<compile_context>
chip_gen: v7x
topology: tpu7x:2x2x1
jax: 0.10.0
libtpu: 0.0.40
codegen_flags: <defaults>
</compile_context>

<pallas_src>
import functools
import math

import jax
import jax.numpy as jnp
from jax.experimental import pallas as pl
from jax.experimental.pallas import tpu as pltpu

# Small, module-consistent shapes.
B, S, IN_DIM, EMBED, HEADS, LAYERS = 2, 8, 16, 32, 4, 2
DH = EMBED // HEADS
EPS = 1e-5
LANES = 128

VMEM_SPEC = pl.BlockSpec(memory_space=pltpu.MemorySpace.VMEM)


# ---------------------------------------------------------------------------
# In-kernel helpers (traced inline inside the single fused kernel).
# ---------------------------------------------------------------------------
def _batch_norm(h, gamma, beta):
    # Training-mode BatchNorm1d over the (batch*seq) axis, per feature.
    mu = jnp.mean(h, axis=0, keepdims=True)
    var = jnp.mean((h - mu) ** 2, axis=0, keepdims=True)
    return (h - mu) * jax.lax.rsqrt(var + EPS) * gamma + beta


# ---------------------------------------------------------------------------
# The single fused kernel: embedding + all encoder layers, no grid.
# `offsets` (static Python dict) maps parameter name -> (row, rows, cols)
# inside the packed (ROWS, 128) slab.
# ---------------------------------------------------------------------------
def encoder_kernel(x_ref, slab_ref, o_ref, *, offsets):
    def g(name):
        off, r, c = offsets[name]
        return slab_ref[off:off + r, :c]          # static, lane-0-anchored slice

    # Embedding linear: (B*S, IN_DIM) @ (IN_DIM, E) + bias.
    x2 = jnp.dot(x_ref[...], g("emb_w"),
                 preferred_element_type=jnp.float32) + g("emb_b")

    for li in range(LAYERS):
        p = lambda n: g(f"L{li}_{n}")

        # --- Multi-head self-attention (per-head static loop, no relayouts) ---
        attn = jnp.zeros((B * S, EMBED), jnp.float32)
        for h in range(HEADS):
            # Per-head projections; 1/sqrt(DH) is pre-folded into wq/bq.
            q = jnp.dot(x2, p(f"wq{h}"), preferred_element_type=jnp.float32) + p(f"bq{h}")
            k = jnp.dot(x2, p(f"wk{h}"), preferred_element_type=jnp.float32) + p(f"bk{h}")
            v = jnp.dot(x2, p(f"wv{h}"), preferred_element_type=jnp.float32) + p(f"bv{h}")
            q3 = q.reshape(B, S, DH)
            k3 = k.reshape(B, S, DH)
            v3 = v.reshape(B, S, DH)

            s = jnp.einsum("bqd,bkd->bqk", q3, k3,
                           preferred_element_type=jnp.float32)       # (B, S, S)
            s = s - jnp.max(s, axis=-1, keepdims=True)
            e = jnp.exp(s)
            prob = e * pl.reciprocal(jnp.sum(e, axis=-1, keepdims=True),
                                     approx=False)
            ctx = jnp.einsum("bqk,bkd->bqd", prob, v3,
                             preferred_element_type=jnp.float32)     # (B, S, DH)

            # Output projection accumulated per head: sum_h ctx_h @ Wo_h.
            attn = attn + jnp.dot(ctx.reshape(B * S, DH), p(f"wo{h}"),
                                  preferred_element_type=jnp.float32)
        attn = attn + p("bo")

        # Residual + BatchNorm1d.
        h1 = _batch_norm(x2 + attn, p("g1"), p("be1"))

        # FFN: Linear(E, 4E) -> ReLU -> Linear(4E, E), residual, BatchNorm1d.
        f = jnp.maximum(
            jnp.dot(h1, p("w1"), preferred_element_type=jnp.float32) + p("b1"), 0.0)
        f = jnp.dot(f, p("w2"), preferred_element_type=jnp.float32) + p("b2")
        x2 = _batch_norm(h1 + f, p("g2"), p("be2"))

    # Single contiguous writeback at the very end.
    o_ref[...] = x2


# ---------------------------------------------------------------------------
# Host-side parameter packing into one (ROWS, 128) f32 slab.
# ---------------------------------------------------------------------------
def pack_params(params):
    entries = []

    def add(name, arr):
        arr = jnp.asarray(arr, jnp.float32)
        if arr.ndim == 1:
            arr = arr[None, :]
        entries.append((name, arr))

    add("emb_w", params["emb_w"])
    add("emb_b", params["emb_b"])
    scale = 1.0 / math.sqrt(DH)
    for li, lp in enumerate(params["layers"]):
        for h in range(HEADS):
            sl = slice(h * DH, (h + 1) * DH)
            add(f"L{li}_wq{h}", lp["wq"][:, sl] * scale)   # scale folded into Q
            add(f"L{li}_bq{h}", lp["bq"][sl] * scale)
            add(f"L{li}_wk{h}", lp["wk"][:, sl])
            add(f"L{li}_bk{h}", lp["bk"][sl])
            add(f"L{li}_wv{h}", lp["wv"][:, sl])
            add(f"L{li}_bv{h}", lp["bv"][sl])
            add(f"L{li}_wo{h}", lp["wo"][sl, :])
        add(f"L{li}_bo", lp["bo"])
        add(f"L{li}_g1", lp["g1"])
        add(f"L{li}_be1", lp["be1"])
        add(f"L{li}_w1", lp["w1"])
        add(f"L{li}_b1", lp["b1"])
        add(f"L{li}_w2", lp["w2"])
        add(f"L{li}_b2", lp["b2"])
        add(f"L{li}_g2", lp["g2"])
        add(f"L{li}_be2", lp["be2"])

    offsets = {}
    blocks = []
    row = 0
    for name, arr in entries:
        r, c = arr.shape
        offsets[name] = (row, r, c)
        blocks.append(jnp.pad(arr, ((0, 0), (0, LANES - c))))
        row += r
    pad_rows = (-row) % 8            # keep the slab row-count (8,128)-friendly
    if pad_rows:
        blocks.append(jnp.zeros((pad_rows, LANES), jnp.float32))
    slab = jnp.concatenate(blocks, axis=0)
    return slab, offsets


def encoder_forward(x, slab, offsets):
    kernel = functools.partial(encoder_kernel, offsets=offsets)
    out = pl.pallas_call(
        kernel,
        out_shape=jax.ShapeDtypeStruct((B * S, EMBED), jnp.float32),
        in_specs=[VMEM_SPEC, VMEM_SPEC],
        out_specs=VMEM_SPEC,
    )(x.reshape(B * S, IN_DIM), slab)
    return out.reshape(B, S, EMBED)


# ---------------------------------------------------------------------------
# Pure-JAX reference (for sanity checking the kernel).
# ---------------------------------------------------------------------------
def _bn_ref(h, g, be):
    mu = jnp.mean(h, axis=(0, 1), keepdims=True)
    var = jnp.mean((h - mu) ** 2, axis=(0, 1), keepdims=True)
    return (h - mu) / jnp.sqrt(var + EPS) * g.reshape(1, 1, -1) + be.reshape(1, 1, -1)


def reference_forward(x, params):
    x = x @ params["emb_w"] + params["emb_b"]
    for lp in params["layers"]:
        def split(t):
            return t.reshape(B, S, HEADS, DH).transpose(0, 2, 1, 3)
        q = split(x @ lp["wq"] + lp["bq"])
        k = split(x @ lp["wk"] + lp["bk"])
        v = split(x @ lp["wv"] + lp["bv"])
        s = jnp.einsum("bhqd,bhkd->bhqk", q, k) / math.sqrt(DH)
        a = jax.nn.softmax(s, axis=-1)
        ctx = jnp.einsum("bhqk,bhkd->bhqd", a, v).transpose(0, 2, 1, 3).reshape(B, S, EMBED)
        attn = ctx @ lp["wo"] + lp["bo"]
        h1 = _bn_ref(x + attn, lp["g1"], lp["be1"])
        f = jnp.maximum(h1 @ lp["w1"] + lp["b1"], 0.0) @ lp["w2"] + lp["b2"]
        x = _bn_ref(h1 + f, lp["g2"], lp["be2"])
    return x


# ---------------------------------------------------------------------------
# Deterministic parameter construction (synthetic, not a checkpoint).
# ---------------------------------------------------------------------------
def make_params(key):
    def lin(k, din, dout):
        kw, kb = jax.random.split(k)
        w = jax.random.normal(kw, (din, dout), jnp.float32) / math.sqrt(din)
        b = jax.random.normal(kb, (dout,), jnp.float32) * 0.01
        return w, b

    keys = jax.random.split(key, 1 + LAYERS)
    emb_w, emb_b = lin(keys[0], IN_DIM, EMBED)
    layers = []
    for li in range(LAYERS):
        lk = jax.random.split(keys[1 + li], 6)
        wq, bq = lin(lk[0], EMBED, EMBED)
        wk, bk = lin(lk[1], EMBED, EMBED)
        wv, bv = lin(lk[2], EMBED, EMBED)
        wo, bo = lin(lk[3], EMBED, EMBED)
        w1, b1 = lin(lk[4], EMBED, 4 * EMBED)
        w2, b2 = lin(lk[5], 4 * EMBED, EMBED)
        layers.append(dict(
            wq=wq, bq=bq, wk=wk, bk=bk, wv=wv, bv=bv, wo=wo, bo=bo,
            w1=w1, b1=b1, w2=w2, b2=b2,
            g1=jnp.ones((EMBED,), jnp.float32), be1=jnp.zeros((EMBED,), jnp.float32),
            g2=jnp.ones((EMBED,), jnp.float32), be2=jnp.zeros((EMBED,), jnp.float32),
        ))
    return dict(emb_w=emb_w, emb_b=emb_b, layers=layers)


if __name__ == "__main__":
    key = jax.random.PRNGKey(0)
    kx, kp = jax.random.split(key)
    x = jax.random.normal(kx, (B, S, IN_DIM), jnp.float32)
    params = make_params(kp)
    slab, offsets = pack_params(params)

    out = jax.block_until_ready(encoder_forward(x, slab, offsets))

    ref = reference_forward(x, params)
    assert out.shape == (B, S, EMBED)
    err = float(jnp.max(jnp.abs(out - ref)))
    assert jnp.allclose(out, ref, atol=2e-3, rtol=2e-3), f"max abs err {err}"

    print("KERNEL_OK")
</pallas_src>

<mosaic_0001>
module attributes {stable_mosaic.version = 11 : i64} {
  func.func @encoder_kernel(%arg0: memref<16x16xf32, #tpu.memory_space<vmem>>, %arg1: memref<1208x128xf32, #tpu.memory_space<vmem>>, %arg2: memref<16x32xf32, #tpu.memory_space<vmem>>) attributes {dimension_semantics = [], scalar_prefetch = 0 : i64, scratch_operands = 0 : i64, tpu.core_type = #tpu.core_type<tc>} {
    %c0 = arith.constant 0 : index
    %c0_0 = arith.constant 0 : index
    %0 = vector.load %arg0[%c0, %c0_0] : memref<16x16xf32, #tpu.memory_space<vmem>>, vector<16x16xf32>
    %c0_1 = arith.constant 0 : index
    %c0_2 = arith.constant 0 : index
    %1 = vector.load %arg1[%c0_1, %c0_2] : memref<1208x128xf32, #tpu.memory_space<vmem>>, vector<16x32xf32>
    %cst = arith.constant dense<0.000000e+00> : vector<16x32xf32>
    %2 = tpu.matmul %0, %1, %cst {dimension_numbers = #tpu.dot_dimension_numbers<[1], [0], [0], [1], [0, 0, 1, 1], [], []>} : vector<16x16xf32>, vector<16x32xf32>, vector<16x32xf32> -> vector<16x32xf32>
    %c16 = arith.constant 16 : index
    %c0_3 = arith.constant 0 : index
    %3 = vector.load %arg1[%c16, %c0_3] : memref<1208x128xf32, #tpu.memory_space<vmem>>, vector<1x32xf32>
    %4 = vector.broadcast %3 : vector<1x32xf32> to vector<16x32xf32>
    %5 = arith.addf %2, %4 : vector<16x32xf32>
    %cst_4 = arith.constant 0.000000e+00 : f32
    %6 = vector.broadcast %cst_4 : f32 to vector<16x32xf32>
    %c17 = arith.constant 17 : index
    %c0_5 = arith.constant 0 : index
    %7 = vector.load %arg1[%c17, %c0_5] : memref<1208x128xf32, #tpu.memory_space<vmem>>, vector<32x8xf32>
    %cst_6 = arith.constant dense<0.000000e+00> : vector<16x8xf32>
    %8 = tpu.matmul %5, %7, %cst_6 {dimension_numbers = #tpu.dot_dimension_numbers<[1], [0], [0], [1], [0, 0, 1, 1], [], []>} : vector<16x32xf32>, vector<32x8xf32>, vector<16x8xf32> -> vector<16x8xf32>
    %c49 = arith.constant 49 : index
    %c0_7 = arith.constant 0 : index
    %9 = vector.load %arg1[%c49, %c0_7] : memref<1208x128xf32, #tpu.memory_space<vmem>>, vector<1x8xf32>
    %10 = vector.broadcast %9 : vector<1x8xf32> to vector<16x8xf32>
    %11 = arith.addf %8, %10 : vector<16x8xf32>
    %c50 = arith.constant 50 : index
    %c0_8 = arith.constant 0 : index
    %12 = vector.load %arg1[%c50, %c0_8] : memref<1208x128xf32, #tpu.memory_space<vmem>>, vector<32x8xf32>
    %cst_9 = arith.constant dense<0.000000e+00> : vector<16x8xf32>
    %13 = tpu.matmul %5, %12, %cst_9 {dimension_numbers = #tpu.dot_dimension_numbers<[1], [0], [0], [1], [0, 0, 1, 1], [], []>} : vector<16x32xf32>, vector<32x8xf32>, vector<16x8xf32> -> vector<16x8xf32>
    %c82 = arith.constant 82 : index
    %c0_10 = arith.constant 0 : index
    %14 = vector.load %arg1[%c82, %c0_10] : memref<1208x128xf32, #tpu.memory_space<vmem>>, vector<1x8xf32>
    %15 = vector.broadcast %14 : vector<1x8xf32> to vector<16x8xf32>
    %16 = arith.addf %13, %15 : vector<16x8xf32>
    %c83 = arith.constant 83 : index
    %c0_11 = arith.constant 0 : index
    %17 = vector.load %arg1[%c83, %c0_11] : memref<1208x128xf32, #tpu.memory_space<vmem>>, vector<32x8xf32>
    %cst_12 = arith.constant dense<0.000000e+00> : vector<16x8xf32>
    %18 = tpu.matmul %5, %17, %cst_12 {dimension_numbers = #tpu.dot_dimension_numbers<[1], [0], [0], [1], [0, 0, 1, 1], [], []>} : vector<16x32xf32>, vector<32x8xf32>, vector<16x8xf32> -> vector<16x8xf32>
    %c115 = arith.constant 115 : index
    %c0_13 = arith.constant 0 : index
    %19 = vector.load %arg1[%c115, %c0_13] : memref<1208x128xf32, #tpu.memory_space<vmem>>, vector<1x8xf32>
    %20 = vector.broadcast %19 : vector<1x8xf32> to vector<16x8xf32>
    %21 = arith.addf %18, %20 : vector<16x8xf32>
    %22 = vector.shape_cast %11 : vector<16x8xf32> to vector<2x8x8xf32>
    %23 = vector.shape_cast %16 : vector<16x8xf32> to vector<2x8x8xf32>
    %24 = vector.shape_cast %21 : vector<16x8xf32> to vector<2x8x8xf32>
    "tpu.trace_start"() <{level = 10 : i32, message = "bqd,bkd->bqk"}> : () -> ()
    %cst_14 = arith.constant dense<0.000000e+00> : vector<2x8x8xf32>
    %25 = tpu.matmul %22, %23, %cst_14 {dimension_numbers = #tpu.dot_dimension_numbers<[2], [2], [1], [1], [0, 0, 0, 1, 1, 1], [0], [0]>} : vector<2x8x8xf32>, vector<2x8x8xf32>, vector<2x8x8xf32> -> vector<2x8x8xf32>
    "tpu.trace_stop"() : () -> ()
    %cst_15 = arith.constant dense<0xFF800000> : vector<2x8xf32>
    %26 = vector.multi_reduction <maximumf>, %25, %cst_15 [2] : vector<2x8x8xf32> to vector<2x8xf32>
    %27 = vector.shape_cast %26 : vector<2x8xf32> to vector<2x8x1xf32>
    %28 = vector.broadcast %27 : vector<2x8x1xf32> to vector<2x8x8xf32>
    %29 = arith.subf %25, %28 : vector<2x8x8xf32>
    %30 = math.exp %29 : vector<2x8x8xf32>
    %cst_16 = arith.constant dense<0.000000e+00> : vector<2x8xf32>
    %31 = vector.multi_reduction <add>, %30, %cst_16 [2] : vector<2x8x8xf32> to vector<2x8xf32>
    %32 = vector.shape_cast %31 : vector<2x8xf32> to vector<2x8x1xf32>
    %33 = tpu.reciprocal %32 : vector<2x8x1xf32> -> vector<2x8x1xf32>
    %34 = vector.broadcast %33 : vector<2x8x1xf32> to vector<2x8x8xf32>
    %35 = arith.mulf %30, %34 : vector<2x8x8xf32>
    "tpu.trace_start"() <{level = 10 : i32, message = "bqk,bkd->bqd"}> : () -> ()
    %cst_17 = arith.constant dense<0.000000e+00> : vector<2x8x8xf32>
    %36 = tpu.matmul %35, %24, %cst_17 {dimension_numbers = #tpu.dot_dimension_numbers<[2], [1], [1], [2], [0, 0, 0, 1, 1, 2], [0], [0]>} : vector<2x8x8xf32>, vector<2x8x8xf32>, vector<2x8x8xf32> -> vector<2x8x8xf32>
    "tpu.trace_stop"() : () -> ()
    %37 = vector.shape_cast %36 : vector<2x8x8xf32> to vector<16x8xf32>
    %c116 = arith.constant 116 : index
    %c0_18 = arith.constant 0 : index
    %38 = vector.load %arg1[%c116, %c0_18] : memref<1208x128xf32, #tpu.memory_space<vmem>>, vector<8x32xf32>
    %cst_19 = arith.constant dense<0.000000e+00> : vector<16x32xf32>
    %39 = tpu.matmul %37, %38, %cst_19 {dimension_numbers = #tpu.dot_dimension_numbers<[1], [0], [0], [1], [0, 0, 1, 1], [], []>} : vector<16x8xf32>, vector<8x32xf32>, vector<16x32xf32> -> vector<16x32xf32>
    %40 = arith.addf %6, %39 : vector<16x32xf32>
    %c124 = arith.constant 124 : index
    %c0_20 = arith.constant 0 : index
    %41 = vector.load %arg1[%c124, %c0_20] : memref<1208x128xf32, #tpu.memory_space<vmem>>, vector<32x8xf32>
    %cst_21 = arith.constant dense<0.000000e+00> : vector<16x8xf32>
    %42 = tpu.matmul %5, %41, %cst_21 {dimension_numbers = #tpu.dot_dimension_numbers<[1], [0], [0], [1], [0, 0, 1, 1], [], []>} : vector<16x32xf32>, vector<32x8xf32>, vector<16x8xf32> -> vector<16x8xf32>
    %c156 = arith.constant 156 : index
    %c0_22 = arith.constant 0 : index
    %43 = vector.load %arg1[%c156, %c0_22] : memref<1208x128xf32, #tpu.memory_space<vmem>>, vector<1x8xf32>
    %44 = vector.broadcast %43 : vector<1x8xf32> to vector<16x8xf32>
    %45 = arith.addf %42, %44 : vector<16x8xf32>
    %c157 = arith.constant 157 : index
    %c0_23 = arith.constant 0 : index
    %46 = vector.load %arg1[%c157, %c0_23] : memref<1208x128xf32, #tpu.memory_space<vmem>>, vector<32x8xf32>
    %cst_24 = arith.constant dense<0.000000e+00> : vector<16x8xf32>
    %47 = tpu.matmul %5, %46, %cst_24 {dimension_numbers = #tpu.dot_dimension_numbers<[1], [0], [0], [1], [0, 0, 1, 1], [], []>} : vector<16x32xf32>, vector<32x8xf32>, vector<16x8xf32> -> vector<16x8xf32>
    %c189 = arith.constant 189 : index
    %c0_25 = arith.constant 0 : index
    %48 = vector.load %arg1[%c189, %c0_25] : memref<1208x128xf32, #tpu.memory_space<vmem>>, vector<1x8xf32>
    %49 = vector.broadcast %48 : vector<1x8xf32> to vector<16x8xf32>
    %50 = arith.addf %47, %49 : vector<16x8xf32>
    %c190 = arith.constant 190 : index
    %c0_26 = arith.constant 0 : index
    %51 = vector.load %arg1[%c190, %c0_26] : memref<1208x128xf32, #tpu.memory_space<vmem>>, vector<32x8xf32>
    %cst_27 = arith.constant dense<0.000000e+00> : vector<16x8xf32>
    %52 = tpu.matmul %5, %51, %cst_27 {dimension_numbers = #tpu.dot_dimension_numbers<[1], [0], [0], [1], [0, 0, 1, 1], [], []>} : vector<16x32xf32>, vector<32x8xf32>, vector<16x8xf32> -> vector<16x8xf32>
    %c222 = arith.constant 222 : index
    %c0_28 = arith.constant 0 : index
    %53 = vector.load %arg1[%c222, %c0_28] : memref<1208x128xf32, #tpu.memory_space<vmem>>, vector<1x8xf32>
    %54 = vector.broadcast %53 : vector<1x8xf32> to vector<16x8xf32>
    %55 = arith.addf %52, %54 : vector<16x8xf32>
    %56 = vector.shape_cast %45 : vector<16x8xf32> to vector<2x8x8xf32>
    %57 = vector.shape_cast %50 : vector<16x8xf32> to vector<2x8x8xf32>
    %58 = vector.shape_cast %55 : vector<16x8xf32> to vector<2x8x8xf32>
    "tpu.trace_start"() <{level = 10 : i32, message = "bqd,bkd->bqk"}> : () -> ()
    %cst_29 = arith.constant dense<0.000000e+00> : vector<2x8x8xf32>
    %59 = tpu.matmul %56, %57, %cst_29 {dimension_numbers = #tpu.dot_dimension_numbers<[2], [2], [1], [1], [0, 0, 0, 1, 1, 1], [0], [0]>} : vector<2x8x8xf32>, vector<2x8x8xf32>, vector<2x8x8xf32> -> vector<2x8x8xf32>
    "tpu.trace_stop"() : () -> ()
    %cst_30 = arith.constant dense<0xFF800000> : vector<2x8xf32>
    %60 = vector.multi_reduction <maximumf>, %59, %cst_30 [2] : vector<2x8x8xf32> to vector<2x8xf32>
    %61 = vector.shape_cast %60 : vector<2x8xf32> to vector<2x8x1xf32>
    %62 = vector.broadcast %61 : vector<2x8x1xf32> to vector<2x8x8xf32>
    %63 = arith.subf %59, %62 : vector<2x8x8xf32>
    %64 = math.exp %63 : vector<2x8x8xf32>
    %cst_31 = arith.constant dense<0.000000e+00> : vector<2x8xf32>
    %65 = vector.multi_reduction <add>, %64, %cst_31 [2] : vector<2x8x8xf32> to vector<2x8xf32>
    %66 = vector.shape_cast %65 : vector<2x8xf32> to vector<2x8x1xf32>
    %67 = tpu.reciprocal %66 : vector<2x8x1xf32> -> vector<2x8x1xf32>
    %68 = vector.broadcast %67 : vector<2x8x1xf32> to vector<2x8x8xf32>
    %69 = arith.mulf %64, %68 : vector<2x8x8xf32>
    "tpu.trace_start"() <{level = 10 : i32, message = "bqk,bkd->bqd"}> : () -> ()
    %cst_32 = arith.constant dense<0.000000e+00> : vector<2x8x8xf32>
    %70 = tpu.matmul %69, %58, %cst_32 {dimension_numbers = #tpu.dot_dimension_numbers<[2], [1], [1], [2], [0, 0, 0, 1, 1, 2], [0], [0]>} : vector<2x8x8xf32>, vector<2x8x8xf32>, vector<2x8x8xf32> -> vector<2x8x8xf32>
    "tpu.trace_stop"() : () -> ()
    %71 = vector.shape_cast %70 : vector<2x8x8xf32> to vector<16x8xf32>
    %c223 = arith.constant 223 : index
    %c0_33 = arith.constant 0 : index
    %72 = vector.load %arg1[%c223, %c0_33] : memref<1208x128xf32, #tpu.memory_space<vmem>>, vector<8x32xf32>
    %cst_34 = arith.constant dense<0.000000e+00> : vector<16x32xf32>
    %73 = tpu.matmul %71, %72, %cst_34 {dimension_numbers = #tpu.dot_dimension_numbers<[1], [0], [0], [1], [0, 0, 1, 1], [], []>} : vector<16x8xf32>, vector<8x32xf32>, vector<16x32xf32> -> vector<16x32xf32>
    %74 = arith.addf %40, %73 : vector<16x32xf32>
    %c231 = arith.constant 231 : index
    %c0_35 = arith.constant 0 : index
    %75 = vector.load %arg1[%c231, %c0_35] : memref<1208x128xf32, #tpu.memory_space<vmem>>, vector<32x8xf32>
    %cst_36 = arith.constant dense<0.000000e+00> : vector<16x8xf32>
    %76 = tpu.matmul %5, %75, %cst_36 {dimension_numbers = #tpu.dot_dimension_numbers<[1], [0], [0], [1], [0, 0, 1, 1], [], []>} : vector<16x32xf32>, vector<32x8xf32>, vector<16x8xf32> -> vector<16x8xf32>
    %c263 = arith.constant 263 : index
    %c0_37 = arith.constant 0 : index
    %77 = vector.load %arg1[%c263, %c0_37] : memref<1208x128xf32, #tpu.memory_space<vmem>>, vector<1x8xf32>
    %78 = vector.broadcast %77 : vector<1x8xf32> to vector<16x8xf32>
    %79 = arith.addf %76, %78 : vector<16x8xf32>
    %c264 = arith.constant 264 : index
    %c0_38 = arith.constant 0 : index
    %80 = vector.load %arg1[%c264, %c0_38] : memref<1208x128xf32, #tpu.memory_space<vmem>>, vector<32x8xf32>
    %cst_39 = arith.constant dense<0.000000e+00> : vector<16x8xf32>
    %81 = tpu.matmul %5, %80, %cst_39 {dimension_numbers = #tpu.dot_dimension_numbers<[1], [0], [0], [1], [0, 0, 1, 1], [], []>} : vector<16x32xf32>, vector<32x8xf32>, vector<16x8xf32> -> vector<16x8xf32>
    %c296 = arith.constant 296 : index
    %c0_40 = arith.constant 0 : index
    %82 = vector.load %arg1[%c296, %c0_40] : memref<1208x128xf32, #tpu.memory_space<vmem>>, vector<1x8xf32>
    %83 = vector.broadcast %82 : vector<1x8xf32> to vector<16x8xf32>
    %84 = arith.addf %81, %83 : vector<16x8xf32>
    %c297 = arith.constant 297 : index
    %c0_41 = arith.constant 0 : index
    %85 = vector.load %arg1[%c297, %c0_41] : memref<1208x128xf32, #tpu.memory_space<vmem>>, vector<32x8xf32>
    %cst_42 = arith.constant dense<0.000000e+00> : vector<16x8xf32>
    %86 = tpu.matmul %5, %85, %cst_42 {dimension_numbers = #tpu.dot_dimension_numbers<[1], [0], [0], [1], [0, 0, 1, 1], [], []>} : vector<16x32xf32>, vector<32x8xf32>, vector<16x8xf32> -> vector<16x8xf32>
    %c329 = arith.constant 329 : index
    %c0_43 = arith.constant 0 : index
    %87 = vector.load %arg1[%c329, %c0_43] : memref<1208x128xf32, #tpu.memory_space<vmem>>, vector<1x8xf32>
    %88 = vector.broadcast %87 : vector<1x8xf32> to vector<16x8xf32>
    %89 = arith.addf %86, %88 : vector<16x8xf32>
    %90 = vector.shape_cast %79 : vector<16x8xf32> to vector<2x8x8xf32>
    %91 = vector.shape_cast %84 : vector<16x8xf32> to vector<2x8x8xf32>
    %92 = vector.shape_cast %89 : vector<16x8xf32> to vector<2x8x8xf32>
    "tpu.trace_start"() <{level = 10 : i32, message = "bqd,bkd->bqk"}> : () -> ()
    %cst_44 = arith.constant dense<0.000000e+00> : vector<2x8x8xf32>
    %93 = tpu.matmul %90, %91, %cst_44 {dimension_numbers = #tpu.dot_dimension_numbers<[2], [2], [1], [1], [0, 0, 0, 1, 1, 1], [0], [0]>} : vector<2x8x8xf32>, vector<2x8x8xf32>, vector<2x8x8xf32> -> vector<2x8x8xf32>
    "tpu.trace_stop"() : () -> ()
    %cst_45 = arith.constant dense<0xFF800000> : vector<2x8xf32>
    %94 = vector.multi_reduction <maximumf>, %93, %cst_45 [2] : vector<2x8x8xf32> to vector<2x8xf32>
    %95 = vector.shape_cast %94 : vector<2x8xf32> to vector<2x8x1xf32>
    %96 = vector.broadcast %95 : vector<2x8x1xf32> to vector<2x8x8xf32>
    %97 = arith.subf %93, %96 : vector<2x8x8xf32>
    %98 = math.exp %97 : vector<2x8x8xf32>
    %cst_46 = arith.constant dense<0.000000e+00> : vector<2x8xf32>
    %99 = vector.multi_reduction <add>, %98, %cst_46 [2] : vector<2x8x8xf32> to vector<2x8xf32>
    %100 = vector.shape_cast %99 : vector<2x8xf32> to vector<2x8x1xf32>
    %101 = tpu.reciprocal %100 : vector<2x8x1xf32> -> vector<2x8x1xf32>
    %102 = vector.broadcast %101 : vector<2x8x1xf32> to vector<2x8x8xf32>
    %103 = arith.mulf %98, %102 : vector<2x8x8xf32>
    "tpu.trace_start"() <{level = 10 : i32, message = "bqk,bkd->bqd"}> : () -> ()
    %cst_47 = arith.constant dense<0.000000e+00> : vector<2x8x8xf32>
    %104 = tpu.matmul %103, %92, %cst_47 {dimension_numbers = #tpu.dot_dimension_numbers<[2], [1], [1], [2], [0, 0, 0, 1, 1, 2], [0], [0]>} : vector<2x8x8xf32>, vector<2x8x8xf32>, vector<2x8x8xf32> -> vector<2x8x8xf32>
    "tpu.trace_stop"() : () -> ()
    %105 = vector.shape_cast %104 : vector<2x8x8xf32> to vector<16x8xf32>
    %c330 = arith.constant 330 : index
    %c0_48 = arith.constant 0 : index
    %106 = vector.load %arg1[%c330, %c0_48] : memref<1208x128xf32, #tpu.memory_space<vmem>>, vector<8x32xf32>
    %cst_49 = arith.constant dense<0.000000e+00> : vector<16x32xf32>
    %107 = tpu.matmul %105, %106, %cst_49 {dimension_numbers = #tpu.dot_dimension_numbers<[1], [0], [0], [1], [0, 0, 1, 1], [], []>} : vector<16x8xf32>, vector<8x32xf32>, vector<16x32xf32> -> vector<16x32xf32>
    %108 = arith.addf %74, %107 : vector<16x32xf32>
    %c338 = arith.constant 338 : index
    %c0_50 = arith.constant 0 : index
    %109 = vector.load %arg1[%c338, %c0_50] : memref<1208x128xf32, #tpu.memory_space<vmem>>, vector<32x8xf32>
    %cst_51 = arith.constant dense<0.000000e+00> : vector<16x8xf32>
    %110 = tpu.matmul %5, %109, %cst_51 {dimension_numbers = #tpu.dot_dimension_numbers<[1], [0], [0], [1], [0, 0, 1, 1], [], []>} : vector<16x32xf32>, vector<32x8xf32>, vector<16x8xf32> -> vector<16x8xf32>
    %c370 = arith.constant 370 : index
    %c0_52 = arith.constant 0 : index
    %111 = vector.load %arg1[%c370, %c0_52] : memref<1208x128xf32, #tpu.memory_space<vmem>>, vector<1x8xf32>
    %112 = vector.broadcast %111 : vector<1x8xf32> to vector<16x8xf32>
    %113 = arith.addf %110, %112 : vector<16x8xf32>
    %c371 = arith.constant 371 : index
    %c0_53 = arith.constant 0 : index
    %114 = vector.load %arg1[%c371, %c0_53] : memref<1208x128xf32, #tpu.memory_space<vmem>>, vector<32x8xf32>
    %cst_54 = arith.constant dense<0.000000e+00> : vector<16x8xf32>
    %115 = tpu.matmul %5, %114, %cst_54 {dimension_numbers = #tpu.dot_dimension_numbers<[1], [0], [0], [1], [0, 0, 1, 1], [], []>} : vector<16x32xf32>, vector<32x8xf32>, vector<16x8xf32> -> vector<16x8xf32>
    %c403 = arith.constant 403 : index
    %c0_55 = arith.constant 0 : index
    %116 = vector.load %arg1[%c403, %c0_55] : memref<1208x128xf32, #tpu.memory_space<vmem>>, vector<1x8xf32>
    %117 = vector.broadcast %116 : vector<1x8xf32> to vector<16x8xf32>
    %118 = arith.addf %115, %117 : vector<16x8xf32>
    %c404 = arith.constant 404 : index
    %c0_56 = arith.constant 0 : index
    %119 = vector.load %arg1[%c404, %c0_56] : memref<1208x128xf32, #tpu.memory_space<vmem>>, vector<32x8xf32>
    %cst_57 = arith.constant dense<0.000000e+00> : vector<16x8xf32>
    %120 = tpu.matmul %5, %119, %cst_57 {dimension_numbers = #tpu.dot_dimension_numbers<[1], [0], [0], [1], [0, 0, 1, 1], [], []>} : vector<16x32xf32>, vector<32x8xf32>, vector<16x8xf32> -> vector<16x8xf32>
    %c436 = arith.constant 436 : index
    %c0_58 = arith.constant 0 : index
    %121 = vector.load %arg1[%c436, %c0_58] : memref<1208x128xf32, #tpu.memory_space<vmem>>, vector<1x8xf32>
    %122 = vector.broadcast %121 : vector<1x8xf32> to vector<16x8xf32>
    %123 = arith.addf %120, %122 : vector<16x8xf32>
    %124 = vector.shape_cast %113 : vector<16x8xf32> to vector<2x8x8xf32>
    %125 = vector.shape_cast %118 : vector<16x8xf32> to vector<2x8x8xf32>
    %126 = vector.shape_cast %123 : vector<16x8xf32> to vector<2x8x8xf32>
    "tpu.trace_start"() <{level = 10 : i32, message = "bqd,bkd->bqk"}> : () -> ()
    %cst_59 = arith.constant dense<0.000000e+00> : vector<2x8x8xf32>
    %127 = tpu.matmul %124, %125, %cst_59 {dimension_numbers = #tpu.dot_dimension_numbers<[2], [2], [1], [1], [0, 0, 0, 1, 1, 1], [0], [0]>} : vector<2x8x8xf32>, vector<2x8x8xf32>, vector<2x8x8xf32> -> vector<2x8x8xf32>
    "tpu.trace_stop"() : () -> ()
    %cst_60 = arith.constant dense<0xFF800000> : vector<2x8xf32>
    %128 = vector.multi_reduction <maximumf>, %127, %cst_60 [2] : vector<2x8x8xf32> to vector<2x8xf32>
    %129 = vector.shape_cast %128 : vector<2x8xf32> to vector<2x8x1xf32>
    %130 = vector.broadcast %129 : vector<2x8x1xf32> to vector<2x8x8xf32>
    %131 = arith.subf %127, %130 : vector<2x8x8xf32>
    %132 = math.exp %131 : vector<2x8x8xf32>
    %cst_61 = arith.constant dense<0.000000e+00> : vector<2x8xf32>
    %133 = vector.multi_reduction <add>, %132, %cst_61 [2] : vector<2x8x8xf32> to vector<2x8xf32>
    %134 = vector.shape_cast %133 : vector<2x8xf32> to vector<2x8x1xf32>
    %135 = tpu.reciprocal %134 : vector<2x8x1xf32> -> vector<2x8x1xf32>
    %136 = vector.broadcast %135 : vector<2x8x1xf32> to vector<2x8x8xf32>
    %137 = arith.mulf %132, %136 : vector<2x8x8xf32>
    "tpu.trace_start"() <{level = 10 : i32, message = "bqk,bkd->bqd"}> : () -> ()
    %cst_62 = arith.constant dense<0.000000e+00> : vector<2x8x8xf32>
    %138 = tpu.matmul %137, %126, %cst_62 {dimension_numbers = #tpu.dot_dimension_numbers<[2], [1], [1], [2], [0, 0, 0, 1, 1, 2], [0], [0]>} : vector<2x8x8xf32>, vector<2x8x8xf32>, vector<2x8x8xf32> -> vector<2x8x8xf32>
    "tpu.trace_stop"() : () -> ()
    %139 = vector.shape_cast %138 : vector<2x8x8xf32> to vector<16x8xf32>
    %c437 = arith.constant 437 : index
    %c0_63 = arith.constant 0 : index
    %140 = vector.load %arg1[%c437, %c0_63] : memref<1208x128xf32, #tpu.memory_space<vmem>>, vector<8x32xf32>
    %cst_64 = arith.constant dense<0.000000e+00> : vector<16x32xf32>
    %141 = tpu.matmul %139, %140, %cst_64 {dimension_numbers = #tpu.dot_dimension_numbers<[1], [0], [0], [1], [0, 0, 1, 1], [], []>} : vector<16x8xf32>, vector<8x32xf32>, vector<16x32xf32> -> vector<16x32xf32>
    %142 = arith.addf %108, %141 : vector<16x32xf32>
    %c445 = arith.constant 445 : index
    %c0_65 = arith.constant 0 : index
    %143 = vector.load %arg1[%c445, %c0_65] : memref<1208x128xf32, #tpu.memory_space<vmem>>, vector<1x32xf32>
    %144 = vector.broadcast %143 : vector<1x32xf32> to vector<16x32xf32>
    %145 = arith.addf %142, %144 : vector<16x32xf32>
    %146 = arith.addf %5, %145 : vector<16x32xf32>
    %c446 = arith.constant 446 : index
    %c0_66 = arith.constant 0 : index
    %147 = vector.load %arg1[%c446, %c0_66] : memref<1208x128xf32, #tpu.memory_space<vmem>>, vector<1x32xf32>
    %c447 = arith.constant 447 : index
    %c0_67 = arith.constant 0 : index
    %148 = vector.load %arg1[%c447, %c0_67] : memref<1208x128xf32, #tpu.memory_space<vmem>>, vector<1x32xf32>
    %cst_68 = arith.constant dense<0.000000e+00> : vector<32xf32>
    %149 = vector.multi_reduction <add>, %146, %cst_68 [0] : vector<16x32xf32> to vector<32xf32>
    %150 = vector.shape_cast %149 : vector<32xf32> to vector<1x32xf32>
    %cst_69 = arith.constant 1.600000e+01 : f32
    %151 = vector.broadcast %cst_69 : f32 to vector<1x32xf32>
    %152 = arith.divf %150, %151 : vector<1x32xf32>
    %153 = vector.broadcast %152 : vector<1x32xf32> to vector<16x32xf32>
    %154 = arith.subf %146, %153 : vector<16x32xf32>
    %155 = arith.mulf %154, %154 : vector<16x32xf32>
    %cst_70 = arith.constant dense<0.000000e+00> : vector<32xf32>
    %156 = vector.multi_reduction <add>, %155, %cst_70 [0] : vector<16x32xf32> to vector<32xf32>
    %157 = vector.shape_cast %156 : vector<32xf32> to vector<1x32xf32>
    %cst_71 = arith.constant 1.600000e+01 : f32
    %158 = vector.broadcast %cst_71 : f32 to vector<1x32xf32>
    %159 = arith.divf %157, %158 : vector<1x32xf32>
    %160 = vector.broadcast %152 : vector<1x32xf32> to vector<16x32xf32>
    %161 = arith.subf %146, %160 : vector<16x32xf32>
    %cst_72 = arith.constant 9.99999974E-6 : f32
    %162 = vector.broadcast %cst_72 : f32 to vector<1x32xf32>
    %163 = arith.addf %159, %162 : vector<1x32xf32>
    %164 = math.rsqrt %163 : vector<1x32xf32>
    %165 = vector.broadcast %164 : vector<1x32xf32> to vector<16x32xf32>
    %166 = arith.mulf %161, %165 : vector<16x32xf32>
    %167 = vector.broadcast %147 : vector<1x32xf32> to vector<16x32xf32>
    %168 = arith.mulf %166, %167 : vector<16x32xf32>
    %169 = vector.broadcast %148 : vector<1x32xf32> to vector<16x32xf32>
    %170 = arith.addf %168, %169 : vector<16x32xf32>
    %c448 = arith.constant 448 : index
    %c0_73 = arith.constant 0 : index
    %171 = vector.load %arg1[%c448, %c0_73] : memref<1208x128xf32, #tpu.memory_space<vmem>>, vector<32x128xf32>
    %cst_74 = arith.constant dense<0.000000e+00> : vector<16x128xf32>
    %172 = tpu.matmul %170, %171, %cst_74 {dimension_numbers = #tpu.dot_dimension_numbers<[1], [0], [0], [1], [0, 0, 1, 1], [], []>} : vector<16x32xf32>, vector<32x128xf32>, vector<16x128xf32> -> vector<16x128xf32>
    %c480 = arith.constant 480 : index
    %c0_75 = arith.constant 0 : index
    %173 = vector.load %arg1[%c480, %c0_75] : memref<1208x128xf32, #tpu.memory_space<vmem>>, vector<1x128xf32>
    %174 = vector.broadcast %173 : vector<1x128xf32> to vector<16x128xf32>
    %175 = arith.addf %172, %174 : vector<16x128xf32>
    %cst_76 = arith.constant 0.000000e+00 : f32
    %176 = vector.broadcast %cst_76 : f32 to vector<16x128xf32>
    %177 = arith.maximumf %175, %176 : vector<16x128xf32>
    %c481 = arith.constant 481 : index
    %c0_77 = arith.constant 0 : index
    %178 = vector.load %arg1[%c481, %c0_77] : memref<1208x128xf32, #tpu.memory_space<vmem>>, vector<128x32xf32>
    %cst_78 = arith.constant dense<0.000000e+00> : vector<16x32xf32>
    %179 = tpu.matmul %177, %178, %cst_78 {dimension_numbers = #tpu.dot_dimension_numbers<[1], [0], [0], [1], [0, 0, 1, 1], [], []>} : vector<16x128xf32>, vector<128x32xf32>, vector<16x32xf32> -> vector<16x32xf32>
    %c609 = arith.constant 609 : index
    %c0_79 = arith.constant 0 : index
    %180 = vector.load %arg1[%c609, %c0_79] : memref<1208x128xf32, #tpu.memory_space<vmem>>, vector<1x32xf32>
    %181 = vector.broadcast %180 : vector<1x32xf32> to vector<16x32xf32>
    %182 = arith.addf %179, %181 : vector<16x32xf32>
    %183 = arith.addf %170, %182 : vector<16x32xf32>
    %c610 = arith.constant 610 : index
    %c0_80 = arith.constant 0 : index
    %184 = vector.load %arg1[%c610, %c0_80] : memref<1208x128xf32, #tpu.memory_space<vmem>>, vector<1x32xf32>
    %c611 = arith.constant 611 : index
    %c0_81 = arith.constant 0 : index
    %185 = vector.load %arg1[%c611, %c0_81] : memref<1208x128xf32, #tpu.memory_space<vmem>>, vector<1x32xf32>
    %cst_82 = arith.constant dense<0.000000e+00> : vector<32xf32>
    %186 = vector.multi_reduction <add>, %183, %cst_82 [0] : vector<16x32xf32> to vector<32xf32>
    %187 = vector.shape_cast %186 : vector<32xf32> to vector<1x32xf32>
    %cst_83 = arith.constant 1.600000e+01 : f32
    %188 = vector.broadcast %cst_83 : f32 to vector<1x32xf32>
    %189 = arith.divf %187, %188 : vector<1x32xf32>
    %190 = vector.broadcast %189 : vector<1x32xf32> to vector<16x32xf32>
    %191 = arith.subf %183, %190 : vector<16x32xf32>
    %192 = arith.mulf %191, %191 : vector<16x32xf32>
    %cst_84 = arith.constant dense<0.000000e+00> : vector<32xf32>
    %193 = vector.multi_reduction <add>, %192, %cst_84 [0] : vector<16x32xf32> to vector<32xf32>
    %194 = vector.shape_cast %193 : vector<32xf32> to vector<1x32xf32>
    %cst_85 = arith.constant 1.600000e+01 : f32
    %195 = vector.broadcast %cst_85 : f32 to vector<1x32xf32>
    %196 = arith.divf %194, %195 : vector<1x32xf32>
    %197 = vector.broadcast %189 : vector<1x32xf32> to vector<16x32xf32>
    %198 = arith.subf %183, %197 : vector<16x32xf32>
    %cst_86 = arith.constant 9.99999974E-6 : f32
    %199 = vector.broadcast %cst_86 : f32 to vector<1x32xf32>
    %200 = arith.addf %196, %199 : vector<1x32xf32>
    %201 = math.rsqrt %200 : vector<1x32xf32>
    %202 = vector.broadcast %201 : vector<1x32xf32> to vector<16x32xf32>
    %203 = arith.mulf %198, %202 : vector<16x32xf32>
    %204 = vector.broadcast %184 : vector<1x32xf32> to vector<16x32xf32>
    %205 = arith.mulf %203, %204 : vector<16x32xf32>
    %206 = vector.broadcast %185 : vector<1x32xf32> to vector<16x32xf32>
    %207 = arith.addf %205, %206 : vector<16x32xf32>
    %cst_87 = arith.constant 0.000000e+00 : f32
    %208 = vector.broadcast %cst_87 : f32 to vector<16x32xf32>
    %c612 = arith.constant 612 : index
    %c0_88 = arith.constant 0 : index
    %209 = vector.load %arg1[%c612, %c0_88] : memref<1208x128xf32, #tpu.memory_space<vmem>>, vector<32x8xf32>
    %cst_89 = arith.constant dense<0.000000e+00> : vector<16x8xf32>
    %210 = tpu.matmul %207, %209, %cst_89 {dimension_numbers = #tpu.dot_dimension_numbers<[1], [0], [0], [1], [0, 0, 1, 1], [], []>} : vector<16x32xf32>, vector<32x8xf32>, vector<16x8xf32> -> vector<16x8xf32>
    %c644 = arith.constant 644 : index
    %c0_90 = arith.constant 0 : index
    %211 = vector.load %arg1[%c644, %c0_90] : memref<1208x128xf32, #tpu.memory_space<vmem>>, vector<1x8xf32>
    %212 = vector.broadcast %211 : vector<1x8xf32> to vector<16x8xf32>
    %213 = arith.addf %210, %212 : vector<16x8xf32>
    %c645 = arith.constant 645 : index
    %c0_91 = arith.constant 0 : index
    %214 = vector.load %arg1[%c645, %c0_91] : memref<1208x128xf32, #tpu.memory_space<vmem>>, vector<32x8xf32>
    %cst_92 = arith.constant dense<0.000000e+00> : vector<16x8xf32>
    %215 = tpu.matmul %207, %214, %cst_92 {dimension_numbers = #tpu.dot_dimension_numbers<[1], [0], [0], [1], [0, 0, 1, 1], [], []>} : vector<16x32xf32>, vector<32x8xf32>, vector<16x8xf32> -> vector<16x8xf32>
    %c677 = arith.constant 677 : index
    %c0_93 = arith.constant 0 : index
    %216 = vector.load %arg1[%c677, %c0_93] : memref<1208x128xf32, #tpu.memory_space<vmem>>, vector<1x8xf32>
    %217 = vector.broadcast %216 : vector<1x8xf32> to vector<16x8xf32>
    %218 = arith.addf %215, %217 : vector<16x8xf32>
    %c678 = arith.constant 678 : index
    %c0_94 = arith.constant 0 : index
    %219 = vector.load %arg1[%c678, %c0_94] : memref<1208x128xf32, #tpu.memory_space<vmem>>, vector<32x8xf32>
    %cst_95 = arith.constant dense<0.000000e+00> : vector<16x8xf32>
    %220 = tpu.matmul %207, %219, %cst_95 {dimension_numbers = #tpu.dot_dimension_numbers<[1], [0], [0], [1], [0, 0, 1, 1], [], []>} : vector<16x32xf32>, vector<32x8xf32>, vector<16x8xf32> -> vector<16x8xf32>
    %c710 = arith.constant 710 : index
    %c0_96 = arith.constant 0 : index
    %221 = vector.load %arg1[%c710, %c0_96] : memref<1208x128xf32, #tpu.memory_space<vmem>>, vector<1x8xf32>
    %222 = vector.broadcast %221 : vector<1x8xf32> to vector<16x8xf32>
    %223 = arith.addf %220, %222 : vector<16x8xf32>
    %224 = vector.shape_cast %213 : vector<16x8xf32> to vector<2x8x8xf32>
    %225 = vector.shape_cast %218 : vector<16x8xf32> to vector<2x8x8xf32>
    %226 = vector.shape_cast %223 : vector<16x8xf32> to vector<2x8x8xf32>
    "tpu.trace_start"() <{level = 10 : i32, message = "bqd,bkd->bqk"}> : () -> ()
    %cst_97 = arith.constant dense<0.000000e+00> : vector<2x8x8xf32>
    %227 = tpu.matmul %224, %225, %cst_97 {dimension_numbers = #tpu.dot_dimension_numbers<[2], [2], [1], [1], [0, 0, 0, 1, 1, 1], [0], [0]>} : vector<2x8x8xf32>, vector<2x8x8xf32>, vector<2x8x8xf32> -> vector<2x8x8xf32>
    "tpu.trace_stop"() : () -> ()
    %cst_98 = arith.constant dense<0xFF800000> : vector<2x8xf32>
    %228 = vector.multi_reduction <maximumf>, %227, %cst_98 [2] : vector<2x8x8xf32> to vector<2x8xf32>
    %229 = vector.shape_cast %228 : vector<2x8xf32> to vector<2x8x1xf32>
    %230 = vector.broadcast %229 : vector<2x8x1xf32> to vector<2x8x8xf32>
    %231 = arith.subf %227, %230 : vector<2x8x8xf32>
    %232 = math.exp %231 : vector<2x8x8xf32>
    %cst_99 = arith.constant dense<0.000000e+00> : vector<2x8xf32>
    %233 = vector.multi_reduction <add>, %232, %cst_99 [2] : vector<2x8x8xf32> to vector<2x8xf32>
    %234 = vector.shape_cast %233 : vector<2x8xf32> to vector<2x8x1xf32>
    %235 = tpu.reciprocal %234 : vector<2x8x1xf32> -> vector<2x8x1xf32>
    %236 = vector.broadcast %235 : vector<2x8x1xf32> to vector<2x8x8xf32>
    %237 = arith.mulf %232, %236 : vector<2x8x8xf32>
    "tpu.trace_start"() <{level = 10 : i32, message = "bqk,bkd->bqd"}> : () -> ()
    %cst_100 = arith.constant dense<0.000000e+00> : vector<2x8x8xf32>
    %238 = tpu.matmul %237, %226, %cst_100 {dimension_numbers = #tpu.dot_dimension_numbers<[2], [1], [1], [2], [0, 0, 0, 1, 1, 2], [0], [0]>} : vector<2x8x8xf32>, vector<2x8x8xf32>, vector<2x8x8xf32> -> vector<2x8x8xf32>
    "tpu.trace_stop"() : () -> ()
    %239 = vector.shape_cast %238 : vector<2x8x8xf32> to vector<16x8xf32>
    %c711 = arith.constant 711 : index
    %c0_101 = arith.constant 0 : index
    %240 = vector.load %arg1[%c711, %c0_101] : memref<1208x128xf32, #tpu.memory_space<vmem>>, vector<8x32xf32>
    %cst_102 = arith.constant dense<0.000000e+00> : vector<16x32xf32>
    %241 = tpu.matmul %239, %240, %cst_102 {dimension_numbers = #tpu.dot_dimension_numbers<[1], [0], [0], [1], [0, 0, 1, 1], [], []>} : vector<16x8xf32>, vector<8x32xf32>, vector<16x32xf32> -> vector<16x32xf32>
    %242 = arith.addf %208, %241 : vector<16x32xf32>
    %c719 = arith.constant 719 : index
    %c0_103 = arith.constant 0 : index
    %243 = vector.load %arg1[%c719, %c0_103] : memref<1208x128xf32, #tpu.memory_space<vmem>>, vector<32x8xf32>
    %cst_104 = arith.constant dense<0.000000e+00> : vector<16x8xf32>
    %244 = tpu.matmul %207, %243, %cst_104 {dimension_numbers = #tpu.dot_dimension_numbers<[1], [0], [0], [1], [0, 0, 1, 1], [], []>} : vector<16x32xf32>, vector<32x8xf32>, vector<16x8xf32> -> vector<16x8xf32>
    %c751 = arith.constant 751 : index
    %c0_105 = arith.constant 0 : index
    %245 = vector.load %arg1[%c751, %c0_105] : memref<1208x128xf32, #tpu.memory_space<vmem>>, vector<1x8xf32>
    %246 = vector.broadcast %245 : vector<1x8xf32> to vector<16x8xf32>
    %247 = arith.addf %244, %246 : vector<16x8xf32>
    %c752 = arith.constant 752 : index
    %c0_106 = arith.constant 0 : index
    %248 = vector.load %arg1[%c752, %c0_106] : memref<1208x128xf32, #tpu.memory_space<vmem>>, vector<32x8xf32>
    %cst_107 = arith.constant dense<0.000000e+00> : vector<16x8xf32>
    %249 = tpu.matmul %207, %248, %cst_107 {dimension_numbers = #tpu.dot_dimension_numbers<[1], [0], [0], [1], [0, 0, 1, 1], [], []>} : vector<16x32xf32>, vector<32x8xf32>, vector<16x8xf32> -> vector<16x8xf32>
    %c784 = arith.constant 784 : index
    %c0_108 = arith.constant 0 : index
    %250 = vector.load %arg1[%c784, %c0_108] : memref<1208x128xf32, #tpu.memory_space<vmem>>, vector<1x8xf32>
    %251 = vector.broadcast %250 : vector<1x8xf32> to vector<16x8xf32>
    %252 = arith.addf %249, %251 : vector<16x8xf32>
    %c785 = arith.constant 785 : index
    %c0_109 = arith.constant 0 : index
    %253 = vector.load %arg1[%c785, %c0_109] : memref<1208x128xf32, #tpu.memory_space<vmem>>, vector<32x8xf32>
    %cst_110 = arith.constant dense<0.000000e+00> : vector<16x8xf32>
    %254 = tpu.matmul %207, %253, %cst_110 {dimension_numbers = #tpu.dot_dimension_numbers<[1], [0], [0], [1], [0, 0, 1, 1], [], []>} : vector<16x32xf32>, vector<32x8xf32>, vector<16x8xf32> -> vector<16x8xf32>
    %c817 = arith.constant 817 : index
    %c0_111 = arith.constant 0 : index
    %255 = vector.load %arg1[%c817, %c0_111] : memref<1208x128xf32, #tpu.memory_space<vmem>>, vector<1x8xf32>
    %256 = vector.broadcast %255 : vector<1x8xf32> to vector<16x8xf32>
    %257 = arith.addf %254, %256 : vector<16x8xf32>
    %258 = vector.shape_cast %247 : vector<16x8xf32> to vector<2x8x8xf32>
    %259 = vector.shape_cast %252 : vector<16x8xf32> to vector<2x8x8xf32>
    %260 = vector.shape_cast %257 : vector<16x8xf32> to vector<2x8x8xf32>
    "tpu.trace_start"() <{level = 10 : i32, message = "bqd,bkd->bqk"}> : () -> ()
    %cst_112 = arith.constant dense<0.000000e+00> : vector<2x8x8xf32>
    %261 = tpu.matmul %258, %259, %cst_112 {dimension_numbers = #tpu.dot_dimension_numbers<[2], [2], [1], [1], [0, 0, 0, 1, 1, 1], [0], [0]>} : vector<2x8x8xf32>, vector<2x8x8xf32>, vector<2x8x8xf32> -> vector<2x8x8xf32>
    "tpu.trace_stop"() : () -> ()
    %cst_113 = arith.constant dense<0xFF800000> : vector<2x8xf32>
    %262 = vector.multi_reduction <maximumf>, %261, %cst_113 [2] : vector<2x8x8xf32> to vector<2x8xf32>
    %263 = vector.shape_cast %262 : vector<2x8xf32> to vector<2x8x1xf32>
    %264 = vector.broadcast %263 : vector<2x8x1xf32> to vector<2x8x8xf32>
    %265 = arith.subf %261, %264 : vector<2x8x8xf32>
    %266 = math.exp %265 : vector<2x8x8xf32>
    %cst_114 = arith.constant dense<0.000000e+00> : vector<2x8xf32>
    %267 = vector.multi_reduction <add>, %266, %cst_114 [2] : vector<2x8x8xf32> to vector<2x8xf32>
    %268 = vector.shape_cast %267 : vector<2x8xf32> to vector<2x8x1xf32>
    %269 = tpu.reciprocal %268 : vector<2x8x1xf32> -> vector<2x8x1xf32>
    %270 = vector.broadcast %269 : vector<2x8x1xf32> to vector<2x8x8xf32>
    %271 = arith.mulf %266, %270 : vector<2x8x8xf32>
    "tpu.trace_start"() <{level = 10 : i32, message = "bqk,bkd->bqd"}> : () -> ()
    %cst_115 = arith.constant dense<0.000000e+00> : vector<2x8x8xf32>
    %272 = tpu.matmul %271, %260, %cst_115 {dimension_numbers = #tpu.dot_dimension_numbers<[2], [1], [1], [2], [0, 0, 0, 1, 1, 2], [0], [0]>} : vector<2x8x8xf32>, vector<2x8x8xf32>, vector<2x8x8xf32> -> vector<2x8x8xf32>
    "tpu.trace_stop"() : () -> ()
    %273 = vector.shape_cast %272 : vector<2x8x8xf32> to vector<16x8xf32>
    %c818 = arith.constant 818 : index
    %c0_116 = arith.constant 0 : index
    %274 = vector.load %arg1[%c818, %c0_116] : memref<1208x128xf32, #tpu.memory_space<vmem>>, vector<8x32xf32>
    %cst_117 = arith.constant dense<0.000000e+00> : vector<16x32xf32>
    %275 = tpu.matmul %273, %274, %cst_117 {dimension_numbers = #tpu.dot_dimension_numbers<[1], [0], [0], [1], [0, 0, 1, 1], [], []>} : vector<16x8xf32>, vector<8x32xf32>, vector<16x32xf32> -> vector<16x32xf32>
    %276 = arith.addf %242, %275 : vector<16x32xf32>
    %c826 = arith.constant 826 : index
    %c0_118 = arith.constant 0 : index
    %277 = vector.load %arg1[%c826, %c0_118] : memref<1208x128xf32, #tpu.memory_space<vmem>>, vector<32x8xf32>
    %cst_119 = arith.constant dense<0.000000e+00> : vector<16x8xf32>
    %278 = tpu.matmul %207, %277, %cst_119 {dimension_numbers = #tpu.dot_dimension_numbers<[1], [0], [0], [1], [0, 0, 1, 1], [], []>} : vector<16x32xf32>, vector<32x8xf32>, vector<16x8xf32> -> vector<16x8xf32>
    %c858 = arith.constant 858 : index
    %c0_120 = arith.constant 0 : index
    %279 = vector.load %arg1[%c858, %c0_120] : memref<1208x128xf32, #tpu.memory_space<vmem>>, vector<1x8xf32>
    %280 = vector.broadcast %279 : vector<1x8xf32> to vector<16x8xf32>
    %281 = arith.addf %278, %280 : vector<16x8xf32>
    %c859 = arith.constant 859 : index
    %c0_121 = arith.constant 0 : index
    %282 = vector.load %arg1[%c859, %c0_121] : memref<1208x128xf32, #tpu.memory_space<vmem>>, vector<32x8xf32>
    %cst_122 = arith.constant dense<0.000000e+00> : vector<16x8xf32>
    %283 = tpu.matmul %207, %282, %cst_122 {dimension_numbers = #tpu.dot_dimension_numbers<[1], [0], [0], [1], [0, 0, 1, 1], [], []>} : vector<16x32xf32>, vector<32x8xf32>, vector<16x8xf32> -> vector<16x8xf32>
    %c891 = arith.constant 891 : index
    %c0_123 = arith.constant 0 : index
    %284 = vector.load %arg1[%c891, %c0_123] : memref<1208x128xf32, #tpu.memory_space<vmem>>, vector<1x8xf32>
    %285 = vector.broadcast %284 : vector<1x8xf32> to vector<16x8xf32>
    %286 = arith.addf %283, %285 : vector<16x8xf32>
    %c892 = arith.constant 892 : index
    %c0_124 = arith.constant 0 : index
    %287 = vector.load %arg1[%c892, %c0_124] : memref<1208x128xf32, #tpu.memory_space<vmem>>, vector<32x8xf32>
    %cst_125 = arith.constant dense<0.000000e+00> : vector<16x8xf32>
    %288 = tpu.matmul %207, %287, %cst_125 {dimension_numbers = #tpu.dot_dimension_numbers<[1], [0], [0], [1], [0, 0, 1, 1], [], []>} : vector<16x32xf32>, vector<32x8xf32>, vector<16x8xf32> -> vector<16x8xf32>
    %c924 = arith.constant 924 : index
    %c0_126 = arith.constant 0 : index
    %289 = vector.load %arg1[%c924, %c0_126] : memref<1208x128xf32, #tpu.memory_space<vmem>>, vector<1x8xf32>
    %290 = vector.broadcast %289 : vector<1x8xf32> to vector<16x8xf32>
    %291 = arith.addf %288, %290 : vector<16x8xf32>
    %292 = vector.shape_cast %281 : vector<16x8xf32> to vector<2x8x8xf32>
    %293 = vector.shape_cast %286 : vector<16x8xf32> to vector<2x8x8xf32>
    %294 = vector.shape_cast %291 : vector<16x8xf32> to vector<2x8x8xf32>
    "tpu.trace_start"() <{level = 10 : i32, message = "bqd,bkd->bqk"}> : () -> ()
    %cst_127 = arith.constant dense<0.000000e+00> : vector<2x8x8xf32>
    %295 = tpu.matmul %292, %293, %cst_127 {dimension_numbers = #tpu.dot_dimension_numbers<[2], [2], [1], [1], [0, 0, 0, 1, 1, 1], [0], [0]>} : vector<2x8x8xf32>, vector<2x8x8xf32>, vector<2x8x8xf32> -> vector<2x8x8xf32>
    "tpu.trace_stop"() : () -> ()
    %cst_128 = arith.constant dense<0xFF800000> : vector<2x8xf32>
    %296 = vector.multi_reduction <maximumf>, %295, %cst_128 [2] : vector<2x8x8xf32> to vector<2x8xf32>
    %297 = vector.shape_cast %296 : vector<2x8xf32> to vector<2x8x1xf32>
    %298 = vector.broadcast %297 : vector<2x8x1xf32> to vector<2x8x8xf32>
    %299 = arith.subf %295, %298 : vector<2x8x8xf32>
    %300 = math.exp %299 : vector<2x8x8xf32>
    %cst_129 = arith.constant dense<0.000000e+00> : vector<2x8xf32>
    %301 = vector.multi_reduction <add>, %300, %cst_129 [2] : vector<2x8x8xf32> to vector<2x8xf32>
    %302 = vector.shape_cast %301 : vector<2x8xf32> to vector<2x8x1xf32>
    %303 = tpu.reciprocal %302 : vector<2x8x1xf32> -> vector<2x8x1xf32>
    %304 = vector.broadcast %303 : vector<2x8x1xf32> to vector<2x8x8xf32>
    %305 = arith.mulf %300, %304 : vector<2x8x8xf32>
    "tpu.trace_start"() <{level = 10 : i32, message = "bqk,bkd->bqd"}> : () -> ()
    %cst_130 = arith.constant dense<0.000000e+00> : vector<2x8x8xf32>
    %306 = tpu.matmul %305, %294, %cst_130 {dimension_numbers = #tpu.dot_dimension_numbers<[2], [1], [1], [2], [0, 0, 0, 1, 1, 2], [0], [0]>} : vector<2x8x8xf32>, vector<2x8x8xf32>, vector<2x8x8xf32> -> vector<2x8x8xf32>
    "tpu.trace_stop"() : () -> ()
    %307 = vector.shape_cast %306 : vector<2x8x8xf32> to vector<16x8xf32>
    %c925 = arith.constant 925 : index
    %c0_131 = arith.constant 0 : index
    %308 = vector.load %arg1[%c925, %c0_131] : memref<1208x128xf32, #tpu.memory_space<vmem>>, vector<8x32xf32>
    %cst_132 = arith.constant dense<0.000000e+00> : vector<16x32xf32>
    %309 = tpu.matmul %307, %308, %cst_132 {dimension_numbers = #tpu.dot_dimension_numbers<[1], [0], [0], [1], [0, 0, 1, 1], [], []>} : vector<16x8xf32>, vector<8x32xf32>, vector<16x32xf32> -> vector<16x32xf32>
    %310 = arith.addf %276, %309 : vector<16x32xf32>
    %c933 = arith.constant 933 : index
    %c0_133 = arith.constant 0 : index
    %311 = vector.load %arg1[%c933, %c0_133] : memref<1208x128xf32, #tpu.memory_space<vmem>>, vector<32x8xf32>
    %cst_134 = arith.constant dense<0.000000e+00> : vector<16x8xf32>
    %312 = tpu.matmul %207, %311, %cst_134 {dimension_numbers = #tpu.dot_dimension_numbers<[1], [0], [0], [1], [0, 0, 1, 1], [], []>} : vector<16x32xf32>, vector<32x8xf32>, vector<16x8xf32> -> vector<16x8xf32>
    %c965 = arith.constant 965 : index
    %c0_135 = arith.constant 0 : index
    %313 = vector.load %arg1[%c965, %c0_135] : memref<1208x128xf32, #tpu.memory_space<vmem>>, vector<1x8xf32>
    %314 = vector.broadcast %313 : vector<1x8xf32> to vector<16x8xf32>
    %315 = arith.addf %312, %314 : vector<16x8xf32>
    %c966 = arith.constant 966 : index
    %c0_136 = arith.constant 0 : index
    %316 = vector.load %arg1[%c966, %c0_136] : memref<1208x128xf32, #tpu.memory_space<vmem>>, vector<32x8xf32>
    %cst_137 = arith.constant dense<0.000000e+00> : vector<16x8xf32>
    %317 = tpu.matmul %207, %316, %cst_137 {dimension_numbers = #tpu.dot_dimension_numbers<[1], [0], [0], [1], [0, 0, 1, 1], [], []>} : vector<16x32xf32>, vector<32x8xf32>, vector<16x8xf32> -> vector<16x8xf32>
    %c998 = arith.constant 998 : index
    %c0_138 = arith.constant 0 : index
    %318 = vector.load %arg1[%c998, %c0_138] : memref<1208x128xf32, #tpu.memory_space<vmem>>, vector<1x8xf32>
    %319 = vector.broadcast %318 : vector<1x8xf32> to vector<16x8xf32>
    %320 = arith.addf %317, %319 : vector<16x8xf32>
    %c999 = arith.constant 999 : index
    %c0_139 = arith.constant 0 : index
    %321 = vector.load %arg1[%c999, %c0_139] : memref<1208x128xf32, #tpu.memory_space<vmem>>, vector<32x8xf32>
    %cst_140 = arith.constant dense<0.000000e+00> : vector<16x8xf32>
    %322 = tpu.matmul %207, %321, %cst_140 {dimension_numbers = #tpu.dot_dimension_numbers<[1], [0], [0], [1], [0, 0, 1, 1], [], []>} : vector<16x32xf32>, vector<32x8xf32>, vector<16x8xf32> -> vector<16x8xf32>
    %c1031 = arith.constant 1031 : index
    %c0_141 = arith.constant 0 : index
    %323 = vector.load %arg1[%c1031, %c0_141] : memref<1208x128xf32, #tpu.memory_space<vmem>>, vector<1x8xf32>
    %324 = vector.broadcast %323 : vector<1x8xf32> to vector<16x8xf32>
    %325 = arith.addf %322, %324 : vector<16x8xf32>
    %326 = vector.shape_cast %315 : vector<16x8xf32> to vector<2x8x8xf32>
    %327 = vector.shape_cast %320 : vector<16x8xf32> to vector<2x8x8xf32>
    %328 = vector.shape_cast %325 : vector<16x8xf32> to vector<2x8x8xf32>
    "tpu.trace_start"() <{level = 10 : i32, message = "bqd,bkd->bqk"}> : () -> ()
    %cst_142 = arith.constant dense<0.000000e+00> : vector<2x8x8xf32>
    %329 = tpu.matmul %326, %327, %cst_142 {dimension_numbers = #tpu.dot_dimension_numbers<[2], [2], [1], [1], [0, 0, 0, 1, 1, 1], [0], [0]>} : vector<2x8x8xf32>, vector<2x8x8xf32>, vector<2x8x8xf32> -> vector<2x8x8xf32>
    "tpu.trace_stop"() : () -> ()
    %cst_143 = arith.constant dense<0xFF800000> : vector<2x8xf32>
    %330 = vector.multi_reduction <maximumf>, %329, %cst_143 [2] : vector<2x8x8xf32> to vector<2x8xf32>
    %331 = vector.shape_cast %330 : vector<2x8xf32> to vector<2x8x1xf32>
    %332 = vector.broadcast %331 : vector<2x8x1xf32> to vector<2x8x8xf32>
    %333 = arith.subf %329, %332 : vector<2x8x8xf32>
    %334 = math.exp %333 : vector<2x8x8xf32>
    %cst_144 = arith.constant dense<0.000000e+00> : vector<2x8xf32>
    %335 = vector.multi_reduction <add>, %334, %cst_144 [2] : vector<2x8x8xf32> to vector<2x8xf32>
    %336 = vector.shape_cast %335 : vector<2x8xf32> to vector<2x8x1xf32>
    %337 = tpu.reciprocal %336 : vector<2x8x1xf32> -> vector<2x8x1xf32>
    %338 = vector.broadcast %337 : vector<2x8x1xf32> to vector<2x8x8xf32>
    %339 = arith.mulf %334, %338 : vector<2x8x8xf32>
    "tpu.trace_start"() <{level = 10 : i32, message = "bqk,bkd->bqd"}> : () -> ()
    %cst_145 = arith.constant dense<0.000000e+00> : vector<2x8x8xf32>
    %340 = tpu.matmul %339, %328, %cst_145 {dimension_numbers = #tpu.dot_dimension_numbers<[2], [1], [1], [2], [0, 0, 0, 1, 1, 2], [0], [0]>} : vector<2x8x8xf32>, vector<2x8x8xf32>, vector<2x8x8xf32> -> vector<2x8x8xf32>
    "tpu.trace_stop"() : () -> ()
    %341 = vector.shape_cast %340 : vector<2x8x8xf32> to vector<16x8xf32>
    %c1032 = arith.constant 1032 : index
    %c0_146 = arith.constant 0 : index
    %342 = vector.load %arg1[%c1032, %c0_146] : memref<1208x128xf32, #tpu.memory_space<vmem>>, vector<8x32xf32>
    %cst_147 = arith.constant dense<0.000000e+00> : vector<16x32xf32>
    %343 = tpu.matmul %341, %342, %cst_147 {dimension_numbers = #tpu.dot_dimension_numbers<[1], [0], [0], [1], [0, 0, 1, 1], [], []>} : vector<16x8xf32>, vector<8x32xf32>, vector<16x32xf32> -> vector<16x32xf32>
    %344 = arith.addf %310, %343 : vector<16x32xf32>
    %c1040 = arith.constant 1040 : index
    %c0_148 = arith.constant 0 : index
    %345 = vector.load %arg1[%c1040, %c0_148] : memref<1208x128xf32, #tpu.memory_space<vmem>>, vector<1x32xf32>
    %346 = vector.broadcast %345 : vector<1x32xf32> to vector<16x32xf32>
    %347 = arith.addf %344, %346 : vector<16x32xf32>
    %348 = arith.addf %207, %347 : vector<16x32xf32>
    %c1041 = arith.constant 1041 : index
    %c0_149 = arith.constant 0 : index
    %349 = vector.load %arg1[%c1041, %c0_149] : memref<1208x128xf32, #tpu.memory_space<vmem>>, vector<1x32xf32>
    %c1042 = arith.constant 1042 : index
    %c0_150 = arith.constant 0 : index
    %350 = vector.load %arg1[%c1042, %c0_150] : memref<1208x128xf32, #tpu.memory_space<vmem>>, vector<1x32xf32>
    %cst_151 = arith.constant dense<0.000000e+00> : vector<32xf32>
    %351 = vector.multi_reduction <add>, %348, %cst_151 [0] : vector<16x32xf32> to vector<32xf32>
    %352 = vector.shape_cast %351 : vector<32xf32> to vector<1x32xf32>
    %cst_152 = arith.constant 1.600000e+01 : f32
    %353 = vector.broadcast %cst_152 : f32 to vector<1x32xf32>
    %354 = arith.divf %352, %353 : vector<1x32xf32>
    %355 = vector.broadcast %354 : vector<1x32xf32> to vector<16x32xf32>
    %356 = arith.subf %348, %355 : vector<16x32xf32>
    %357 = arith.mulf %356, %356 : vector<16x32xf32>
    %cst_153 = arith.constant dense<0.000000e+00> : vector<32xf32>
    %358 = vector.multi_reduction <add>, %357, %cst_153 [0] : vector<16x32xf32> to vector<32xf32>
    %359 = vector.shape_cast %358 : vector<32xf32> to vector<1x32xf32>
    %cst_154 = arith.constant 1.600000e+01 : f32
    %360 = vector.broadcast %cst_154 : f32 to vector<1x32xf32>
    %361 = arith.divf %359, %360 : vector<1x32xf32>
    %362 = vector.broadcast %354 : vector<1x32xf32> to vector<16x32xf32>
    %363 = arith.subf %348, %362 : vector<16x32xf32>
    %cst_155 = arith.constant 9.99999974E-6 : f32
    %364 = vector.broadcast %cst_155 : f32 to vector<1x32xf32>
    %365 = arith.addf %361, %364 : vector<1x32xf32>
    %366 = math.rsqrt %365 : vector<1x32xf32>
    %367 = vector.broadcast %366 : vector<1x32xf32> to vector<16x32xf32>
    %368 = arith.mulf %363, %367 : vector<16x32xf32>
    %369 = vector.broadcast %349 : vector<1x32xf32> to vector<16x32xf32>
    %370 = arith.mulf %368, %369 : vector<16x32xf32>
    %371 = vector.broadcast %350 : vector<1x32xf32> to vector<16x32xf32>
    %372 = arith.addf %370, %371 : vector<16x32xf32>
    %c1043 = arith.constant 1043 : index
    %c0_156 = arith.constant 0 : index
    %373 = vector.load %arg1[%c1043, %c0_156] : memref<1208x128xf32, #tpu.memory_space<vmem>>, vector<32x128xf32>
    %cst_157 = arith.constant dense<0.000000e+00> : vector<16x128xf32>
    %374 = tpu.matmul %372, %373, %cst_157 {dimension_numbers = #tpu.dot_dimension_numbers<[1], [0], [0], [1], [0, 0, 1, 1], [], []>} : vector<16x32xf32>, vector<32x128xf32>, vector<16x128xf32> -> vector<16x128xf32>
    %c1075 = arith.constant 1075 : index
    %c0_158 = arith.constant 0 : index
    %375 = vector.load %arg1[%c1075, %c0_158] : memref<1208x128xf32, #tpu.memory_space<vmem>>, vector<1x128xf32>
    %376 = vector.broadcast %375 : vector<1x128xf32> to vector<16x128xf32>
    %377 = arith.addf %374, %376 : vector<16x128xf32>
    %cst_159 = arith.constant 0.000000e+00 : f32
    %378 = vector.broadcast %cst_159 : f32 to vector<16x128xf32>
    %379 = arith.maximumf %377, %378 : vector<16x128xf32>
    %c1076 = arith.constant 1076 : index
    %c0_160 = arith.constant 0 : index
    %380 = vector.load %arg1[%c1076, %c0_160] : memref<1208x128xf32, #tpu.memory_space<vmem>>, vector<128x32xf32>
    %cst_161 = arith.constant dense<0.000000e+00> : vector<16x32xf32>
    %381 = tpu.matmul %379, %380, %cst_161 {dimension_numbers = #tpu.dot_dimension_numbers<[1], [0], [0], [1], [0, 0, 1, 1], [], []>} : vector<16x128xf32>, vector<128x32xf32>, vector<16x32xf32> -> vector<16x32xf32>
    %c1204 = arith.constant 1204 : index
    %c0_162 = arith.constant 0 : index
    %382 = vector.load %arg1[%c1204, %c0_162] : memref<1208x128xf32, #tpu.memory_space<vmem>>, vector<1x32xf32>
    %383 = vector.broadcast %382 : vector<1x32xf32> to vector<16x32xf32>
    %384 = arith.addf %381, %383 : vector<16x32xf32>
    %385 = arith.addf %372, %384 : vector<16x32xf32>
    %c1205 = arith.constant 1205 : index
    %c0_163 = arith.constant 0 : index
    %386 = vector.load %arg1[%c1205, %c0_163] : memref<1208x128xf32, #tpu.memory_space<vmem>>, vector<1x32xf32>
    %c1206 = arith.constant 1206 : index
    %c0_164 = arith.constant 0 : index
    %387 = vector.load %arg1[%c1206, %c0_164] : memref<1208x128xf32, #tpu.memory_space<vmem>>, vector<1x32xf32>
    %cst_165 = arith.constant dense<0.000000e+00> : vector<32xf32>
    %388 = vector.multi_reduction <add>, %385, %cst_165 [0] : vector<16x32xf32> to vector<32xf32>
    %389 = vector.shape_cast %388 : vector<32xf32> to vector<1x32xf32>
    %cst_166 = arith.constant 1.600000e+01 : f32
    %390 = vector.broadcast %cst_166 : f32 to vector<1x32xf32>
    %391 = arith.divf %389, %390 : vector<1x32xf32>
    %392 = vector.broadcast %391 : vector<1x32xf32> to vector<16x32xf32>
    %393 = arith.subf %385, %392 : vector<16x32xf32>
    %394 = arith.mulf %393, %393 : vector<16x32xf32>
    %cst_167 = arith.constant dense<0.000000e+00> : vector<32xf32>
    %395 = vector.multi_reduction <add>, %394, %cst_167 [0] : vector<16x32xf32> to vector<32xf32>
    %396 = vector.shape_cast %395 : vector<32xf32> to vector<1x32xf32>
    %cst_168 = arith.constant 1.600000e+01 : f32
    %397 = vector.broadcast %cst_168 : f32 to vector<1x32xf32>
    %398 = arith.divf %396, %397 : vector<1x32xf32>
    %399 = vector.broadcast %391 : vector<1x32xf32> to vector<16x32xf32>
    %400 = arith.subf %385, %399 : vector<16x32xf32>
    %cst_169 = arith.constant 9.99999974E-6 : f32
    %401 = vector.broadcast %cst_169 : f32 to vector<1x32xf32>
    %402 = arith.addf %398, %401 : vector<1x32xf32>
    %403 = math.rsqrt %402 : vector<1x32xf32>
    %404 = vector.broadcast %403 : vector<1x32xf32> to vector<16x32xf32>
    %405 = arith.mulf %400, %404 : vector<16x32xf32>
    %406 = vector.broadcast %386 : vector<1x32xf32> to vector<16x32xf32>
    %407 = arith.mulf %405, %406 : vector<16x32xf32>
    %408 = vector.broadcast %387 : vector<1x32xf32> to vector<16x32xf32>
    %409 = arith.addf %407, %408 : vector<16x32xf32>
    %c0_170 = arith.constant 0 : index
    %c0_171 = arith.constant 0 : index
    %410 = vector.load %arg2[%c0_170, %c0_171] : memref<16x32xf32, #tpu.memory_space<vmem>>, vector<16x32xf32>
    tpu.vector_store %arg2[%c0_170, %c0_171], %409 {strides = array<i32>} : memref<16x32xf32, #tpu.memory_space<vmem>>, vector<16x32xf32>,
    return
  }
}

</mosaic_0001>

<bundles_post_ra>
// kernel: tpu_custom_call.1
= control target key start
LH: loop header
LB: loop body
LE: loop exit
PB: predicated region body
PF: predicated region fallthrough
CT: control target
= control target key end

     0   :  { %7 = vsyncpa [#allocation3], 0  ;;  %s7819_s0 = inlined_call_operand.hbm [shape: f32[16,16], index: 0, kind: input, shape index: {}]   ;;  %s7820_s1 = inlined_call_operand.hbm [shape: f32[1208,128], index: 1, kind: input, shape index: {}]   ;;  %s7821_s2 = inlined_call_operand.hbm [shape: f32[16,32], index: 2, kind: output, shape index: {}]  }
   0x1   :  { %8 = vsyncpa [#allocation6], 0 }
   0x2   :  { %9 = vsyncpa [#allocation4], 0  ;;  %s7415_s9 = smov [#allocation2]   ;;  %s7343_s13 = scalar_lea.hbm %s7819_s0, 256 }
   0x3   :  { %s15_s10 = sshll.u32 %s7415_s9, 4  ;;  %p7344_p0 = scmp.ne.s32.totalorder %s7819_s0, %s7343_s13  ;;  %s16_s10 = int_to_ptr.vmem [resolvable:$true] %s15_s10 }
   0x4   :  { %p7347_p1 = scmp.lt.u32.totalorder %s7343_s13, %s7819_s0 }
   0x6   :  { %p7349_p2 = pnand %p7347_p1, %p7344_p0 }
   0x8   :  { %7352 = shalt.err (!%p7349_p2)
}
   0x9   :  { %s7353_s18 = scalar_lea.vmem %s16_s10, 256  ;;  %p7358_p4 = scmp.lt.s32.totalorder %s16_s10, %s16_s10 }
   0xa   :  { %p7354_p3 = scmp.ne.s32.totalorder %s16_s10, %s7353_s18  ;;  %p7359_p5 = scmp.lt.s32.totalorder %s7353_s18, %s7353_s18 }
   0xc   :  { %p7360_p6 = por %p7359_p5, %p7358_p4 }
   0xe   :  { %p7361_p7 = pnand %p7360_p6, %p7354_p3 }
  0x10   :  { %7364 = shalt.err (!%p7361_p7)
}
  0x11   :  { %s7416_s19 = smov 128   ;;  %s7417_s20 = smov 8  }
  0x12   :  { %21 = dma.hbm_to_vmem [thread:$0]  %s7819_s0, 256, %s16_s10, [#allocation3], %s7416_s19, %s7416_s19, %s7417_s20  }
  0x13   :  { %s7418_s23 = smov [#allocation5]   ;;  %s7365_s27 = scalar_lea.hbm %s7820_s1, 19328 }
  0x14   :  { %s27_s24 = sshll.u32 %s7418_s23, 4  ;;  %p7366_p8 = scmp.ne.s32.totalorder %s7820_s1, %s7365_s27  ;;  %s28_s24 = int_to_ptr.vmem [resolvable:$true] %s27_s24 }
  0x15   :  { %p7369_p9 = scmp.lt.u32.totalorder %s7365_s27, %s7820_s1 }
  0x17   :  { %p7371_p10 = pnand %p7369_p9, %p7366_p8 }
  0x19   :  { %7374 = shalt.err (!%p7371_p10)
}
  0x1a   :  { %s7375_s4 = scalar_lea.vmem %s28_s24, 19328  ;;  %p7380_p12 = scmp.lt.s32.totalorder %s28_s24, %s28_s24 }
  0x1b   :  { %p7376_p11 = scmp.ne.s32.totalorder %s28_s24, %s7375_s4  ;;  %p7381_p13 = scmp.lt.s32.totalorder %s7375_s4, %s7375_s4 }
  0x1d   :  { %p7382_p0 = por %p7381_p13, %p7380_p12 }
  0x1f   :  { %p7383_p1 = pnand %p7382_p0, %p7376_p11 }
  0x21   :  { %7386 = shalt.err (!%p7383_p1)
}
  0x22   :  { %33 = dma.hbm_to_vmem [thread:$0]  %s7820_s1, 19328, %s28_s24, [#allocation6], %s7416_s19, %s7416_s19, %s7417_s20  }
  0x23   :  { %7409 = dma.done.wait [#allocation3], 256  }
  0x24   :  { %7410 = vsyncadd [#allocation3], 4294967040 }
  0x25   :  { %7411 = dma.done.wait [#allocation6], 19328  }
  0x26   :  { %7412 = vsyncadd [#allocation6], 4294947968  ;;  %vm49_vm0 = vcmask 130048   ;;  %v42_v0 = vld [vmem:[#allocation5] sm:$0xff]  ;;  %v43_v1 = vld [vmem:[#allocation5 + $0x8] sm:$0xff]  ;;  %vm140_vm1 = vcmask 261120  }
  0x27   :  { %v40_v2 = vld [vmem:[#allocation2] sm:$0xff]  ;;  %v6976_v3 = vpack.c.bf16 %v43_v1, %v42_v0  ;;  %v132_v5 = vld [vmem:[#allocation5 + $0x19] sm:$0xff]  ;;  %v133_v8 = vld [vmem:[#allocation5 + $0x21] sm:$0xff]  ;;  %v7419_v28 = vmov 0.0   ;;  %vm7420_vm2 = vmmov 0   ;;  %vm390_vm3 = vcmask 64512  }
  0x28   :  { %6417 = vmatprep.mubr.msk.f32.mxu0 %vm49_vm0, %v40_v2  ;;  %v131_v4 = vld [vmem:[#allocation5 + $0x11] sm:$0xff]  ;;  %v134_v9 = vld [vmem:[#allocation5 + $0x29] sm:$0xff]  ;;  %v223_v12 = vld [vmem:[#allocation5 + $0x3a] sm:$0xff]  ;;  %6463 = vmatprep.subr.mxu1 %v7419_v28  ;;  %s7421_s1 = smov [#allocation7]  }
  0x29   :  { %v6980_v6 = vpack.c.bf16 %v132_v5, %v131_v4  ;;  %6977 = vmatprep.subr.bf16.mxu0 %v6976_v3  ;;  %v41_v7 = vld [vmem:[#allocation2 + $0x8] sm:$0xff]  ;;  %v6984_v10 = vpack.c.bf16 %v134_v9, %v133_v8  ;;  %v5972_v14 = vld [vmem:[#allocation5 + $0x10] ss:$0 sm:$0xff]  ;;  %v224_v16 = vld [vmem:[#allocation5 + $0x42] sm:$0xff]  ;;  %6465 = vmatprep.mubr.msk.f32.mxu1 %vm7420_vm2, %v7419_v28  ;;  %s5959_s6 = sshll.u32 %s7421_s1, 4  ;;  %s5960_s6 = int_to_ptr.vmem [resolvable:$true] %s5959_s6 }
  0x2a   :  { %6979 = vmatpush3.bf16.msra.mxu0 %v6976_v3  ;;  %v222_v11 = vld [vmem:[#allocation5 + $0x32] sm:$0xff]  ;;  %v225_v17 = vld [vmem:[#allocation5 + $0x4a] sm:$0xff]  ;;  %v307_v23 = vld [vmem:[#allocation5 + $0x5b] sm:$0xff]  ;;  %s7387_s7 = scalar_lea.vmem %s5960_s6, 256  ;;  %p7392_p3 = scmp.lt.s32.totalorder %s5960_s6, %s5960_s6 }
  0x2b   :  { %6981 = vmatprep.subr.bf16.mxu0 %v6980_v6  ;;  %v6988_v13 = vpack.c.bf16 %v223_v12, %v222_v11  ;;  %v6992_v21 = vpack.c.bf16 %v225_v17, %v224_v16  ;;  %v306_v22 = vld [vmem:[#allocation5 + $0x53] sm:$0xff]  ;;  %v308_v25 = vld [vmem:[#allocation5 + $0x63] sm:$0xff]  ;;  %v309_v26 = vld [vmem:[#allocation5 + $0x6b] sm:$0xff]  ;;  %p7388_p2 = scmp.ne.s32.totalorder %s5960_s6, %s7387_s7  ;;  %p7393_p4 = scmp.lt.s32.totalorder %s7387_s7, %s7387_s7 }
  0x2c   :  { %v6996_v24 = vpack.c.bf16 %v307_v23, %v306_v22  ;;  %v7000_v27 = vpack.c.bf16 %v309_v26, %v308_v25  ;;  %v5978_v31 = vld [vmem:[#allocation5 + $0x52] ss:$0 sm:$0xff]  ;;  %v5975_v34 = vld [vmem:[#allocation5 + $0x31] ss:$0 sm:$0xff]  ;;  %v796_v36 = vld [vmem:[#allocation5 + $0x9d] sm:$0xff] }
  0x2d   :  { %6418 = vmatmul.mubr.msk.f32.vlgmr.msra.gmra.mrb[0].mxu0 %vm49_vm0, %v41_v7  ;;  %v797_v37 = vld [vmem:[#allocation5 + $0xa5] sm:$0xff]  ;;  %v5981_v41 = vld [vmem:[#allocation5 + $0x73] ss:$0 sm:$0xff]  ;;  %v799_v43 = vld [vmem:[#allocation5 + $0xb5] sm:$0xff]  ;;  %p7394_p5 = por %p7393_p4, %p7392_p3 }
  0x2e   :  { %6983 = vmatpush3.bf16.msra.mxu0 %v6980_v6  ;;  %v7012_v39 = vpack.c.bf16 %v797_v37, %v796_v36  ;;  %v798_v42 = vld [vmem:[#allocation5 + $0xad] sm:$0xff]  ;;  %v5993_v56 = vld [vmem:[#allocation5 + $0xbd] ss:$0 sm:$0xff]  ;;  %v5996_v37 = vld [vmem:[#allocation5 + $0xde] ss:$0 sm:$0xff] }
  0x2f   :  { %6985 = vmatprep.subr.bf16.mxu0 %v6984_v10  ;;  %v7016_v48 = vpack.c.bf16 %v799_v43, %v798_v42  ;;  %v712_v9 = vld [vmem:[#allocation5 + $0x7c] sm:$0xff]  ;;  %v881_v22 = vld [vmem:[#allocation5 + $0xc6] sm:$0xff]  ;;  %p7395_p6 = pnand %p7394_p5, %p7388_p2 }
  0x30   :  { %v883_v25 = vld [vmem:[#allocation5 + $0xd6] sm:$0xff] }
  0x32   :  { %6987 = vmatpush3.bf16.msra.mxu0 %v6984_v10  ;;  %v713_v10 = vld [vmem:[#allocation5 + $0x84] sm:$0xff] }
  0x33   :  { %6989 = vmatprep.subr.bf16.mxu0 %v6988_v13 }
 0x100   :  { %v6419_v15 = vpop.f32.mrb[0].mxu0 }
 0x101   :  { %v122_v18 = vpop.f32.mrb[1].mxu0  ;;  %v7469_v20 = vadd.f32 %v6419_v15, %v5972_v14  ;;  %v715_v15 = vld [vmem:[#allocation5 + $0x94] sm:$0xff] }
 0x102   :  { %v7467_v19 = vadd.f32 %v5972_v14, %v122_v18  ;;  %v714_v14 = vld [vmem:[#allocation5 + $0x8c] sm:$0xff] }
 0x103   :  { %v7008_v18 = vpack.c.bf16 %v715_v15, %v714_v14  ;;  %v1531_v15 = vld [vmem:[#allocation5 + $0x108] sm:$0xff] }
 0x104   :  { %6428 = vmatprep.mubr.msk.f32.mxu0 %vm140_vm1, %v7467_v19 }
 0x105   :  { %6429 = vmatmul.mubr.msk.f32.vlgmr.msra.gmra.mrb[2].mxu0 %vm140_vm1, %v7469_v20 }
 0x106   :  { %6991 = vmatpush3.bf16.msra.mxu0 %v6988_v13  ;;  %6439 = vmatprep.mubr.msk.f32.mxu0 %vm140_vm1, %v7467_v19  ;;  %v7004_v13 = vpack.c.bf16 %v713_v10, %v712_v9  ;;  %v1617_v9 = vld [vmem:[#allocation5 + $0x139] sm:$0xff]  ;;  %v1618_v10 = vld [vmem:[#allocation5 + $0x141] sm:$0xff] }
 0x107   :  { %6993 = vmatprep.subr.bf16.mxu0 %v6992_v21 }
 0x10a   :  { %6995 = vmatpush3.bf16.msra.mxu0 %v6992_v21  ;;  %v880_v21 = vld [vmem:[#allocation5 + $0xbe] sm:$0xff] }
 0x10b   :  { %6997 = vmatprep.subr.bf16.mxu0 %v6996_v24  ;;  %v7020_v23 = vpack.c.bf16 %v881_v22, %v880_v21 }
 0x10d   :  { %6440 = vmatmul.mubr.msk.f32.vlgmr.msra.gmra.mrb[4].mxu0 %vm140_vm1, %v7469_v20 }
 0x10e   :  { %6999 = vmatpush3.bf16.msra.mxu0 %v6996_v24  ;;  %6450 = vmatprep.mubr.msk.f32.mxu0 %vm140_vm1, %v7467_v19  ;;  %v882_v24 = vld [vmem:[#allocation5 + $0xce] sm:$0xff] }
 0x10f   :  { %7001 = vmatprep.subr.bf16.mxu0 %v7000_v27  ;;  %v7024_v26 = vpack.c.bf16 %v883_v25, %v882_v24  ;;  %v1534_v24 = vld [vmem:[#allocation5 + $0x120] sm:$0xff] }
 0x112   :  { %7003 = vmatpush3.bf16.msra.mxu0 %v7000_v27 }
 0x113   :  { %6453 = vmatprep.subr.mxu0 %v7419_v28 }
 0x115   :  { %6451 = vmatmul.mubr.msk.f32.vlgmr.msra.gmra.mrb[6].mxu0 %vm140_vm1, %v7469_v20 }
 0x116   :  { %6455 = vmatprep.mubr.msk.f32.mxu0 %vm7420_vm2, %v7419_v28 }
 0x1d8   :  { %v6430_v29 = vpop.f32.mrb[2].mxu0 }
 0x1d9   :  { %v213_v30 = vpop.f32.mrb[3].mxu0  ;;  %v219_v45 = vadd.f32 %v6430_v29, %v5975_v34 }
 0x1da   :  { %v214_v38 = vadd.f32 %v5975_v34, %v213_v30 }
 0x1e0   :  { %v6441_v32 = vpop.f32.mrb[4].mxu0 }
 0x1e1   :  { %v297_v33 = vpop.f32.mrb[5].mxu0  ;;  %v303_v40 = vadd.f32 %v6441_v32, %v5978_v31  ;;  %v5990_v32 = vld [vmem:[#allocation5 + $0x9c] ss:$0 sm:$0xff] }
 0x1e2   :  { %v298_v35 = vadd.f32 %v5978_v31, %v297_v33 }
 0x1e4   :  { %6454 = vmatpush3.xpose.msk.msra.mxu0 %vm390_vm3, %v298_v35 }
 0x1e5   :  { %6458 = vmatprep.subr.mxu0 %v7419_v28 }
 0x1e7   :  { %6456 = vmatmul.mubr.msk.f32.vlgmr.msra.gmra.mrb[8].mxu0 %vm390_vm3, %v214_v38 }
 0x1e8   :  { %v6452_v44 = vpop.f32.mrb[6].mxu0  ;;  %6459 = vmatpush3.xpose.msk.msra.mxu0 %vm390_vm3, %v303_v40  ;;  %6460 = vmatprep.mubr.msk.f32.mxu0 %vm7420_vm2, %v7419_v28 }
 0x1e9   :  { %v387_v46 = vadd.f32 %v6452_v44, %v5981_v41  ;;  %v381_v47 = vpop.f32.mrb[7].mxu0  ;;  %7013 = vmatprep.subr.bf16.mxu0 %v7012_v39 }
 0x1ea   :  { %v382_v49 = vadd.f32 %v5981_v41, %v381_v47 }
 0x1eb   :  { %6461 = vmatmul.mubr.msk.f32.vlgmr.msra.gmra.mrb[10].mxu0 %vm390_vm3, %v219_v45 }
 0x1ec   :  { %6464 = vmatpush3.msra.mxu1 %v382_v49  ;;  %7015 = vmatpush3.bf16.msra.mxu0 %v7012_v39 }
 0x1ed   :  { %6492 = vmatprep.mubr.msk.f32.mxu0 %vm140_vm1, %v7467_v19  ;;  %7017 = vmatprep.subr.bf16.mxu0 %v7016_v48 }
 0x1ee   :  { %6468 = vmatprep.subr.mxu1 %v7419_v28 }
 0x1f0   :  { %7019 = vmatpush3.bf16.msra.mxu0 %v7016_v48 }
 0x1f1   :  { %6506 = vmatprep.subr.mxu0 %v7419_v28 }
 0x1f3   :  { %6493 = vmatmul.mubr.msk.f32.vlgmr.msra.gmra.mrb[12].mxu0 %vm140_vm1, %v7469_v20 }
 0x1f4   :  { %6508 = vmatprep.mubr.msk.f32.mxu0 %vm7420_vm2, %v7419_v28 }
 0x2ba   :  { %v463_v50 = vpop.f32.mrb[8].mxu0 }
 0x2bb   :  { %v6457_v51 = vpop.f32.mrb[9].mxu0  ;;  %v543_v52 = vsel %vm390_vm3, %v463_v50, -inf }
 0x2bc   :  { %544 = vmax.xlane.f32.xlu0 %v543_v52 }
 0x2be   :  { %v539_v53 = vpop.f32.mrb[10].mxu0 }
 0x2bf   :  { %v6462_v54 = vpop.f32.mrb[11].mxu0  ;;  %v546_v55 = vsel %vm390_vm3, %v539_v53, -inf }
 0x2c0   :  { %547 = vmax.xlane.f32.xlu0 %v546_v55 }
 0x2c6   :  { %v6494_v57 = vpop.f32.mrb[12].mxu0 }
 0x2c7   :  { %v7506_v58 = vadd.f32 %v6494_v57, %v5993_v56  ;;  %v871_v59 = vpop.f32.mrb[13].mxu0 }
 0x2c8   :  { %v872_v60 = vadd.f32 %v5993_v56, %v871_v59  ;;  %v1448_v59 = vld [vmem:[#allocation5 + $0xef] sm:$0xff] }
 0x2ca   :  { %6507 = vmatpush3.xpose.msk.msra.mxu0 %vm390_vm3, %v872_v60 }
 0x2cb   :  { %6511 = vmatprep.subr.mxu0 %v7419_v28 }
 0x349   :  { %v545_v61 = vpop.xlane.xlu0 %544 }
 0x34a   :  { %v549_v62 = vsub.f32 %v463_v50, %v545_v61 }
 0x34c   :  { %v551_v63 = vmul.f32 1.442695, %v549_v62 }
 0x34d   :  { %v548_v0 = vpop.xlane.xlu0 %547 }
 0x34e   :  { %7271 = vpow2.f32 %v551_v63  ;;  %v550_v1 = vsub.f32 %v539_v53, %v548_v0 }
 0x350   :  { %v553_v2 = vmul.f32 1.442695, %v550_v1  ;;  %v1449_v1 = vld [vmem:[#allocation5 + $0xf7] sm:$0xff] }
 0x352   :  { %7273 = vpow2.f32 %v553_v2  ;;  %v1450_v2 = vld [vmem:[#allocation5 + $0xff] sm:$0xff] }
 0x358   :  { %v7272_v3 = vpop.eup %7271 }
 0x359   :  { %v555_v4 = vsel %vm390_vm3, %v7272_v3, 0.0 }
 0x35a   :  { %556 = vadd.xlane.f32.xlu1 %v555_v4 }
 0x35c   :  { %v7274_v5 = vpop.eup %7273 }
 0x35d   :  { %v558_v6 = vsel %vm390_vm3, %v7274_v5, 0.0 }
 0x35e   :  { %559 = vadd.xlane.f32.xlu1 %v558_v6  ;;  %v1615_v6 = vld [vmem:[#allocation5 + $0x129] sm:$0xff] }
 0x3e7   :  { %v557_v7 = vpop.xlane.xlu1 %556 }
 0x3e8   :  { %7275 = vrcp.f32 %v557_v7  ;;  %v1616_v7 = vld [vmem:[#allocation5 + $0x131] sm:$0xff] }
 0x3eb   :  { %v560_v8 = vpop.xlane.xlu1 %559 }
 0x3ec   :  { %7277 = vrcp.f32 %v560_v8  ;;  %v7044_v8 = vpack.c.bf16 %v1616_v7, %v1615_v6  ;;  %v2271_v7 = vld [vmem:[#allocation5 + $0x194] sm:$0xff] }
 0x3f2   :  { %v7276_v11 = vpop.eup %7275 }
 0x3f3   :  { %v563_v12 = vmul.f32 %v7276_v11, %v7272_v3  ;;  %v7048_v11 = vpack.c.bf16 %v1618_v10, %v1617_v9  ;;  %v2273_v10 = vld [vmem:[#allocation5 + $0x1a4] sm:$0xff] }
 0x3f5   :  { %6466 = vmatmul.mubr.msk.f32.vlgmr.msra.gmra.mrb[0].mxu1 %vm390_vm3, %v563_v12  ;;  %v1284_v12 = vld [vmem:[#allocation5 + $0xdf] sm:$0xff] }
 0x3f6   :  { %v7278_v16 = vpop.eup %7277  ;;  %6469 = vmatpush3.msra.mxu1 %v387_v46  ;;  %6470 = vmatprep.mubr.msk.f32.mxu1 %vm7420_vm2, %v7419_v28 }
 0x3f7   :  { %v564_v17 = vmul.f32 %v7278_v16, %v7274_v5  ;;  %7005 = vmatprep.subr.bf16.mxu1 %v7004_v13  ;;  %v7032_v5 = vpack.c.bf16 %v1450_v2, %v1449_v1  ;;  %v1532_v16 = vld [vmem:[#allocation5 + $0x110] sm:$0xff] }
 0x3f8   :  { %v2106_v1 = vld [vmem:[#allocation5 + $0x16a] sm:$0xff] }
 0x3f9   :  { %6471 = vmatmul.mubr.msk.f32.vlgmr.msra.gmra.mrb[2].mxu1 %vm390_vm3, %v564_v17 }
 0x3fa   :  { %7007 = vmatpush3.bf16.msra.mxu1 %v7004_v13  ;;  %6481 = vmatprep.mubr.msk.f32.mxu1 %vm140_vm1, %v7467_v19  ;;  %v711_v13 = vld [vmem:[#allocation5 + $0x74] sm:$0xff] }
 0x3fb   :  { %7009 = vmatprep.subr.bf16.mxu1 %v7008_v18 }
 0x3fe   :  { %7011 = vmatpush3.bf16.msra.mxu1 %v7008_v18  ;;  %v7036_v18 = vpack.c.bf16 %v1532_v16, %v1531_v15  ;;  %v2189_v16 = vld [vmem:[#allocation5 + $0x183] sm:$0xff] }
 0x3ff   :  { %7021 = vmatprep.subr.bf16.mxu1 %v7020_v23 }
 0x401   :  { %6482 = vmatmul.mubr.msk.f32.vlgmr.msra.gmra.mrb[4].mxu1 %vm140_vm1, %v7469_v20 }
 0x402   :  { %7023 = vmatpush3.bf16.msra.mxu1 %v7020_v23  ;;  %6503 = vmatprep.mubr.msk.f32.mxu1 %vm140_vm1, %v7467_v19  ;;  %v1533_v23 = vld [vmem:[#allocation5 + $0x118] sm:$0xff] }
 0x403   :  { %7025 = vmatprep.subr.bf16.mxu1 %v7024_v26  ;;  %v7040_v25 = vpack.c.bf16 %v1534_v24, %v1533_v23 }
 0x406   :  { %7027 = vmatpush3.bf16.msra.mxu1 %v7024_v26 }
 0x407   :  { %6516 = vmatprep.subr.mxu1 %v7419_v28 }
 0x409   :  { %6504 = vmatmul.mubr.msk.f32.vlgmr.msra.gmra.mrb[6].mxu1 %vm140_vm1, %v7469_v20 }
 0x40a   :  { %6518 = vmatprep.mubr.msk.f32.mxu1 %vm7420_vm2, %v7419_v28 }
 0x4c8   :  { %v7527_v27 = vpop.f32.mrb[0].mxu1 }
 0x4c9   :  { %v6467_v29 = vpop.f32.mrb[1].mxu1 }
 0x4cc   :  { %v7529_v30 = vpop.f32.mrb[2].mxu1 }
 0x4cd   :  { %v6472_v31 = vpop.f32.mrb[3].mxu1 }
 0x4d4   :  { %v6483_v33 = vpop.f32.mrb[4].mxu1 }
 0x4d5   :  { %v787_v34 = vpop.f32.mrb[5].mxu1  ;;  %v793_v36 = vadd.f32 %v6483_v33, %v5990_v32 }
 0x4d6   :  { %v788_v35 = vadd.f32 %v5990_v32, %v787_v34  ;;  %v6012_v32 = vld [vmem:[#allocation5 + $0x128] ss:$0 sm:$0xff]  ;;  %v6009_v34 = vld [vmem:[#allocation5 + $0x107] ss:$0 sm:$0xff] }
 0x4d8   :  { %6509 = vmatmul.mubr.msk.f32.vlgmr.msra.gmra.mrb[14].mxu0 %vm390_vm3, %v788_v35 }
 0x4d9   :  { %6512 = vmatpush3.xpose.msk.msra.mxu0 %vm390_vm3, %v7506_v58  ;;  %6513 = vmatprep.mubr.msk.f32.mxu0 %vm7420_vm2, %v7419_v28  ;;  %v1447_v58 = vld [vmem:[#allocation5 + $0xe7] sm:$0xff] }
 0x4da   :  { %6521 = vmatprep.subr.mxu0 %v7419_v28  ;;  %v7028_v60 = vpack.c.bf16 %v1448_v59, %v1447_v58  ;;  %v2103_v58 = vld [vmem:[#allocation5 + $0x152] sm:$0xff]  ;;  %v2104_v59 = vld [vmem:[#allocation5 + $0x15a] sm:$0xff] }
 0x4dc   :  { %v6505_v38 = vpop.f32.mrb[6].mxu1  ;;  %6514 = vmatmul.mubr.msk.f32.vlgmr.msra.gmra.mrb[16].mxu0 %vm390_vm3, %v793_v36  ;;  %v6015_v36 = vld [vmem:[#allocation5 + $0x149] ss:$0 sm:$0xff] }
 0x4dd   :  { %v961_v39 = vadd.f32 %v6505_v38, %v5996_v37  ;;  %v955_v40 = vpop.f32.mrb[7].mxu1  ;;  %6523 = vmatprep.mubr.msk.f32.mxu0 %vm7420_vm2, %v7419_v28 }
 0x4de   :  { %v956_v41 = vadd.f32 %v5996_v37, %v955_v40 }
 0x4df   :  { %6522 = vmatpush3.msra.mxu0 %v961_v39 }
 0x4e0   :  { %6517 = vmatpush3.msra.mxu1 %v956_v41  ;;  %7029 = vmatprep.subr.bf16.mxu0 %v7028_v60 }
 0x4e1   :  { %6526 = vmatprep.subr.mxu1 %v1284_v12 }
 0x5ab   :  { %v1036_v42 = vpop.f32.mrb[14].mxu0 }
 0x5ac   :  { %v6510_v43 = vpop.f32.mrb[15].mxu0  ;;  %v1116_v44 = vsel %vm390_vm3, %v1036_v42, -inf }
 0x5ad   :  { %1117 = vmax.xlane.f32.xlu0 %v1116_v44 }
 0x5af   :  { %v1112_v45 = vpop.f32.mrb[16].mxu0 }
 0x5b0   :  { %v6515_v46 = vpop.f32.mrb[17].mxu0  ;;  %v1119_v47 = vsel %vm390_vm3, %v1112_v45, -inf }
 0x5b1   :  { %1120 = vmax.xlane.f32.xlu1 %v1119_v47 }
 0x63a   :  { %v1118_v48 = vpop.xlane.xlu0 %1117 }
 0x63b   :  { %v1122_v49 = vsub.f32 %v1036_v42, %v1118_v48 }
 0x63d   :  { %v1124_v50 = vmul.f32 1.442695, %v1122_v49 }
 0x63e   :  { %v1121_v51 = vpop.xlane.xlu1 %1120 }
 0x63f   :  { %7279 = vpow2.f32 %v1124_v50  ;;  %v1123_v52 = vsub.f32 %v1112_v45, %v1121_v51 }
 0x641   :  { %v1126_v53 = vmul.f32 1.442695, %v1123_v52 }
 0x643   :  { %7281 = vpow2.f32 %v1126_v53 }
 0x649   :  { %v7280_v54 = vpop.eup %7279 }
 0x64a   :  { %v1128_v55 = vsel %vm390_vm3, %v7280_v54, 0.0 }
 0x64b   :  { %1129 = vadd.xlane.f32.xlu0 %v1128_v55 }
 0x64d   :  { %v7282_v56 = vpop.eup %7281 }
 0x64e   :  { %v1131_v57 = vsel %vm390_vm3, %v7282_v56, 0.0 }
 0x64f   :  { %1132 = vadd.xlane.f32.xlu1 %v1131_v57 }
 0x6d8   :  { %v1130_v61 = vpop.xlane.xlu0 %1129 }
 0x6d9   :  { %7283 = vrcp.f32 %v1130_v61  ;;  %v2019_v61 = vld [vmem:[#allocation5 + $0x14a] sm:$0xff] }
 0x6dc   :  { %v1133_v62 = vpop.xlane.xlu1 %1132 }
 0x6dd   :  { %7285 = vrcp.f32 %v1133_v62 }
 0x6e3   :  { %v7284_v63 = vpop.eup %7283 }
 0x6e4   :  { %v1136_v0 = vmul.f32 %v7284_v63, %v7280_v54 }
 0x6e6   :  { %6519 = vmatmul.mubr.msk.f32.vlgmr.msra.gmra.mrb[8].mxu1 %vm390_vm3, %v1136_v0  ;;  %v2105_v0 = vld [vmem:[#allocation5 + $0x162] sm:$0xff] }
 0x6e7   :  { %v7286_v3 = vpop.eup %7285  ;;  %6527 = vmatpush3.msra.mxu1 %v1284_v12 }
 0x6e8   :  { %v1137_v4 = vmul.f32 %v7286_v3, %v7282_v56  ;;  %6531 = vmatprep.subr.mxu1 %v711_v13 }
 0x6ea   :  { %6524 = vmatmul.mubr.msk.f32.vlgmr.msra.gmra.mrb[18].mxu0 %vm390_vm3, %v1137_v4 }
 0x6eb   :  { %7031 = vmatpush3.bf16.msra.mxu0 %v7028_v60  ;;  %6544 = vmatprep.mubr.msk.f32.mxu0 %vm140_vm1, %v7467_v19  ;;  %v7052_v60 = vpack.c.bf16 %v2104_v59, %v2103_v58 }
 0x6ec   :  { %7033 = vmatprep.subr.bf16.mxu0 %v7032_v5 }
 0x6ef   :  { %7035 = vmatpush3.bf16.msra.mxu0 %v7032_v5  ;;  %v7056_v5 = vpack.c.bf16 %v2106_v1, %v2105_v0 }
 0x6f0   :  { %7045 = vmatprep.subr.bf16.mxu0 %v7044_v8 }
 0x6f2   :  { %6545 = vmatmul.mubr.msk.f32.vlgmr.msra.gmra.mrb[20].mxu0 %vm140_vm1, %v7469_v20 }
 0x6f3   :  { %7047 = vmatpush3.bf16.msra.mxu0 %v7044_v8  ;;  %6566 = vmatprep.mubr.msk.f32.mxu0 %vm140_vm1, %v7467_v19  ;;  %v2272_v8 = vld [vmem:[#allocation5 + $0x19c] sm:$0xff] }
 0x6f4   :  { %7049 = vmatprep.subr.bf16.mxu0 %v7048_v11  ;;  %v7068_v9 = vpack.c.bf16 %v2272_v8, %v2271_v7  ;;  %v2813_v7 = vld [vmem:[#allocation5 + $0x1d0] sm:$0xff]  ;;  %v2814_v8 = vld [vmem:[#allocation5 + $0x1d8] sm:$0xff] }
 0x6f7   :  { %7051 = vmatpush3.bf16.msra.mxu0 %v7048_v11  ;;  %v2274_v11 = vld [vmem:[#allocation5 + $0x1ac] sm:$0xff] }
 0x6f8   :  { %6574 = vmatprep.subr.mxu0 %v7419_v28  ;;  %v7072_v12 = vpack.c.bf16 %v2274_v11, %v2273_v10  ;;  %v2903_v10 = vld [vmem:[#allocation5 + $0x1e1] sm:$0xff]  ;;  %v2904_v11 = vld [vmem:[#allocation5 + $0x1e9] sm:$0xff] }
 0x6fa   :  { %6567 = vmatmul.mubr.msk.f32.vlgmr.msra.gmra.mrb[22].mxu0 %vm140_vm1, %v7469_v20 }
 0x6fb   :  { %6576 = vmatprep.mubr.msk.f32.mxu0 %vm7420_vm2, %v7419_v28 }
 0x7b9   :  { %v1207_v14 = vpop.f32.mrb[8].mxu1 }
 0x7ba   :  { %v6520_v17 = vpop.f32.mrb[9].mxu1  ;;  %6528 = vmatprep.mubr.msk.f32.mxu1 %vm390_vm3, %v1207_v14  ;;  %v2188_v14 = vld [vmem:[#allocation5 + $0x17b] sm:$0xff] }
 0x7bb   :  { %v2190_v17 = vld [vmem:[#allocation5 + $0x18b] sm:$0xff] }
 0x7bc   :  { %v7064_v23 = vpack.c.bf16 %v2190_v17, %v2189_v16  ;;  %v2907_v16 = vld [vmem:[#allocation5 + $0x201] sm:$0xff]  ;;  %v2908_v17 = vld [vmem:[#allocation5 + $0x209] sm:$0xff] }
 0x7bd   :  { %v1280_v21 = vpop.f32.mrb[18].mxu0 }
 0x7be   :  { %v6525_v22 = vpop.f32.mrb[19].mxu0  ;;  %6529 = vmatmul.mubr.msk.f32.vlgmr.msra.gmra.mrb[10].mxu1 %vm390_vm3, %v1280_v21 }
 0x7bf   :  { %6532 = vmatpush3.msra.mxu1 %v711_v13  ;;  %6533 = vmatprep.mubr.msk.f32.mxu1 %vm390_vm3, %v7527_v27  ;;  %v2187_v13 = vld [vmem:[#allocation5 + $0x173] sm:$0xff] }
 0x7c0   :  { %7037 = vmatprep.subr.bf16.mxu1 %v7036_v18  ;;  %v7060_v15 = vpack.c.bf16 %v2188_v14, %v2187_v13  ;;  %v7084_v13 = vpack.c.bf16 %v2904_v11, %v2903_v10  ;;  %v2906_v14 = vld [vmem:[#allocation5 + $0x1f9] sm:$0xff] }
 0x7c1   :  { %v2918_v10 = vld [vmem:[#allocation5 + $0x259] sm:$0xff] }
 0x7c5   :  { %v6546_v26 = vpop.f32.mrb[20].mxu0 }
 0x7c6   :  { %v1522_v29 = vpop.f32.mrb[21].mxu0  ;;  %6534 = vmatmul.mubr.msk.f32.vlgmr.msra.gmra.mrb[10].mxu1 %vm390_vm3, %v7529_v30  ;;  %v1528_v38 = vadd.f32 %v6546_v26, %v6009_v34 }
 0x7c7   :  { %7039 = vmatpush3.bf16.msra.mxu1 %v7036_v18  ;;  %6555 = vmatprep.mubr.msk.f32.mxu1 %vm140_vm1, %v7467_v19  ;;  %v1523_v39 = vadd.f32 %v6009_v34, %v1522_v29  ;;  %v6032_v29 = vld [vmem:[#allocation5 + $0x1b4] ss:$0 sm:$0xff]  ;;  %v6029_v34 = vld [vmem:[#allocation5 + $0x193] ss:$0 sm:$0xff] }
 0x7c8   :  { %7041 = vmatprep.subr.bf16.mxu1 %v7040_v25 }
 0x7cb   :  { %7043 = vmatpush3.bf16.msra.mxu1 %v7040_v25 }
 0x7cc   :  { %6569 = vmatprep.subr.mxu1 %v7419_v28 }
 0x7cd   :  { %v6568_v31 = vpop.f32.mrb[22].mxu0 }
 0x7ce   :  { %6556 = vmatmul.mubr.msk.f32.vlgmr.msra.gmra.mrb[12].mxu1 %vm140_vm1, %v7469_v20  ;;  %v1690_v27 = vpop.f32.mrb[23].mxu0  ;;  %v1696_v40 = vadd.f32 %v6568_v31, %v6015_v36 }
 0x7cf   :  { %6571 = vmatprep.mubr.msk.f32.mxu1 %vm7420_vm2, %v7419_v28  ;;  %v1691_v41 = vadd.f32 %v6015_v36, %v1690_v27  ;;  %v6026_v36 = vld [vmem:[#allocation5 + $0x172] ss:$0 sm:$0xff] }
 0x8a1   :  { %v6557_v33 = vpop.f32.mrb[12].mxu1 }
 0x8a2   :  { %v1612_v30 = vadd.f32 %v6557_v33, %v6012_v32  ;;  %v1606_v35 = vpop.f32.mrb[13].mxu1 }
 0x8a3   :  { %v1607_v37 = vadd.f32 %v6012_v32, %v1606_v35 }
 0x8a4   :  { %6575 = vmatpush3.xpose.msk.msra.mxu0 %vm390_vm3, %v1612_v30 }
 0x8a5   :  { %6570 = vmatpush3.xpose.msk.msra.mxu1 %vm390_vm3, %v1607_v37  ;;  %6584 = vmatprep.subr.mxu0 %v7419_v28 }
 0x8a6   :  { %6579 = vmatprep.subr.mxu1 %v7419_v28 }
 0x8a7   :  { %6577 = vmatmul.mubr.msk.f32.vlgmr.msra.gmra.mrb[24].mxu0 %vm390_vm3, %v1528_v38 }
 0x8a8   :  { %6572 = vmatmul.mubr.msk.f32.vlgmr.msra.gmra.mrb[14].mxu1 %vm390_vm3, %v1523_v39  ;;  %6585 = vmatpush3.msra.mxu0 %v1696_v40 }
 0x8a9   :  { %6580 = vmatpush3.msra.mxu1 %v1691_v41  ;;  %6586 = vmatprep.mubr.msk.f32.mxu0 %vm7420_vm2, %v7419_v28 }
 0x8aa   :  { %6581 = vmatprep.mubr.msk.f32.mxu1 %vm7420_vm2, %v7419_v28  ;;  %7053 = vmatprep.subr.bf16.mxu0 %v7052_v60 }
 0x8ab   :  { %6589 = vmatprep.subr.mxu1 %v2019_v61 }
 0x97a   :  { %v1847_v42 = vpop.f32.mrb[24].mxu0 }
 0x97b   :  { %v1771_v43 = vpop.f32.mrb[14].mxu1  ;;  %v6578_v44 = vpop.f32.mrb[25].mxu0  ;;  %v1854_v45 = vsel %vm390_vm3, %v1847_v42, -inf }
 0x97c   :  { %1855 = vmax.xlane.f32.xlu1 %v1854_v45  ;;  %v6573_v46 = vpop.f32.mrb[15].mxu1  ;;  %v1851_v47 = vsel %vm390_vm3, %v1771_v43, -inf }
 0x97d   :  { %1852 = vmax.xlane.f32.xlu0 %v1851_v47 }
 0xa09   :  { %v1856_v48 = vpop.xlane.xlu1 %1855 }
 0xa0a   :  { %v1858_v49 = vsub.f32 %v1847_v42, %v1856_v48  ;;  %v1853_v50 = vpop.xlane.xlu0 %1852 }
 0xa0b   :  { %v1857_v51 = vsub.f32 %v1771_v43, %v1853_v50 }
 0xa0c   :  { %v1861_v52 = vmul.f32 1.442695, %v1858_v49 }
 0xa0d   :  { %v1859_v53 = vmul.f32 1.442695, %v1857_v51 }
 0xa0e   :  { %7287 = vpow2.f32 %v1861_v52 }
 0xa0f   :  { %7289 = vpow2.f32 %v1859_v53 }
 0xa18   :  { %v7288_v54 = vpop.eup %7287 }
 0xa19   :  { %v7290_v55 = vpop.eup %7289  ;;  %v1866_v56 = vsel %vm390_vm3, %v7288_v54, 0.0 }
 0xa1a   :  { %1867 = vadd.xlane.f32.xlu1 %v1866_v56  ;;  %v1863_v57 = vsel %vm390_vm3, %v7290_v55, 0.0 }
 0xa1b   :  { %1864 = vadd.xlane.f32.xlu0 %v1863_v57 }
 0xaa7   :  { %v1868_v62 = vpop.xlane.xlu1 %1867 }
 0xaa8   :  { %7291 = vrcp.f32 %v1868_v62  ;;  %v1865_v63 = vpop.xlane.xlu0 %1864 }
 0xaa9   :  { %7293 = vrcp.f32 %v1865_v63  ;;  %v2675_v63 = vld [vmem:[#allocation5 + $0x1b5] sm:$0xff] }
 0xab2   :  { %v7292_v2 = vpop.eup %7291 }
 0xab3   :  { %v7294_v3 = vpop.eup %7293  ;;  %v1872_v4 = vmul.f32 %v7292_v2, %v7288_v54 }
 0xab4   :  { %v1871_v6 = vmul.f32 %v7294_v3, %v7290_v55 }
 0xab5   :  { %6587 = vmatmul.mubr.msk.f32.vlgmr.msra.gmra.mrb[26].mxu0 %vm390_vm3, %v1872_v4  ;;  %v2811_v4 = vld [vmem:[#allocation5 + $0x1c0] sm:$0xff] }
 0xab6   :  { %7055 = vmatpush3.bf16.msra.mxu0 %v7052_v60  ;;  %6582 = vmatmul.mubr.msk.f32.vlgmr.msra.gmra.mrb[16].mxu1 %vm390_vm3, %v1871_v6 }
 0xab7   :  { %6602 = vmatprep.mubr.msk.f32.mxu0 %vm140_vm1, %v7467_v19  ;;  %7057 = vmatprep.subr.bf16.mxu0 %v7056_v5 }
 0xab8   :  { %6590 = vmatpush3.msra.mxu1 %v2019_v61 }
 0xab9   :  { %7061 = vmatprep.subr.bf16.mxu1 %v7060_v15 }
 0xaba   :  { %7059 = vmatpush3.bf16.msra.mxu0 %v7056_v5  ;;  %v2812_v5 = vld [vmem:[#allocation5 + $0x1c8] sm:$0xff] }
 0xabb   :  { %7069 = vmatprep.subr.bf16.mxu0 %v7068_v9  ;;  %v7076_v6 = vpack.c.bf16 %v2812_v5, %v2811_v4  ;;  %v6045_v4 = vld [vmem:[#allocation5 + $0x1bf] ss:$0 sm:$0xff] }
 0xabd   :  { %6603 = vmatmul.mubr.msk.f32.vlgmr.msra.gmra.mrb[28].mxu0 %vm140_vm1, %v7469_v20 }
 0xabe   :  { %7071 = vmatpush3.bf16.msra.mxu0 %v7068_v9  ;;  %6624 = vmatprep.mubr.msk.f32.mxu0 %vm140_vm1, %v7467_v19  ;;  %v7080_v9 = vpack.c.bf16 %v2814_v8, %v2813_v7 }
 0xabf   :  { %7073 = vmatprep.subr.bf16.mxu0 %v7072_v12 }
 0xac2   :  { %7075 = vmatpush3.bf16.msra.mxu0 %v7072_v12  ;;  %v2905_v12 = vld [vmem:[#allocation5 + $0x1f1] sm:$0xff] }
 0xac3   :  { %6637 = vmatprep.subr.mxu0 %v7419_v28 }
 0xac5   :  { %6625 = vmatmul.mubr.msk.f32.vlgmr.msra.gmra.mrb[30].mxu0 %vm140_vm1, %v7469_v20 }
 0xac6   :  { %6639 = vmatprep.mubr.msk.f32.mxu0 %vm7420_vm2, %v7419_v28 }
 0xb88   :  { %v2015_v18 = vpop.f32.mrb[26].mxu0 }
 0xb89   :  { %v1942_v21 = vpop.f32.mrb[16].mxu1  ;;  %v6588_v22 = vpop.f32.mrb[27].mxu0 }
 0xb8a   :  { %v6583_v24 = vpop.f32.mrb[17].mxu1  ;;  %6591 = vmatprep.mubr.msk.f32.mxu1 %vm390_vm3, %v1942_v21  ;;  %v2909_v21 = vld [vmem:[#allocation5 + $0x211] sm:$0xff]  ;;  %v2910_v22 = vld [vmem:[#allocation5 + $0x219] sm:$0xff] }
 0xb8b   :  { %6592 = vmatmul.mubr.msk.f32.vlgmr.msra.gmra.mrb[10].mxu1 %vm390_vm3, %v2015_v18  ;;  %v7092_v18 = vpack.c.bf16 %v2908_v17, %v2907_v16  ;;  %v2911_v24 = vld [vmem:[#allocation5 + $0x221] sm:$0xff] }
 0xb8c   :  { %7063 = vmatpush3.bf16.msra.mxu1 %v7060_v15  ;;  %6613 = vmatprep.mubr.msk.f32.mxu1 %vm140_vm1, %v7467_v19  ;;  %v7088_v15 = vpack.c.bf16 %v2906_v14, %v2905_v12  ;;  %v6046_v12 = vld [vmem:[#allocation5 + $0x1e0] ss:$0 sm:$0xff] }
 0xb8d   :  { %7065 = vmatprep.subr.bf16.mxu1 %v7064_v23 }
 0xb90   :  { %v6604_v25 = vpop.f32.mrb[28].mxu0  ;;  %7067 = vmatpush3.bf16.msra.mxu1 %v7064_v23  ;;  %v7096_v23 = vpack.c.bf16 %v2910_v22, %v2909_v21  ;;  %v3043_v21 = vld [vmem:[#allocation5 + $0x264] sm:$0xff]  ;;  %v3044_v22 = vld [vmem:[#allocation5 + $0x26c] sm:$0xff] }
 0xb91   :  { %v2178_v26 = vpop.f32.mrb[29].mxu0  ;;  %6627 = vmatprep.subr.mxu1 %v7419_v28  ;;  %v2184_v40 = vadd.f32 %v6604_v25, %v6026_v36  ;;  %v2912_v25 = vld [vmem:[#allocation5 + $0x229] sm:$0xff] }
 0xb92   :  { %v2179_v38 = vadd.f32 %v6026_v36, %v2178_v26  ;;  %v7100_v26 = vpack.c.bf16 %v2912_v25, %v2911_v24  ;;  %v3045_v24 = vld [vmem:[#allocation5 + $0x274] sm:$0xff]  ;;  %v3046_v25 = vld [vmem:[#allocation5 + $0x27c] sm:$0xff] }
 0xb93   :  { %6614 = vmatmul.mubr.msk.f32.vlgmr.msra.gmra.mrb[18].mxu1 %vm140_vm1, %v7469_v20 }
 0xb94   :  { %6629 = vmatprep.mubr.msk.f32.mxu1 %vm7420_vm2, %v7419_v28 }
 0xb98   :  { %v6626_v31 = vpop.f32.mrb[30].mxu0 }
 0xb99   :  { %v2352_v27 = vadd.f32 %v6626_v31, %v6032_v29  ;;  %v2346_v32 = vpop.f32.mrb[31].mxu0  ;;  %v2914_v31 = vld [vmem:[#allocation5 + $0x239] sm:$0xff] }
 0xb9a   :  { %v2347_v33 = vadd.f32 %v6032_v29, %v2346_v32  ;;  %v2913_v29 = vld [vmem:[#allocation5 + $0x231] sm:$0xff]  ;;  %v2915_v32 = vld [vmem:[#allocation5 + $0x241] sm:$0xff] }
 0xb9c   :  { %6638 = vmatpush3.msra.mxu0 %v2347_v33  ;;  %v2916_v33 = vld [vmem:[#allocation5 + $0x249] sm:$0xff] }
 0xb9d   :  { %7077 = vmatprep.subr.bf16.mxu0 %v7076_v6 }
 0xc66   :  { %v6615_v30 = vpop.f32.mrb[18].mxu1 }
 0xc67   :  { %v2262_v35 = vpop.f32.mrb[19].mxu1  ;;  %v2268_v39 = vadd.f32 %v6615_v30, %v6029_v34  ;;  %v6043_v30 = vld [vmem:[#allocation5 + $0x1bd] ss:$0 sm:$0xff] }
 0xc68   :  { %v2263_v37 = vadd.f32 %v6029_v34, %v2262_v35  ;;  %v7108_v34 = vpack.c.bf16 %v2916_v33, %v2915_v32  ;;  %v6049_v32 = vld [vmem:[#allocation5 + $0x261] ss:$0 sm:$0xff] }
 0xc6a   :  { %6628 = vmatpush3.xpose.msk.msra.mxu1 %vm390_vm3, %v2263_v37 }
 0xc6b   :  { %6632 = vmatprep.subr.mxu1 %v7419_v28 }
 0xc6d   :  { %6630 = vmatmul.mubr.msk.f32.vlgmr.msra.gmra.mrb[20].mxu1 %vm390_vm3, %v2179_v38 }
 0xc6e   :  { %6633 = vmatpush3.xpose.msk.msra.mxu1 %vm390_vm3, %v2268_v39  ;;  %6634 = vmatprep.mubr.msk.f32.mxu1 %vm7420_vm2, %v7419_v28 }
 0xc6f   :  { %6642 = vmatprep.subr.mxu1 %v7419_v28 }
 0xc71   :  { %6635 = vmatmul.mubr.msk.f32.vlgmr.msra.gmra.mrb[22].mxu1 %vm390_vm3, %v2184_v40 }
 0xc72   :  { %6643 = vmatpush3.msra.mxu1 %v2352_v27  ;;  %6644 = vmatprep.mubr.msk.f32.mxu1 %vm7420_vm2, %v7419_v28  ;;  %v7104_v27 = vpack.c.bf16 %v2914_v31, %v2913_v29  ;;  %v3133_v29 = vld [vmem:[#allocation5 + $0x285] sm:$0xff]  ;;  %v3134_v31 = vld [vmem:[#allocation5 + $0x28d] sm:$0xff] }
 0xc73   :  { %6647 = vmatprep.subr.mxu1 %v2675_v63 }
 0xd40   :  { %v2427_v41 = vpop.f32.mrb[20].mxu1 }
 0xd41   :  { %v6631_v42 = vpop.f32.mrb[21].mxu1  ;;  %v2507_v43 = vsel %vm390_vm3, %v2427_v41, -inf }
 0xd42   :  { %2508 = vmax.xlane.f32.xlu0 %v2507_v43 }
 0xd44   :  { %v2503_v44 = vpop.f32.mrb[22].mxu1 }
 0xd45   :  { %v6636_v45 = vpop.f32.mrb[23].mxu1  ;;  %v2510_v46 = vsel %vm390_vm3, %v2503_v44, -inf }
 0xd46   :  { %2511 = vmax.xlane.f32.xlu1 %v2510_v46 }
 0xdcf   :  { %v2509_v47 = vpop.xlane.xlu0 %2508 }
 0xdd0   :  { %v2513_v48 = vsub.f32 %v2427_v41, %v2509_v47 }
 0xdd2   :  { %v2515_v49 = vmul.f32 1.442695, %v2513_v48 }
 0xdd3   :  { %v2512_v50 = vpop.xlane.xlu1 %2511 }
 0xdd4   :  { %7295 = vpow2.f32 %v2515_v49  ;;  %v2514_v51 = vsub.f32 %v2503_v44, %v2512_v50 }
 0xdd6   :  { %v2517_v52 = vmul.f32 1.442695, %v2514_v51 }
 0xdd8   :  { %7297 = vpow2.f32 %v2517_v52 }
 0xdde   :  { %v7296_v53 = vpop.eup %7295 }
 0xddf   :  { %v2519_v54 = vsel %vm390_vm3, %v7296_v53, 0.0 }
 0xde0   :  { %2520 = vadd.xlane.f32.xlu0 %v2519_v54 }
 0xde2   :  { %v7298_v55 = vpop.eup %7297 }
 0xde3   :  { %v2522_v56 = vsel %vm390_vm3, %v7298_v55, 0.0 }
 0xde4   :  { %2523 = vadd.xlane.f32.xlu1 %v2522_v56 }
 0xe6d   :  { %v2521_v57 = vpop.xlane.xlu0 %2520 }
 0xe6e   :  { %7299 = vrcp.f32 %v2521_v57 }
 0xe71   :  { %v2524_v58 = vpop.xlane.xlu1 %2523 }
 0xe72   :  { %7301 = vrcp.f32 %v2524_v58 }
 0xe78   :  { %v7300_v59 = vpop.eup %7299 }
 0xe79   :  { %v2527_v60 = vmul.f32 %v7300_v59, %v7296_v53 }
 0xe7b   :  { %6640 = vmatmul.mubr.msk.f32.vlgmr.msra.gmra.mrb[32].mxu0 %vm390_vm3, %v2527_v60 }
 0xe7c   :  { %v7302_v61 = vpop.eup %7301  ;;  %7079 = vmatpush3.bf16.msra.mxu0 %v7076_v6 }
 0xe7d   :  { %v2528_v62 = vmul.f32 %v7302_v61, %v7298_v55  ;;  %7081 = vmatprep.subr.bf16.mxu0 %v7080_v9 }
 0xe7f   :  { %6645 = vmatmul.mubr.msk.f32.vlgmr.msra.gmra.mrb[24].mxu1 %vm390_vm3, %v2528_v62 }
 0xe80   :  { %6648 = vmatpush3.msra.mxu1 %v2675_v63  ;;  %7083 = vmatpush3.bf16.msra.mxu0 %v7080_v9  ;;  %v2917_v9 = vld [vmem:[#allocation5 + $0x251] sm:$0xff] }
 0xe81   :  { %7085 = vmatprep.subr.bf16.mxu1 %v7084_v13  ;;  %v7112_v11 = vpack.c.bf16 %v2918_v10, %v2917_v9  ;;  %v3217_v9 = vld [vmem:[#allocation5 + $0x2a6] sm:$0xff]  ;;  %v3218_v10 = vld [vmem:[#allocation5 + $0x2ae] sm:$0xff] }
 0xf4e   :  { %v2598_v0 = vpop.f32.mrb[32].mxu0 }
 0xf4f   :  { %v6641_v1 = vpop.f32.mrb[33].mxu0  ;;  %6649 = vmatprep.mubr.msk.f32.mxu1 %vm390_vm3, %v2598_v0 }
 0xf50   :  { %v6044_v1 = vld [vmem:[#allocation5 + $0x1be] ss:$0 sm:$0xff] }
 0xf52   :  { %v2671_v2 = vpop.f32.mrb[24].mxu1 }
 0xf53   :  { %v6646_v3 = vpop.f32.mrb[25].mxu1  ;;  %6650 = vmatmul.mubr.msk.f32.vlgmr.msra.gmra.mrb[10].mxu1 %vm390_vm3, %v2671_v2 }
 0xf54   :  { %7087 = vmatpush3.bf16.msra.mxu1 %v7084_v13 }
 0xf55   :  { %7089 = vmatprep.subr.bf16.mxu1 %v7088_v15 }
 0xf58   :  { %7091 = vmatpush3.bf16.msra.mxu1 %v7088_v15 }
 0xf59   :  { %7093 = vmatprep.subr.bf16.mxu1 %v7092_v18 }
 0xf5c   :  { %7095 = vmatpush3.bf16.msra.mxu1 %v7092_v18 }
 0xf5d   :  { %7097 = vmatprep.subr.bf16.mxu1 %v7096_v23 }
 0xf60   :  { %7099 = vmatpush3.bf16.msra.mxu1 %v7096_v23  ;;  %v7116_v23 = vpack.c.bf16 %v3044_v22, %v3043_v21  ;;  %v6052_v22 = vld [vmem:[#allocation5 + $0x284] ss:$0 sm:$0xff] }
 0xf61   :  { %7101 = vmatprep.subr.bf16.mxu1 %v7100_v26 }
 0xf62   :  { %7117 = vmatprep.subr.bf16.mxu0 %v7116_v23 }
 0xf64   :  { %7103 = vmatpush3.bf16.msra.mxu1 %v7100_v26  ;;  %v7120_v26 = vpack.c.bf16 %v3046_v25, %v3045_v24 }
 0xf65   :  { %7105 = vmatprep.subr.bf16.mxu1 %v7104_v27 }
 0xf68   :  { %7107 = vmatpush3.bf16.msra.mxu1 %v7104_v27  ;;  %v7124_v27 = vpack.c.bf16 %v3134_v31, %v3133_v29 }
 0xf69   :  { %7109 = vmatprep.subr.bf16.mxu1 %v7108_v34 }
 0xf6c   :  { %7111 = vmatpush3.bf16.msra.mxu1 %v7108_v34 }
 0xf6d   :  { %7113 = vmatprep.subr.bf16.mxu1 %v7112_v11 }
 0xf70   :  { %7115 = vmatpush3.bf16.msra.mxu1 %v7112_v11  ;;  %v7132_v11 = vpack.c.bf16 %v3218_v10, %v3217_v9 }
 0xf71   :  { %6741 = vmatprep.subr.mxu1 %v7419_v28 }
0x1026   :  { %v6651_v35 = vpop.f32.mrb[10].mxu1 }
0x1027   :  { %v2765_v36 = vadd.f32 %v6651_v35, %v6043_v30  ;;  %v2748_v37 = vpop.f32.mrb[11].mxu1 }
0x1028   :  { %v2764_v38 = vadd.f32 %v6043_v30, %v2748_v37 }
0x1029   :  { %v2767_v39 = vadd.f32 %v2765_v36, %v7469_v20 }
0x102a   :  { %v2766_v40 = vadd.f32 %v2764_v38, %v7467_v19 }
0x102b   :  { %v2771_v41 = vsel %vm140_vm1, %v2767_v39, 0.0 }
0x102c   :  { %v2770_v42 = vsel %vm140_vm1, %v2766_v40, 0.0 }
0x102d   :  { %v2772_v43 = vadd.f32 %v2771_v41, %v2770_v42 }
0x102f   :  { %v2773_v44 = vrot.slane %v2772_v43, 4 }
0x1031   :  { %v2774_v45 = vadd.f32 %v2773_v44, %v2772_v43 }
0x1033   :  { %v2775_v46 = vrot.slane %v2774_v45, 2 }
0x1035   :  { %v2776_v47 = vadd.f32 %v2775_v46, %v2774_v45 }
0x1037   :  { %v2777_v48 = vrot.slane %v2776_v47, 1 }
0x1039   :  { %v2778_v49 = vadd.f32 %v2777_v48, %v2776_v47 }
0x103b   :  { %v2780_v50 = vmul.f32 0.0625, %v2778_v49 }
0x103d   :  { %v2781_v51 = vsub.f32 %v2766_v40, %v2780_v50  ;;  %v2782_v52 = vsub.f32 %v2767_v39, %v2780_v50 }
0x103f   :  { %v2783_v53 = vmul.f32 %v2781_v51, %v2781_v51  ;;  %v2784_v54 = vmul.f32 %v2782_v52, %v2782_v52 }
0x1041   :  { %v2785_v20 = vsel %vm140_vm1, %v2783_v53, 0.0  ;;  %v2786_v19 = vsel %vm140_vm1, %v2784_v54, 0.0 }
0x1042   :  { %v2787_v55 = vadd.f32 %v2786_v19, %v2785_v20 }
0x1044   :  { %v2788_v56 = vrot.slane %v2787_v55, 4 }
0x1046   :  { %v2789_v57 = vadd.f32 %v2788_v56, %v2787_v55 }
0x1048   :  { %v2790_v58 = vrot.slane %v2789_v57, 2 }
0x104a   :  { %v2791_v59 = vadd.f32 %v2790_v58, %v2789_v57 }
0x104c   :  { %v2792_v60 = vrot.slane %v2791_v59, 1 }
0x104e   :  { %v2793_v61 = vadd.f32 %v2792_v60, %v2791_v59 }
0x1050   :  { %v2794_v62 = vmul.f32 0.0625, %v2793_v61 }
0x1052   :  { %v2795_v63 = vadd.f32 1e-05, %v2794_v62  ;;  %v6050_v62 = vld [vmem:[#allocation5 + $0x262] ss:$0 sm:$0xff] }
0x1054   :  { %7303 = vrsqrt.f32 %v2795_v63 }
0x105e   :  { %v7304_v0 = vpop.eup %7303 }
0x105f   :  { %v2797_v2 = vmul.f32 %v7304_v0, %v2781_v51  ;;  %v2798_v3 = vmul.f32 %v7304_v0, %v2782_v52 }
0x1061   :  { %v2803_v5 = vmul.f32 %v6044_v1, %v2797_v2  ;;  %v2804_v6 = vmul.f32 %v6044_v1, %v2798_v3  ;;  %v6051_v1 = vld [vmem:[#allocation5 + $0x263] ss:$0 sm:$0xff] }
0x1063   :  { %v2809_v7 = vadd.f32 %v6045_v4, %v2803_v5  ;;  %v2810_v8 = vadd.f32 %v6045_v4, %v2804_v6  ;;  %v3135_v4 = vld [vmem:[#allocation5 + $0x295] sm:$0xff]  ;;  %v3136_v5 = vld [vmem:[#allocation5 + $0x29d] sm:$0xff] }
0x1065   :  { %6660 = vmatprep.mubr.msk.f32.mxu0 %vm140_vm1, %v2809_v7 }
0x1066   :  { %6661 = vmatmul.mubr.msk.f32.vlgmr.msra.gmra.mrb[34].mxu0 %vm140_vm1, %v2810_v8 }
0x1067   :  { %7119 = vmatpush3.bf16.msra.mxu0 %v7116_v23 }
0x1068   :  { %7121 = vmatprep.subr.bf16.mxu0 %v7120_v26 }
0x106b   :  { %7123 = vmatpush3.bf16.msra.mxu0 %v7120_v26  ;;  %v6058_v26 = vld [vmem:[#allocation5 + $0x2c6] ss:$0 sm:$0xff] }
0x106c   :  { %7125 = vmatprep.subr.bf16.mxu0 %v7124_v27 }
0x1139   :  { %v6662_v13 = vpop.f32.mrb[34].mxu0 }
0x113a   :  { %v2898_v14 = vadd.f32 %v6662_v13, %v6046_v12  ;;  %v2892_v15 = vpop.f32.mrb[35].mxu0  ;;  %v3220_v13 = vld [vmem:[#allocation5 + $0x2be] sm:$0xff] }
0x113b   :  { %v2893_v16 = vadd.f32 %v6046_v12, %v2892_v15  ;;  %v3219_v12 = vld [vmem:[#allocation5 + $0x2b6] sm:$0xff] }
0x113c   :  { %v2902_v18 = vmax.f32 %v2898_v14, 0.0  ;;  %v7136_v14 = vpack.c.bf16 %v3220_v13, %v3219_v12 }
0x113d   :  { %v2901_v17 = vmax.f32 %v2893_v16, 0.0 }
0x113f   :  { %6695 = vmatprep.mubr.f32.mxu1 %v2901_v17  ;;  %v6055_v17 = vld [vmem:[#allocation5 + $0x2a5] ss:$0 sm:$0xff] }
0x1140   :  { %6696 = vmatmul.mubr.f32.vlgmr.msra.gmra.mrb[26].mxu1 %v2902_v18 }
0x1141   :  { %6743 = vmatprep.mubr.msk.f32.mxu1 %vm7420_vm2, %v7419_v28 }
0x1213   :  { %v6697_v33 = vpop.f32.mrb[26].mxu1 }
0x1214   :  { %v2996_v34 = vadd.f32 %v6697_v33, %v6049_v32  ;;  %v2990_v30 = vpop.f32.mrb[27].mxu1 }
0x1215   :  { %v2991_v35 = vadd.f32 %v6049_v32, %v2990_v30 }
0x1216   :  { %v3000_v36 = vadd.f32 %v2996_v34, %v2810_v8  ;;  %v7128_v8 = vpack.c.bf16 %v3136_v5, %v3135_v4  ;;  %v3792_v4 = vld [vmem:[#allocation5 + $0x321] sm:$0xff]  ;;  %v3793_v5 = vld [vmem:[#allocation5 + $0x329] sm:$0xff] }
0x1217   :  { %v2999_v37 = vadd.f32 %v2991_v35, %v2809_v7 }
0x1218   :  { %v3004_v38 = vsel %vm140_vm1, %v3000_v36, 0.0 }
0x1219   :  { %v3003_v39 = vsel %vm140_vm1, %v2999_v37, 0.0 }
0x121a   :  { %v3005_v40 = vadd.f32 %v3004_v38, %v3003_v39 }
0x121c   :  { %v3006_v41 = vrot.slane %v3005_v40, 4 }
0x121e   :  { %v3007_v42 = vadd.f32 %v3006_v41, %v3005_v40 }
0x1220   :  { %v3008_v43 = vrot.slane %v3007_v42, 2 }
0x1222   :  { %v3009_v44 = vadd.f32 %v3008_v43, %v3007_v42 }
0x1224   :  { %v3010_v45 = vrot.slane %v3009_v44, 1 }
0x1226   :  { %v3011_v46 = vadd.f32 %v3010_v45, %v3009_v44 }
0x1228   :  { %v3012_v47 = vmul.f32 0.0625, %v3011_v46 }
0x122a   :  { %v3013_v48 = vsub.f32 %v2999_v37, %v3012_v47  ;;  %v3014_v49 = vsub.f32 %v3000_v36, %v3012_v47 }
0x122c   :  { %v3015_v50 = vmul.f32 %v3013_v48, %v3013_v48  ;;  %v3016_v51 = vmul.f32 %v3014_v49, %v3014_v49 }
0x122e   :  { %v3017_v52 = vsel %vm140_vm1, %v3015_v50, 0.0  ;;  %v3018_v53 = vsel %vm140_vm1, %v3016_v51, 0.0  ;;  %v3623_v50 = vld [vmem:[#allocation5 + $0x2d7] sm:$0xff] }
0x122f   :  { %v3019_v54 = vadd.f32 %v3018_v53, %v3017_v52  ;;  %v3706_v52 = vld [vmem:[#allocation5 + $0x2f0] sm:$0xff]  ;;  %v3707_v53 = vld [vmem:[#allocation5 + $0x2f8] sm:$0xff] }
0x1231   :  { %v3020_v20 = vrot.slane %v3019_v54, 4 }
0x1233   :  { %v3021_v19 = vadd.f32 %v3020_v20, %v3019_v54  ;;  %v7148_v54 = vpack.c.bf16 %v3707_v53, %v3706_v52 }
0x1235   :  { %v3022_v55 = vrot.slane %v3021_v19, 2 }
0x1237   :  { %v3023_v56 = vadd.f32 %v3022_v55, %v3021_v19  ;;  %v3624_v55 = vld [vmem:[#allocation5 + $0x2df] sm:$0xff] }
0x1239   :  { %v3024_v57 = vrot.slane %v3023_v56, 1 }
0x123b   :  { %v3025_v58 = vadd.f32 %v3024_v57, %v3023_v56  ;;  %v3625_v56 = vld [vmem:[#allocation5 + $0x2e7] sm:$0xff] }
0x123d   :  { %v3026_v59 = vmul.f32 0.0625, %v3025_v58 }
0x123f   :  { %v3027_v60 = vadd.f32 1e-05, %v3026_v59  ;;  %v7144_v59 = vpack.c.bf16 %v3625_v56, %v3624_v55 }
0x1241   :  { %7305 = vrsqrt.f32 %v3027_v60  ;;  %v3708_v60 = vld [vmem:[#allocation5 + $0x300] sm:$0xff] }
0x124b   :  { %v7306_v61 = vpop.eup %7305 }
0x124c   :  { %v3029_v63 = vmul.f32 %v7306_v61, %v3013_v48  ;;  %v3030_v0 = vmul.f32 %v7306_v61, %v3014_v49  ;;  %v3622_v49 = vld [vmem:[#allocation5 + $0x2cf] sm:$0xff] }
0x124d   :  { %v7140_v51 = vpack.c.bf16 %v3623_v50, %v3622_v49  ;;  %v3709_v61 = vld [vmem:[#allocation5 + $0x308] sm:$0xff] }
0x124e   :  { %v3035_v2 = vmul.f32 %v6050_v62, %v3029_v63  ;;  %v3036_v3 = vmul.f32 %v6050_v62, %v3030_v0  ;;  %v3790_v62 = vld [vmem:[#allocation5 + $0x311] sm:$0xff]  ;;  %v3791_v63 = vld [vmem:[#allocation5 + $0x319] sm:$0xff] }
0x1250   :  { %v7639_v6 = vadd.f32 %v6051_v1, %v3035_v2  ;;  %v7641_v7 = vadd.f32 %v6051_v1, %v3036_v3  ;;  %v7152_v2 = vpack.c.bf16 %v3709_v61, %v3708_v60  ;;  %v7156_v3 = vpack.c.bf16 %v3791_v63, %v3790_v62  ;;  %v4527_v60 = vld [vmem:[#allocation5 + $0x38c] sm:$0xff]  ;;  %v4528_v61 = vld [vmem:[#allocation5 + $0x394] sm:$0xff] }
0x1251   :  { %v7184_v62 = vpack.c.bf16 %v4528_v61, %v4527_v60  ;;  %v4194_v63 = vld [vmem:[#allocation5 + $0x332] sm:$0xff] }
0x1252   :  { %6706 = vmatprep.mubr.msk.f32.mxu0 %vm140_vm1, %v7639_v6  ;;  %v5183_v61 = vld [vmem:[#allocation5 + $0x3f7] sm:$0xff] }
0x1253   :  { %6707 = vmatmul.mubr.msk.f32.vlgmr.msra.gmra.mrb[36].mxu0 %vm140_vm1, %v7641_v7 }
0x1254   :  { %7127 = vmatpush3.bf16.msra.mxu0 %v7124_v27  ;;  %6717 = vmatprep.mubr.msk.f32.mxu0 %vm140_vm1, %v7639_v6 }
0x1255   :  { %7129 = vmatprep.subr.bf16.mxu0 %v7128_v8 }
0x1258   :  { %7131 = vmatpush3.bf16.msra.mxu0 %v7128_v8  ;;  %v7160_v8 = vpack.c.bf16 %v3793_v5, %v3792_v4 }
0x1259   :  { %7133 = vmatprep.subr.bf16.mxu0 %v7132_v11 }
0x125b   :  { %6718 = vmatmul.mubr.msk.f32.vlgmr.msra.gmra.mrb[38].mxu0 %vm140_vm1, %v7641_v7 }
0x125c   :  { %7135 = vmatpush3.bf16.msra.mxu0 %v7132_v11  ;;  %6728 = vmatprep.mubr.msk.f32.mxu0 %vm140_vm1, %v7639_v6 }
0x125d   :  { %7137 = vmatprep.subr.bf16.mxu0 %v7136_v14 }
0x1260   :  { %7139 = vmatpush3.bf16.msra.mxu0 %v7136_v14 }
0x1261   :  { %6731 = vmatprep.subr.mxu0 %v7419_v28 }
0x1263   :  { %6729 = vmatmul.mubr.msk.f32.vlgmr.msra.gmra.mrb[40].mxu0 %vm140_vm1, %v7641_v7 }
0x1264   :  { %6733 = vmatprep.mubr.msk.f32.mxu0 %vm7420_vm2, %v7419_v28 }
0x1326   :  { %v6708_v15 = vpop.f32.mrb[36].mxu0 }
0x1327   :  { %v3124_v16 = vpop.f32.mrb[37].mxu0  ;;  %v3130_v31 = vadd.f32 %v6708_v15, %v6052_v22  ;;  %v6070_v15 = vld [vmem:[#allocation5 + $0x310] ss:$0 sm:$0xff] }
0x1328   :  { %v3125_v24 = vadd.f32 %v6052_v22, %v3124_v16  ;;  %v6073_v22 = vld [vmem:[#allocation5 + $0x331] ss:$0 sm:$0xff] }
0x132e   :  { %v6719_v18 = vpop.f32.mrb[38].mxu0 }
0x132f   :  { %v3208_v21 = vpop.f32.mrb[39].mxu0  ;;  %v3214_v25 = vadd.f32 %v6719_v18, %v6055_v17  ;;  %v6067_v18 = vld [vmem:[#allocation5 + $0x2ef] ss:$0 sm:$0xff] }
0x1330   :  { %v3209_v23 = vadd.f32 %v6055_v17, %v3208_v21 }
0x1332   :  { %6732 = vmatpush3.xpose.msk.msra.mxu0 %vm390_vm3, %v3209_v23 }
0x1333   :  { %6736 = vmatprep.subr.mxu0 %v7419_v28 }
0x1335   :  { %6734 = vmatmul.mubr.msk.f32.vlgmr.msra.gmra.mrb[42].mxu0 %vm390_vm3, %v3125_v24 }
0x1336   :  { %v6730_v29 = vpop.f32.mrb[40].mxu0  ;;  %6737 = vmatpush3.xpose.msk.msra.mxu0 %vm390_vm3, %v3214_v25  ;;  %6738 = vmatprep.mubr.msk.f32.mxu0 %vm7420_vm2, %v7419_v28 }
0x1337   :  { %v3298_v27 = vadd.f32 %v6730_v29, %v6058_v26  ;;  %v3292_v32 = vpop.f32.mrb[41].mxu0  ;;  %6746 = vmatprep.subr.mxu0 %v7419_v28 }
0x1338   :  { %v3293_v33 = vadd.f32 %v6058_v26, %v3292_v32 }
0x1339   :  { %6739 = vmatmul.mubr.msk.f32.vlgmr.msra.gmra.mrb[44].mxu0 %vm390_vm3, %v3130_v31 }
0x133a   :  { %6742 = vmatpush3.msra.mxu1 %v3293_v33  ;;  %6747 = vmatpush3.msra.mxu0 %v3298_v27 }
0x133b   :  { %6748 = vmatprep.mubr.msk.f32.mxu0 %vm7420_vm2, %v7419_v28  ;;  %7141 = vmatprep.subr.bf16.mxu1 %v7140_v51 }
0x133c   :  { %7149 = vmatprep.subr.bf16.mxu0 %v7148_v54 }
0x1408   :  { %v3373_v34 = vpop.f32.mrb[42].mxu0 }
0x1409   :  { %v6735_v30 = vpop.f32.mrb[43].mxu0  ;;  %v3453_v35 = vsel %vm390_vm3, %v3373_v34, -inf }
0x140a   :  { %3454 = vmax.xlane.f32.xlu1 %v3453_v35 }
0x140c   :  { %v3449_v36 = vpop.f32.mrb[44].mxu0 }
0x140d   :  { %v6740_v37 = vpop.f32.mrb[45].mxu0  ;;  %v3456_v38 = vsel %vm390_vm3, %v3449_v36, -inf }
0x140e   :  { %3457 = vmax.xlane.f32.xlu0 %v3456_v38 }
0x1497   :  { %v3455_v39 = vpop.xlane.xlu1 %3454 }
0x1498   :  { %v3459_v40 = vsub.f32 %v3373_v34, %v3455_v39 }
0x149a   :  { %v3461_v41 = vmul.f32 1.442695, %v3459_v40 }
0x149b   :  { %v3458_v42 = vpop.xlane.xlu0 %3457 }
0x149c   :  { %7307 = vpow2.f32 %v3461_v41  ;;  %v3460_v43 = vsub.f32 %v3449_v36, %v3458_v42 }
0x149e   :  { %v3463_v44 = vmul.f32 1.442695, %v3460_v43 }
0x14a0   :  { %7309 = vpow2.f32 %v3463_v44 }
0x14a6   :  { %v7308_v45 = vpop.eup %7307 }
0x14a7   :  { %v3465_v46 = vsel %vm390_vm3, %v7308_v45, 0.0 }
0x14a8   :  { %3466 = vadd.xlane.f32.xlu1 %v3465_v46 }
0x14aa   :  { %v7310_v47 = vpop.eup %7309 }
0x14ab   :  { %v3468_v48 = vsel %vm390_vm3, %v7310_v47, 0.0 }
0x14ac   :  { %3469 = vadd.xlane.f32.xlu0 %v3468_v48  ;;  %v4358_v48 = vld [vmem:[#allocation5 + $0x342] sm:$0xff] }
0x1535   :  { %v3467_v20 = vpop.xlane.xlu1 %3466 }
0x1536   :  { %7311 = vrcp.f32 %v3467_v20  ;;  %v4360_v20 = vld [vmem:[#allocation5 + $0x352] sm:$0xff] }
0x1539   :  { %v3470_v19 = vpop.xlane.xlu0 %3469 }
0x153a   :  { %7313 = vrcp.f32 %v3470_v19 }
0x1540   :  { %v7312_v57 = vpop.eup %7311 }
0x1541   :  { %v3473_v58 = vmul.f32 %v7312_v57, %v7308_v45  ;;  %v4525_v57 = vld [vmem:[#allocation5 + $0x37c] sm:$0xff] }
0x1543   :  { %6744 = vmatmul.mubr.msk.f32.vlgmr.msra.gmra.mrb[28].mxu1 %vm390_vm3, %v3473_v58  ;;  %v4526_v58 = vld [vmem:[#allocation5 + $0x384] sm:$0xff] }
0x1544   :  { %v7314_v0 = vpop.eup %7313  ;;  %7143 = vmatpush3.bf16.msra.mxu1 %v7140_v51  ;;  %6759 = vmatprep.mubr.msk.f32.mxu1 %vm140_vm1, %v7639_v6 }
0x1545   :  { %v3474_v1 = vmul.f32 %v7314_v0, %v7310_v47  ;;  %7145 = vmatprep.subr.bf16.mxu1 %v7144_v59  ;;  %v4357_v47 = vld [vmem:[#allocation5 + $0x33a] sm:$0xff]  ;;  %v3621_v0 = vld [vmem:[#allocation5 + $0x2c7] sm:$0xff] }
0x1546   :  { %v7164_v49 = vpack.c.bf16 %v4358_v48, %v4357_v47  ;;  %v5013_v47 = vld [vmem:[#allocation5 + $0x3a5] sm:$0xff]  ;;  %v5014_v48 = vld [vmem:[#allocation5 + $0x3ad] sm:$0xff] }
0x1547   :  { %6749 = vmatmul.mubr.msk.f32.vlgmr.msra.gmra.mrb[46].mxu0 %vm390_vm3, %v3474_v1 }
0x1548   :  { %7147 = vmatpush3.bf16.msra.mxu1 %v7144_v59  ;;  %7151 = vmatpush3.bf16.msra.mxu0 %v7148_v54  ;;  %v4359_v54 = vld [vmem:[#allocation5 + $0x34a] sm:$0xff]  ;;  %v7180_v59 = vpack.c.bf16 %v4526_v58, %v4525_v57 }
0x1549   :  { %6770 = vmatprep.mubr.msk.f32.mxu0 %vm140_vm1, %v7639_v6  ;;  %7153 = vmatprep.subr.bf16.mxu0 %v7152_v2  ;;  %v7168_v56 = vpack.c.bf16 %v4360_v20, %v4359_v54  ;;  %v5016_v54 = vld [vmem:[#allocation5 + $0x3bd] sm:$0xff]  ;;  %v5181_v58 = vld [vmem:[#allocation5 + $0x3e7] sm:$0xff] }
0x154a   :  { %7157 = vmatprep.subr.bf16.mxu1 %v7156_v3 }
0x154b   :  { %6760 = vmatmul.mubr.msk.f32.vlgmr.msra.gmra.mrb[30].mxu1 %vm140_vm1, %v7641_v7 }
0x154c   :  { %7155 = vmatpush3.bf16.msra.mxu0 %v7152_v2  ;;  %7159 = vmatpush3.bf16.msra.mxu1 %v7156_v3  ;;  %v4441_v2 = vld [vmem:[#allocation5 + $0x35b] sm:$0xff]  ;;  %v4442_v3 = vld [vmem:[#allocation5 + $0x363] sm:$0xff] }
0x154d   :  { %6781 = vmatprep.mubr.msk.f32.mxu1 %vm140_vm1, %v7639_v6  ;;  %7161 = vmatprep.subr.bf16.mxu1 %v7160_v8  ;;  %v7172_v5 = vpack.c.bf16 %v4442_v3, %v4441_v2  ;;  %v5099_v3 = vld [vmem:[#allocation5 + $0x3d6] sm:$0xff] }
0x154e   :  { %6784 = vmatprep.subr.mxu0 %v7419_v28 }
0x154f   :  { %6771 = vmatmul.mubr.msk.f32.vlgmr.msra.gmra.mrb[48].mxu0 %vm140_vm1, %v7641_v7 }
0x1550   :  { %7163 = vmatpush3.bf16.msra.mxu1 %v7160_v8  ;;  %6786 = vmatprep.mubr.msk.f32.mxu0 %vm7420_vm2, %v7419_v28 }
0x1551   :  { %6794 = vmatprep.subr.mxu1 %v7419_v28 }
0x1553   :  { %6782 = vmatmul.mubr.msk.f32.vlgmr.msra.gmra.mrb[32].mxu1 %vm140_vm1, %v7641_v7 }
0x1554   :  { %6796 = vmatprep.mubr.msk.f32.mxu1 %vm7420_vm2, %v7419_v28 }
0x1616   :  { %v7692_v9 = vpop.f32.mrb[28].mxu1 }
0x1617   :  { %v6745_v10 = vpop.f32.mrb[29].mxu1 }
0x161a   :  { %v7694_v11 = vpop.f32.mrb[46].mxu0 }
0x161b   :  { %v6750_v12 = vpop.f32.mrb[47].mxu0 }
0x161c   :  { %v4443_v12 = vld [vmem:[#allocation5 + $0x36b] sm:$0xff] }
0x161e   :  { %v6761_v13 = vpop.f32.mrb[30].mxu1 }
0x161f   :  { %v3697_v14 = vpop.f32.mrb[31].mxu1  ;;  %v3703_v31 = vadd.f32 %v6761_v13, %v6067_v18  ;;  %v4444_v13 = vld [vmem:[#allocation5 + $0x373] sm:$0xff] }
0x1620   :  { %v3698_v24 = vadd.f32 %v6067_v18, %v3697_v14  ;;  %v7176_v14 = vpack.c.bf16 %v4444_v13, %v4443_v12  ;;  %v6089_v18 = vld [vmem:[#allocation5 + $0x37b] ss:$0 sm:$0xff] }
0x1622   :  { %v6772_v16 = vpop.f32.mrb[48].mxu0 }
0x1623   :  { %v3781_v17 = vpop.f32.mrb[49].mxu0  ;;  %v3787_v26 = vadd.f32 %v6772_v16, %v6070_v15 }
0x1624   :  { %v3782_v21 = vadd.f32 %v6070_v15, %v3781_v17 }
0x1626   :  { %v6783_v23 = vpop.f32.mrb[32].mxu1  ;;  %6785 = vmatpush3.xpose.msk.msra.mxu0 %vm390_vm3, %v3782_v21 }
0x1627   :  { %v3865_v25 = vpop.f32.mrb[33].mxu1  ;;  %6789 = vmatprep.subr.mxu0 %v7419_v28  ;;  %v3871_v27 = vadd.f32 %v6783_v23, %v6073_v22 }
0x1628   :  { %v3866_v29 = vadd.f32 %v6073_v22, %v3865_v25  ;;  %v6086_v22 = vld [vmem:[#allocation5 + $0x35a] ss:$0 sm:$0xff] }
0x1629   :  { %6787 = vmatmul.mubr.msk.f32.vlgmr.msra.gmra.mrb[50].mxu0 %vm390_vm3, %v3698_v24  ;;  %v6092_v24 = vld [vmem:[#allocation5 + $0x39c] ss:$0 sm:$0xff] }
0x162a   :  { %6790 = vmatpush3.xpose.msk.msra.mxu0 %vm390_vm3, %v3787_v26  ;;  %6795 = vmatpush3.msra.mxu1 %v3866_v29 }
0x162b   :  { %6791 = vmatprep.mubr.msk.f32.mxu0 %vm7420_vm2, %v7419_v28  ;;  %6799 = vmatprep.subr.mxu0 %v7419_v28 }
0x162c   :  { %6804 = vmatprep.subr.mxu1 %v4194_v63 }
0x162d   :  { %6792 = vmatmul.mubr.msk.f32.vlgmr.msra.gmra.mrb[52].mxu0 %vm390_vm3, %v3703_v31 }
0x162e   :  { %6800 = vmatpush3.msra.mxu0 %v3871_v27  ;;  %6801 = vmatprep.mubr.msk.f32.mxu0 %vm7420_vm2, %v7419_v28 }
0x162f   :  { %7165 = vmatprep.subr.bf16.mxu0 %v7164_v49 }
0x16fc   :  { %v3946_v32 = vpop.f32.mrb[50].mxu0 }
0x16fd   :  { %v6788_v33 = vpop.f32.mrb[51].mxu0  ;;  %v4026_v34 = vsel %vm390_vm3, %v3946_v32, -inf }
0x16fe   :  { %4027 = vmax.xlane.f32.xlu0 %v4026_v34 }
0x1700   :  { %v4022_v30 = vpop.f32.mrb[52].mxu0 }
0x1701   :  { %v6793_v35 = vpop.f32.mrb[53].mxu0  ;;  %v4029_v36 = vsel %vm390_vm3, %v4022_v30, -inf }
0x1702   :  { %4030 = vmax.xlane.f32.xlu1 %v4029_v36 }
0x178b   :  { %v4028_v37 = vpop.xlane.xlu0 %4027 }
0x178c   :  { %v4032_v38 = vsub.f32 %v3946_v32, %v4028_v37 }
0x178e   :  { %v4034_v39 = vmul.f32 1.442695, %v4032_v38 }
0x178f   :  { %v4031_v40 = vpop.xlane.xlu1 %4030 }
0x1790   :  { %7315 = vpow2.f32 %v4034_v39  ;;  %v4033_v41 = vsub.f32 %v4022_v30, %v4031_v40 }
0x1792   :  { %v4036_v42 = vmul.f32 1.442695, %v4033_v41 }
0x1794   :  { %7317 = vpow2.f32 %v4036_v42 }
0x179a   :  { %v7316_v43 = vpop.eup %7315 }
0x179b   :  { %v4038_v44 = vsel %vm390_vm3, %v7316_v43, 0.0 }
0x179c   :  { %4039 = vadd.xlane.f32.xlu0 %v4038_v44 }
0x179e   :  { %v7318_v45 = vpop.eup %7317 }
0x179f   :  { %v4041_v46 = vsel %vm390_vm3, %v7318_v45, 0.0 }
0x17a0   :  { %4042 = vadd.xlane.f32.xlu1 %v4041_v46 }
0x1829   :  { %v4040_v50 = vpop.xlane.xlu0 %4039 }
0x182a   :  { %7319 = vrcp.f32 %v4040_v50  ;;  %v4929_v50 = vld [vmem:[#allocation5 + $0x39d] sm:$0xff] }
0x182d   :  { %v4043_v51 = vpop.xlane.xlu1 %4042 }
0x182e   :  { %7321 = vrcp.f32 %v4043_v51 }
0x1834   :  { %v7320_v52 = vpop.eup %7319 }
0x1835   :  { %v4046_v53 = vmul.f32 %v7320_v52, %v7316_v43 }
0x1837   :  { %6797 = vmatmul.mubr.msk.f32.vlgmr.msra.gmra.mrb[34].mxu1 %vm390_vm3, %v4046_v53  ;;  %v5015_v53 = vld [vmem:[#allocation5 + $0x3b5] sm:$0xff] }
0x1838   :  { %v7322_v19 = vpop.eup %7321  ;;  %6805 = vmatpush3.msra.mxu1 %v4194_v63 }
0x1839   :  { %v4047_v55 = vmul.f32 %v7322_v19, %v7318_v45  ;;  %6809 = vmatprep.subr.mxu1 %v3621_v0 }
0x183b   :  { %6802 = vmatmul.mubr.msk.f32.vlgmr.msra.gmra.mrb[54].mxu0 %vm390_vm3, %v4047_v55 }
0x183c   :  { %7167 = vmatpush3.bf16.msra.mxu0 %v7164_v49  ;;  %6822 = vmatprep.mubr.msk.f32.mxu0 %vm140_vm1, %v7639_v6  ;;  %v7188_v49 = vpack.c.bf16 %v5014_v48, %v5013_v47 }
0x183d   :  { %7169 = vmatprep.subr.bf16.mxu0 %v7168_v56 }
0x1840   :  { %7171 = vmatpush3.bf16.msra.mxu0 %v7168_v56  ;;  %v7192_v56 = vpack.c.bf16 %v5016_v54, %v5015_v53 }
0x1841   :  { %7181 = vmatprep.subr.bf16.mxu0 %v7180_v59 }
0x1843   :  { %6823 = vmatmul.mubr.msk.f32.vlgmr.msra.gmra.mrb[56].mxu0 %vm140_vm1, %v7641_v7 }
0x1844   :  { %7183 = vmatpush3.bf16.msra.mxu0 %v7180_v59  ;;  %6844 = vmatprep.mubr.msk.f32.mxu0 %vm140_vm1, %v7639_v6  ;;  %v5182_v59 = vld [vmem:[#allocation5 + $0x3ef] sm:$0xff] }
0x1845   :  { %7185 = vmatprep.subr.bf16.mxu0 %v7184_v62  ;;  %v7204_v60 = vpack.c.bf16 %v5182_v59, %v5181_v58  ;;  %v5723_v58 = vld [vmem:[#allocation5 + $0x42b] sm:$0xff] }
0x1848   :  { %7187 = vmatpush3.bf16.msra.mxu0 %v7184_v62  ;;  %v5184_v62 = vld [vmem:[#allocation5 + $0x3ff] sm:$0xff] }
0x1849   :  { %6852 = vmatprep.subr.mxu0 %v7419_v28  ;;  %v7208_v63 = vpack.c.bf16 %v5184_v62, %v5183_v61  ;;  %v5813_v61 = vld [vmem:[#allocation5 + $0x43c] sm:$0xff]  ;;  %v5814_v62 = vld [vmem:[#allocation5 + $0x444] sm:$0xff] }
0x184b   :  { %6845 = vmatmul.mubr.msk.f32.vlgmr.msra.gmra.mrb[58].mxu0 %vm140_vm1, %v7641_v7 }
0x184c   :  { %6854 = vmatprep.mubr.msk.f32.mxu0 %vm7420_vm2, %v7419_v28 }
0x190a   :  { %v4117_v1 = vpop.f32.mrb[34].mxu1 }
0x190b   :  { %v6798_v4 = vpop.f32.mrb[35].mxu1  ;;  %6806 = vmatprep.mubr.msk.f32.mxu1 %vm390_vm3, %v4117_v1  ;;  %v5098_v1 = vld [vmem:[#allocation5 + $0x3ce] sm:$0xff] }
0x190c   :  { %v5100_v4 = vld [vmem:[#allocation5 + $0x3de] sm:$0xff] }
0x190d   :  { %v7200_v12 = vpack.c.bf16 %v5100_v4, %v5099_v3  ;;  %v5817_v3 = vld [vmem:[#allocation5 + $0x45c] sm:$0xff] }
0x190e   :  { %v4190_v8 = vpop.f32.mrb[54].mxu0 }
0x190f   :  { %v6803_v10 = vpop.f32.mrb[55].mxu0  ;;  %6807 = vmatmul.mubr.msk.f32.vlgmr.msra.gmra.mrb[36].mxu1 %vm390_vm3, %v4190_v8 }
0x1910   :  { %6810 = vmatpush3.msra.mxu1 %v3621_v0  ;;  %6811 = vmatprep.mubr.msk.f32.mxu1 %vm390_vm3, %v7692_v9  ;;  %v5097_v0 = vld [vmem:[#allocation5 + $0x3c6] sm:$0xff] }
0x1911   :  { %7173 = vmatprep.subr.bf16.mxu1 %v7172_v5  ;;  %v7196_v2 = vpack.c.bf16 %v5098_v1, %v5097_v0  ;;  %v5815_v0 = vld [vmem:[#allocation5 + $0x44c] sm:$0xff] }
0x1912   :  { %v7224_v1 = vpack.c.bf16 %v5815_v0, %v5814_v62 }
0x1916   :  { %v6824_v15 = vpop.f32.mrb[56].mxu0 }
0x1917   :  { %v4432_v16 = vpop.f32.mrb[57].mxu0  ;;  %6812 = vmatmul.mubr.msk.f32.vlgmr.msra.gmra.mrb[36].mxu1 %vm390_vm3, %v7694_v11  ;;  %v4438_v26 = vadd.f32 %v6824_v15, %v6086_v22 }
0x1918   :  { %7175 = vmatpush3.bf16.msra.mxu1 %v7172_v5  ;;  %6833 = vmatprep.mubr.msk.f32.mxu1 %vm140_vm1, %v7639_v6  ;;  %v4433_v29 = vadd.f32 %v6086_v22, %v4432_v16  ;;  %v6109_v16 = vld [vmem:[#allocation5 + $0x407] ss:$0 sm:$0xff]  ;;  %v6106_v22 = vld [vmem:[#allocation5 + $0x3e6] ss:$0 sm:$0xff] }
0x1919   :  { %7177 = vmatprep.subr.bf16.mxu1 %v7176_v14 }
0x191c   :  { %7179 = vmatpush3.bf16.msra.mxu1 %v7176_v14 }
0x191d   :  { %6847 = vmatprep.subr.mxu1 %v7419_v28 }
0x191e   :  { %v6846_v17 = vpop.f32.mrb[58].mxu0 }
0x191f   :  { %6834 = vmatmul.mubr.msk.f32.vlgmr.msra.gmra.mrb[38].mxu1 %vm140_vm1, %v7641_v7  ;;  %v4600_v9 = vpop.f32.mrb[59].mxu0  ;;  %v4606_v31 = vadd.f32 %v6846_v17, %v6092_v24 }
0x1920   :  { %6849 = vmatprep.mubr.msk.f32.mxu1 %vm7420_vm2, %v7419_v28  ;;  %v4601_v27 = vadd.f32 %v6092_v24, %v4600_v9  ;;  %v6103_v24 = vld [vmem:[#allocation5 + $0x3c5] ss:$0 sm:$0xff] }
0x19f2   :  { %v6835_v21 = vpop.f32.mrb[38].mxu1 }
0x19f3   :  { %v4522_v11 = vadd.f32 %v6835_v21, %v6089_v18  ;;  %v4516_v23 = vpop.f32.mrb[39].mxu1 }
0x19f4   :  { %v4517_v25 = vadd.f32 %v6089_v18, %v4516_v23 }
0x19f5   :  { %6853 = vmatpush3.xpose.msk.msra.mxu0 %vm390_vm3, %v4522_v11 }
0x19f6   :  { %6848 = vmatpush3.xpose.msk.msra.mxu1 %vm390_vm3, %v4517_v25  ;;  %6862 = vmatprep.subr.mxu0 %v7419_v28 }
0x19f7   :  { %6857 = vmatprep.subr.mxu1 %v7419_v28 }
0x19f8   :  { %6855 = vmatmul.mubr.msk.f32.vlgmr.msra.gmra.mrb[60].mxu0 %vm390_vm3, %v4438_v26 }
0x19f9   :  { %6850 = vmatmul.mubr.msk.f32.vlgmr.msra.gmra.mrb[40].mxu1 %vm390_vm3, %v4433_v29  ;;  %6863 = vmatpush3.msra.mxu0 %v4606_v31 }
0x19fa   :  { %6858 = vmatpush3.msra.mxu1 %v4601_v27  ;;  %6864 = vmatprep.mubr.msk.f32.mxu0 %vm7420_vm2, %v7419_v28 }
0x19fb   :  { %6859 = vmatprep.mubr.msk.f32.mxu1 %vm7420_vm2, %v7419_v28  ;;  %7189 = vmatprep.subr.bf16.mxu0 %v7188_v49 }
0x19fc   :  { %6867 = vmatprep.subr.mxu1 %v4929_v50 }
0x1acb   :  { %v4757_v32 = vpop.f32.mrb[60].mxu0 }
0x1acc   :  { %v4681_v33 = vpop.f32.mrb[40].mxu1  ;;  %v6856_v34 = vpop.f32.mrb[61].mxu0  ;;  %v4764_v30 = vsel %vm390_vm3, %v4757_v32, -inf }
0x1acd   :  { %4765 = vmax.xlane.f32.xlu1 %v4764_v30  ;;  %v6851_v35 = vpop.f32.mrb[41].mxu1  ;;  %v4761_v36 = vsel %vm390_vm3, %v4681_v33, -inf }
0x1ace   :  { %4762 = vmax.xlane.f32.xlu0 %v4761_v36 }
0x1b5a   :  { %v4766_v37 = vpop.xlane.xlu1 %4765 }
0x1b5b   :  { %v4768_v38 = vsub.f32 %v4757_v32, %v4766_v37  ;;  %v4763_v39 = vpop.xlane.xlu0 %4762 }
0x1b5c   :  { %v4767_v40 = vsub.f32 %v4681_v33, %v4763_v39 }
0x1b5d   :  { %v4771_v41 = vmul.f32 1.442695, %v4768_v38 }
0x1b5e   :  { %v4769_v42 = vmul.f32 1.442695, %v4767_v40 }
0x1b5f   :  { %7323 = vpow2.f32 %v4771_v41 }
0x1b60   :  { %7325 = vpow2.f32 %v4769_v42 }
0x1b69   :  { %v7324_v43 = vpop.eup %7323 }
0x1b6a   :  { %v7326_v44 = vpop.eup %7325  ;;  %v4776_v45 = vsel %vm390_vm3, %v7324_v43, 0.0 }
0x1b6b   :  { %4777 = vadd.xlane.f32.xlu1 %v4776_v45  ;;  %v4773_v46 = vsel %vm390_vm3, %v7326_v44, 0.0 }
0x1b6c   :  { %4774 = vadd.xlane.f32.xlu0 %v4773_v46 }
0x1bf8   :  { %v4778_v51 = vpop.xlane.xlu1 %4777 }
0x1bf9   :  { %7327 = vrcp.f32 %v4778_v51  ;;  %v4775_v52 = vpop.xlane.xlu0 %4774  ;;  %v5585_v51 = vld [vmem:[#allocation5 + $0x408] sm:$0xff] }
0x1bfa   :  { %7329 = vrcp.f32 %v4775_v52 }
0x1c03   :  { %v7328_v20 = vpop.eup %7327 }
0x1c04   :  { %v7330_v19 = vpop.eup %7329  ;;  %v4782_v55 = vmul.f32 %v7328_v20, %v7324_v43 }
0x1c05   :  { %v4781_v57 = vmul.f32 %v7330_v19, %v7326_v44  ;;  %v5720_v19 = vld [vmem:[#allocation5 + $0x413] sm:$0xff] }
0x1c06   :  { %6865 = vmatmul.mubr.msk.f32.vlgmr.msra.gmra.mrb[62].mxu0 %vm390_vm3, %v4782_v55  ;;  %v5721_v55 = vld [vmem:[#allocation5 + $0x41b] sm:$0xff] }
0x1c07   :  { %7191 = vmatpush3.bf16.msra.mxu0 %v7188_v49  ;;  %6860 = vmatmul.mubr.msk.f32.vlgmr.msra.gmra.mrb[42].mxu1 %vm390_vm3, %v4781_v57  ;;  %v5722_v57 = vld [vmem:[#allocation5 + $0x423] sm:$0xff] }
0x1c08   :  { %6880 = vmatprep.mubr.msk.f32.mxu0 %vm140_vm1, %v7639_v6  ;;  %7193 = vmatprep.subr.bf16.mxu0 %v7192_v56  ;;  %v7216_v59 = vpack.c.bf16 %v5723_v58, %v5722_v57  ;;  %v5826_v58 = vld [vmem:[#allocation5 + $0x4a4] sm:$0xff] }
0x1c09   :  { %6868 = vmatpush3.msra.mxu1 %v4929_v50 }
0x1c0a   :  { %7197 = vmatprep.subr.bf16.mxu1 %v7196_v2 }
0x1c0b   :  { %7195 = vmatpush3.bf16.msra.mxu0 %v7192_v56  ;;  %v7212_v56 = vpack.c.bf16 %v5721_v55, %v5720_v19 }
0x1c0c   :  { %7205 = vmatprep.subr.bf16.mxu0 %v7204_v60 }
0x1c0e   :  { %6881 = vmatmul.mubr.msk.f32.vlgmr.msra.gmra.mrb[64].mxu0 %vm140_vm1, %v7641_v7 }
0x1c0f   :  { %7207 = vmatpush3.bf16.msra.mxu0 %v7204_v60  ;;  %6902 = vmatprep.mubr.msk.f32.mxu0 %vm140_vm1, %v7639_v6  ;;  %v5812_v60 = vld [vmem:[#allocation5 + $0x434] sm:$0xff] }
0x1c10   :  { %7209 = vmatprep.subr.bf16.mxu0 %v7208_v63 }
0x1c13   :  { %7211 = vmatpush3.bf16.msra.mxu0 %v7208_v63  ;;  %v7220_v63 = vpack.c.bf16 %v5813_v61, %v5812_v60  ;;  %v6123_v61 = vld [vmem:[#allocation5 + $0x433] ss:$0 sm:$0xff] }
0x1c14   :  { %6915 = vmatprep.subr.mxu0 %v7419_v28 }
0x1c16   :  { %6903 = vmatmul.mubr.msk.f32.vlgmr.msra.gmra.mrb[66].mxu0 %vm140_vm1, %v7641_v7 }
0x1c17   :  { %6917 = vmatprep.mubr.msk.f32.mxu0 %vm7420_vm2, %v7419_v28 }
0x1cd9   :  { %v4925_v5 = vpop.f32.mrb[62].mxu0 }
0x1cda   :  { %v4852_v8 = vpop.f32.mrb[42].mxu1  ;;  %v6866_v10 = vpop.f32.mrb[63].mxu0 }
0x1cdb   :  { %v6861_v13 = vpop.f32.mrb[43].mxu1  ;;  %6869 = vmatprep.mubr.msk.f32.mxu1 %vm390_vm3, %v4852_v8  ;;  %v5819_v8 = vld [vmem:[#allocation5 + $0x46c] sm:$0xff] }
0x1cdc   :  { %6870 = vmatmul.mubr.msk.f32.vlgmr.msra.gmra.mrb[36].mxu1 %vm390_vm3, %v4925_v5  ;;  %v5818_v5 = vld [vmem:[#allocation5 + $0x464] sm:$0xff]  ;;  %v5821_v13 = vld [vmem:[#allocation5 + $0x47c] sm:$0xff] }
0x1cdd   :  { %7199 = vmatpush3.bf16.msra.mxu1 %v7196_v2  ;;  %6891 = vmatprep.mubr.msk.f32.mxu1 %vm140_vm1, %v7639_v6  ;;  %v5816_v2 = vld [vmem:[#allocation5 + $0x454] sm:$0xff]  ;;  %v7232_v10 = vpack.c.bf16 %v5819_v8, %v5818_v5 }
0x1cde   :  { %7201 = vmatprep.subr.bf16.mxu1 %v7200_v12  ;;  %v7228_v4 = vpack.c.bf16 %v5817_v3, %v5816_v2 }
0x1ce1   :  { %v6882_v14 = vpop.f32.mrb[64].mxu0  ;;  %7203 = vmatpush3.bf16.msra.mxu1 %v7200_v12  ;;  %v5820_v12 = vld [vmem:[#allocation5 + $0x474] sm:$0xff] }
0x1ce2   :  { %v5088_v15 = vpop.f32.mrb[65].mxu0  ;;  %6905 = vmatprep.subr.mxu1 %v7419_v28  ;;  %v5094_v31 = vadd.f32 %v6882_v14, %v6103_v24  ;;  %v7236_v14 = vpack.c.bf16 %v5821_v13, %v5820_v12 }
0x1ce3   :  { %v5089_v26 = vadd.f32 %v6103_v24, %v5088_v15  ;;  %v5822_v15 = vld [vmem:[#allocation5 + $0x484] sm:$0xff] }
0x1ce4   :  { %6892 = vmatmul.mubr.msk.f32.vlgmr.msra.gmra.mrb[44].mxu1 %vm140_vm1, %v7641_v7 }
0x1ce5   :  { %6907 = vmatprep.mubr.msk.f32.mxu1 %vm7420_vm2, %v7419_v28 }
0x1ce9   :  { %v6904_v17 = vpop.f32.mrb[66].mxu0 }
0x1cea   :  { %v5262_v9 = vadd.f32 %v6904_v17, %v6109_v16  ;;  %v5256_v18 = vpop.f32.mrb[67].mxu0 }
0x1ceb   :  { %v5257_v21 = vadd.f32 %v6109_v16, %v5256_v18  ;;  %v5823_v16 = vld [vmem:[#allocation5 + $0x48c] sm:$0xff]  ;;  %v5825_v18 = vld [vmem:[#allocation5 + $0x49c] sm:$0xff] }
0x1cec   :  { %v7240_v17 = vpack.c.bf16 %v5823_v16, %v5822_v15 }
0x1ced   :  { %6916 = vmatpush3.msra.mxu0 %v5257_v21 }
0x1cee   :  { %7213 = vmatprep.subr.bf16.mxu0 %v7212_v56 }
0x1db7   :  { %v6893_v11 = vpop.f32.mrb[44].mxu1 }
0x1db8   :  { %v5172_v23 = vpop.f32.mrb[45].mxu1  ;;  %v5178_v29 = vadd.f32 %v6893_v11, %v6106_v22 }
0x1db9   :  { %v5173_v25 = vadd.f32 %v6106_v22, %v5172_v23  ;;  %v6120_v22 = vld [vmem:[#allocation5 + $0x410] ss:$0 sm:$0xff] }
0x1dbb   :  { %6906 = vmatpush3.xpose.msk.msra.mxu1 %vm390_vm3, %v5173_v25 }
0x1dbc   :  { %6910 = vmatprep.subr.mxu1 %v7419_v28 }
0x1dbe   :  { %6908 = vmatmul.mubr.msk.f32.vlgmr.msra.gmra.mrb[46].mxu1 %vm390_vm3, %v5089_v26 }
0x1dbf   :  { %6911 = vmatpush3.xpose.msk.msra.mxu1 %vm390_vm3, %v5178_v29  ;;  %6912 = vmatprep.mubr.msk.f32.mxu1 %vm7420_vm2, %v7419_v28 }
0x1dc0   :  { %6920 = vmatprep.subr.mxu1 %v7419_v28 }
0x1dc2   :  { %6913 = vmatmul.mubr.msk.f32.vlgmr.msra.gmra.mrb[48].mxu1 %vm390_vm3, %v5094_v31 }
0x1dc3   :  { %6921 = vmatpush3.msra.mxu1 %v5262_v9  ;;  %6922 = vmatprep.mubr.msk.f32.mxu1 %vm7420_vm2, %v7419_v28  ;;  %v5824_v9 = vld [vmem:[#allocation5 + $0x494] sm:$0xff] }
0x1dc4   :  { %6925 = vmatprep.subr.mxu1 %v5585_v51  ;;  %v7244_v21 = vpack.c.bf16 %v5825_v18, %v5824_v9 }
0x1e91   :  { %v5337_v27 = vpop.f32.mrb[46].mxu1 }
0x1e92   :  { %v6909_v32 = vpop.f32.mrb[47].mxu1  ;;  %v5417_v33 = vsel %vm390_vm3, %v5337_v27, -inf }
0x1e93   :  { %5418 = vmax.xlane.f32.xlu0 %v5417_v33 }
0x1e95   :  { %v5413_v34 = vpop.f32.mrb[48].mxu1 }
0x1e96   :  { %v6914_v30 = vpop.f32.mrb[49].mxu1  ;;  %v5420_v35 = vsel %vm390_vm3, %v5413_v34, -inf }
0x1e97   :  { %5421 = vmax.xlane.f32.xlu1 %v5420_v35 }
0x1f20   :  { %v5419_v36 = vpop.xlane.xlu0 %5418 }
0x1f21   :  { %v5423_v37 = vsub.f32 %v5337_v27, %v5419_v36 }
0x1f23   :  { %v5425_v38 = vmul.f32 1.442695, %v5423_v37 }
0x1f24   :  { %v5422_v39 = vpop.xlane.xlu1 %5421 }
0x1f25   :  { %7331 = vpow2.f32 %v5425_v38  ;;  %v5424_v40 = vsub.f32 %v5413_v34, %v5422_v39 }
0x1f27   :  { %v5427_v41 = vmul.f32 1.442695, %v5424_v40 }
0x1f29   :  { %7333 = vpow2.f32 %v5427_v41 }
0x1f2f   :  { %v7332_v42 = vpop.eup %7331 }
0x1f30   :  { %v5429_v28 = vsel %vm390_vm3, %v7332_v42, 0.0 }
0x1f31   :  { %5430 = vadd.xlane.f32.xlu0 %v5429_v28 }
0x1f33   :  { %v7334_v43 = vpop.eup %7333 }
0x1f34   :  { %v5432_v44 = vsel %vm390_vm3, %v7334_v43, 0.0 }
0x1f35   :  { %5433 = vadd.xlane.f32.xlu1 %v5432_v44 }
0x1fbe   :  { %v5431_v45 = vpop.xlane.xlu0 %5430 }
0x1fbf   :  { %7335 = vrcp.f32 %v5431_v45 }
0x1fc2   :  { %v5434_v46 = vpop.xlane.xlu1 %5433 }
0x1fc3   :  { %7337 = vrcp.f32 %v5434_v46 }
0x1fc9   :  { %v7336_v47 = vpop.eup %7335 }
0x1fca   :  { %v5437_v48 = vmul.f32 %v7336_v47, %v7332_v42 }
0x1fcc   :  { %6918 = vmatmul.mubr.msk.f32.vlgmr.msra.gmra.mrb[68].mxu0 %vm390_vm3, %v5437_v48 }
0x1fcd   :  { %v7338_v49 = vpop.eup %7337  ;;  %7215 = vmatpush3.bf16.msra.mxu0 %v7212_v56 }
0x1fce   :  { %v5438_v50 = vmul.f32 %v7338_v49, %v7334_v43  ;;  %7217 = vmatprep.subr.bf16.mxu0 %v7216_v59 }
0x1fd0   :  { %6923 = vmatmul.mubr.msk.f32.vlgmr.msra.gmra.mrb[50].mxu1 %vm390_vm3, %v5438_v50 }
0x1fd1   :  { %6926 = vmatpush3.msra.mxu1 %v5585_v51  ;;  %7219 = vmatpush3.bf16.msra.mxu0 %v7216_v59  ;;  %v5827_v59 = vld [vmem:[#allocation5 + $0x4ac] sm:$0xff] }
0x1fd2   :  { %7221 = vmatprep.subr.bf16.mxu1 %v7220_v63  ;;  %v7248_v60 = vpack.c.bf16 %v5827_v59, %v5826_v58 }
0x209f   :  { %v5508_v52 = vpop.f32.mrb[68].mxu0 }
0x20a0   :  { %v6919_v53 = vpop.f32.mrb[69].mxu0  ;;  %6927 = vmatprep.mubr.msk.f32.mxu1 %vm390_vm3, %v5508_v52  ;;  %v6121_v52 = vld [vmem:[#allocation5 + $0x411] ss:$0 sm:$0xff] }
0x20a3   :  { %v5581_v54 = vpop.f32.mrb[50].mxu1 }
0x20a4   :  { %v6924_v20 = vpop.f32.mrb[51].mxu1  ;;  %6928 = vmatmul.mubr.msk.f32.vlgmr.msra.gmra.mrb[36].mxu1 %vm390_vm3, %v5581_v54 }
0x20a5   :  { %7223 = vmatpush3.bf16.msra.mxu1 %v7220_v63  ;;  %v6122_v20 = vld [vmem:[#allocation5 + $0x412] ss:$0 sm:$0xff] }
0x20a6   :  { %7225 = vmatprep.subr.bf16.mxu1 %v7224_v1 }
0x20a9   :  { %7227 = vmatpush3.bf16.msra.mxu1 %v7224_v1 }
0x20aa   :  { %7229 = vmatprep.subr.bf16.mxu1 %v7228_v4 }
0x20ad   :  { %7231 = vmatpush3.bf16.msra.mxu1 %v7228_v4  ;;  %v6126_v4 = vld [vmem:[#allocation5 + $0x4b4] ss:$0 sm:$0xff] }
0x20ae   :  { %7233 = vmatprep.subr.bf16.mxu1 %v7232_v10 }
0x20b1   :  { %7235 = vmatpush3.bf16.msra.mxu1 %v7232_v10 }
0x20b2   :  { %7237 = vmatprep.subr.bf16.mxu1 %v7236_v14 }
0x20b5   :  { %7239 = vmatpush3.bf16.msra.mxu1 %v7236_v14 }
0x20b6   :  { %7241 = vmatprep.subr.bf16.mxu1 %v7240_v17 }
0x20b9   :  { %7243 = vmatpush3.bf16.msra.mxu1 %v7240_v17 }
0x20ba   :  { %7245 = vmatprep.subr.bf16.mxu1 %v7244_v21 }
0x20bd   :  { %7247 = vmatpush3.bf16.msra.mxu1 %v7244_v21 }
0x20be   :  { %7249 = vmatprep.subr.bf16.mxu1 %v7248_v60 }
0x20c1   :  { %7251 = vmatpush3.bf16.msra.mxu1 %v7248_v60 }
0x2177   :  { %v6929_v11 = vpop.f32.mrb[36].mxu1 }
0x2178   :  { %v5675_v23 = vadd.f32 %v6929_v11, %v6120_v22  ;;  %v5658_v24 = vpop.f32.mrb[37].mxu1 }
0x2179   :  { %v5674_v25 = vadd.f32 %v6120_v22, %v5658_v24 }
0x217a   :  { %v5677_v26 = vadd.f32 %v5675_v23, %v7641_v7 }
0x217b   :  { %v5676_v29 = vadd.f32 %v5674_v25, %v7639_v6 }
0x217c   :  { %v5681_v31 = vsel %vm140_vm1, %v5677_v26, 0.0 }
0x217d   :  { %v5680_v27 = vsel %vm140_vm1, %v5676_v29, 0.0 }
0x217e   :  { %v5682_v32 = vadd.f32 %v5681_v31, %v5680_v27 }
0x2180   :  { %v5683_v33 = vrot.slane %v5682_v32, 4 }
0x2182   :  { %v5684_v34 = vadd.f32 %v5683_v33, %v5682_v32 }
0x2184   :  { %v5685_v30 = vrot.slane %v5684_v34, 2 }
0x2186   :  { %v5686_v35 = vadd.f32 %v5685_v30, %v5684_v34 }
0x2188   :  { %v5687_v36 = vrot.slane %v5686_v35, 1 }
0x218a   :  { %v5688_v37 = vadd.f32 %v5687_v36, %v5686_v35 }
0x218c   :  { %v5689_v38 = vmul.f32 0.0625, %v5688_v37 }
0x218e   :  { %v5690_v39 = vsub.f32 %v5676_v29, %v5689_v38  ;;  %v5691_v40 = vsub.f32 %v5677_v26, %v5689_v38 }
0x2190   :  { %v5692_v41 = vmul.f32 %v5690_v39, %v5690_v39  ;;  %v5693_v42 = vmul.f32 %v5691_v40, %v5691_v40 }
0x2192   :  { %v5694_v7 = vsel %vm140_vm1, %v5692_v41, 0.0  ;;  %v5695_v6 = vsel %vm140_vm1, %v5693_v42, 0.0  ;;  %v6127_v42 = vld [vmem:[#allocation5 + $0x4b5] ss:$0 sm:$0xff] }
0x2193   :  { %v5696_v28 = vadd.f32 %v5695_v6, %v5694_v7 }
0x2195   :  { %v5697_v43 = vrot.slane %v5696_v28, 4 }
0x2197   :  { %v5698_v44 = vadd.f32 %v5697_v43, %v5696_v28  ;;  %v6128_v28 = vld [vmem:[#allocation5 + $0x4b6] ss:$0 sm:$0xff] }
0x2199   :  { %v5699_v45 = vrot.slane %v5698_v44, 2 }
0x219b   :  { %v5700_v46 = vadd.f32 %v5699_v45, %v5698_v44 }
0x219d   :  { %v5701_v47 = vrot.slane %v5700_v46, 1 }
0x219f   :  { %v5702_v48 = vadd.f32 %v5701_v47, %v5700_v46 }
0x21a1   :  { %v5703_v49 = vmul.f32 0.0625, %v5702_v48 }
0x21a3   :  { %v5704_v50 = vadd.f32 1e-05, %v5703_v49 }
0x21a5   :  { %7339 = vrsqrt.f32 %v5704_v50 }
0x21af   :  { %v7340_v51 = vpop.eup %7339 }
0x21b0   :  { %v5706_v53 = vmul.f32 %v7340_v51, %v5690_v39  ;;  %v5707_v54 = vmul.f32 %v7340_v51, %v5691_v40 }
0x21b2   :  { %v5712_v19 = vmul.f32 %v6121_v52, %v5706_v53  ;;  %v5713_v55 = vmul.f32 %v6121_v52, %v5707_v54 }
0x21b4   :  { %v5718_v56 = vadd.f32 %v6122_v20, %v5712_v19  ;;  %v5719_v57 = vadd.f32 %v6122_v20, %v5713_v55 }
0x21b6   :  { %6938 = vmatprep.mubr.msk.f32.mxu0 %vm140_vm1, %v5718_v56 }
0x21b7   :  { %6939 = vmatmul.mubr.msk.f32.vlgmr.msra.gmra.mrb[70].mxu0 %vm140_vm1, %v5719_v57 }
0x228a   :  { %v6940_v62 = vpop.f32.mrb[70].mxu0 }
0x228b   :  { %v5807_v63 = vadd.f32 %v6940_v62, %v6123_v61  ;;  %v5801_v0 = vpop.f32.mrb[71].mxu0 }
0x228c   :  { %v5802_v1 = vadd.f32 %v6123_v61, %v5801_v0 }
0x228d   :  { %v5811_v3 = vmax.f32 %v5807_v63, 0.0 }
0x228e   :  { %v5810_v2 = vmax.f32 %v5802_v1, 0.0 }
0x2290   :  { %6973 = vmatprep.mubr.f32.mxu1 %v5810_v2 }
0x2291   :  { %6974 = vmatmul.mubr.f32.vlgmr.msra.gmra.mrb[52].mxu1 %v5811_v3 }
0x2364   :  { %v6975_v5 = vpop.f32.mrb[52].mxu1 }
0x2365   :  { %v5905_v8 = vadd.f32 %v6975_v5, %v6126_v4  ;;  %v5899_v10 = vpop.f32.mrb[53].mxu1 }
0x2366   :  { %v5900_v12 = vadd.f32 %v6126_v4, %v5899_v10 }
0x2367   :  { %v5909_v13 = vadd.f32 %v5905_v8, %v5719_v57 }
0x2368   :  { %v5908_v14 = vadd.f32 %v5900_v12, %v5718_v56 }
0x2369   :  { %v5913_v15 = vsel %vm140_vm1, %v5909_v13, 0.0 }
0x236a   :  { %v5912_v16 = vsel %vm140_vm1, %v5908_v14, 0.0 }
0x236b   :  { %v5914_v17 = vadd.f32 %v5913_v15, %v5912_v16 }
0x236d   :  { %v5915_v9 = vrot.slane %v5914_v17, 4 }
0x236f   :  { %v5916_v18 = vadd.f32 %v5915_v9, %v5914_v17 }
0x2371   :  { %v5917_v21 = vrot.slane %v5916_v18, 2 }
0x2373   :  { %v5918_v22 = vadd.f32 %v5917_v21, %v5916_v18 }
0x2375   :  { %v5919_v11 = vrot.slane %v5918_v22, 1 }
0x2377   :  { %v5920_v23 = vadd.f32 %v5919_v11, %v5918_v22 }
0x2379   :  { %v5921_v24 = vmul.f32 0.0625, %v5920_v23 }
0x237b   :  { %v5922_v25 = vsub.f32 %v5908_v14, %v5921_v24  ;;  %v5923_v26 = vsub.f32 %v5909_v13, %v5921_v24 }
0x237d   :  { %v5924_v29 = vmul.f32 %v5922_v25, %v5922_v25  ;;  %v5925_v31 = vmul.f32 %v5923_v26, %v5923_v26 }
0x237f   :  { %v5926_v27 = vsel %vm140_vm1, %v5924_v29, 0.0  ;;  %v5927_v32 = vsel %vm140_vm1, %v5925_v31, 0.0 }
0x2380   :  { %v5928_v33 = vadd.f32 %v5927_v32, %v5926_v27 }
0x2382   :  { %v5929_v34 = vrot.slane %v5928_v33, 4 }
0x2384   :  { %v5930_v30 = vadd.f32 %v5929_v34, %v5928_v33 }
0x2386   :  { %v5931_v35 = vrot.slane %v5930_v30, 2 }
0x2388   :  { %v5932_v36 = vadd.f32 %v5931_v35, %v5930_v30 }
0x238a   :  { %v5933_v37 = vrot.slane %v5932_v36, 1 }
0x238c   :  { %v5934_v38 = vadd.f32 %v5933_v37, %v5932_v36 }
0x238e   :  { %v5935_v39 = vmul.f32 0.0625, %v5934_v38 }
0x2390   :  { %v5936_v40 = vadd.f32 1e-05, %v5935_v39 }
0x2392   :  { %7341 = vrsqrt.f32 %v5936_v40 }
0x239c   :  { %v7342_v41 = vpop.eup %7341 }
0x239d   :  { %v5938_v7 = vmul.f32 %v7342_v41, %v5922_v25  ;;  %v5939_v6 = vmul.f32 %v7342_v41, %v5923_v26 }
0x239f   :  { %v5944_v43 = vmul.f32 %v6127_v42, %v5938_v7  ;;  %v5945_v44 = vmul.f32 %v6127_v42, %v5939_v6 }
0x23a1   :  { %v5950_v45 = vadd.f32 %v6128_v28, %v5944_v43  ;;  %v5951_v46 = vadd.f32 %v6128_v28, %v5945_v44 }
0x23a3   :  { %5952 = vst.msk [vmem:[#allocation7] sm:$0xff] %vm140_vm1, %v5950_v45  ;;  %5953 = vst.msk [vmem:[#allocation7 + $0x8] sm:$0xff] %vm140_vm1, %v5951_v46 }
0x23a4   :  { %7398 = shalt.err (!%p7395_p6)
}
0x23a5   :  { %s7399_s10 = scalar_lea.hbm %s7821_s2, 256 }
0x23a6   :  { %p7400_p7 = scmp.ne.s32.totalorder %s7821_s2, %s7399_s10  ;;  %p7403_p8 = scmp.lt.u32.totalorder %s7399_s10, %s7821_s2 }
0x23a8   :  { %p7405_p9 = pnand %p7403_p8, %p7400_p7 }
0x23aa   :  { %7408 = shalt.err (!%p7405_p9)
}
0x23ab   :  { %5965 = dma.vmem_to_hbm [thread:$0]  %s5960_s6, 256, %s7821_s2, [#allocation4], %s7416_s19, %s7416_s19, %s7417_s20  }
0x23ac   :  { %7413 = dma.done.wait [#allocation4], 256  }
0x23ad   :  { %7414 = vsyncadd [#allocation4], 4294967040 }
0x23ae   :  { %5969 = vsyncpa [#allocation3], 1 }
0x23af   :  { %5970 = vsyncpa [#allocation6], 1 }
0x23b0   :  { %5971 = vsyncpa [#allocation4], 1 }

</bundles_post_ra>
